<compile_context>
chip_gen: v5e
topology: v5e:2x2
jax: 0.10.0
libtpu: 0.0.40
codegen_flags: <defaults>
</compile_context>

<pallas_src>
import functools

import jax
import jax.numpy as jnp
from jax.experimental import pallas as pl
from jax.experimental.pallas import tpu as pltpu


# ----------------------------------------------------------------------------
# small helpers
# ----------------------------------------------------------------------------

def _round_up(x, m):
    return (x + m - 1) // m * m


def _pick_k_tile(kp):
    for t in (1024, 512, 256, 128):
        if kp % t == 0:
            return t
    return kp


# ----------------------------------------------------------------------------
# Pallas kernels
# ----------------------------------------------------------------------------

def _matmul_bias_act_kernel(x_ref, w_ref, b_ref, o_ref, acc_ref, *, relu):
    """One (tm, tn) output tile; K is the innermost ("arbitrary") grid axis."""
    k = pl.program_id(2)

    @pl.when(k == 0)
    def _init():
        acc_ref[...] = jnp.zeros_like(acc_ref)

    # bf16 x bf16 -> f32 accumulate on the MXU.
    acc_ref[...] += jnp.dot(x_ref[...], w_ref[...],
                            preferred_element_type=jnp.float32)

    @pl.when(k == pl.num_programs(2) - 1)
    def _epilogue():
        acc = acc_ref[...] + b_ref[...]          # f32 epilogue (v5e-safe)
        if relu:
            acc = jnp.maximum(acc, 0.0)
        o_ref[...] = acc.astype(o_ref.dtype)


def _maxpool3x3s2_kernel(x_ref, o_ref):
    """MaxPool2d(kernel_size=3, stride=2) on an NHWC block, read once."""
    _, H, W, _ = x_ref.shape
    _, Ho, Wo, _ = o_ref.shape
    x = x_ref[...]
    # 3-tap max along H (contiguous slices), then stride-2 subsample.
    hmax = jnp.maximum(jnp.maximum(x[:, 0:H - 2], x[:, 1:H - 1]), x[:, 2:H])
    hsub = jnp.concatenate([hmax[:, 2 * i:2 * i + 1] for i in range(Ho)],
                           axis=1)
    # 3-tap max along W, then stride-2 subsample.
    wmax = jnp.maximum(jnp.maximum(hsub[:, :, 0:W - 2], hsub[:, :, 1:W - 1]),
                       hsub[:, :, 2:W])
    o_ref[...] = jnp.concatenate(
        [wmax[:, :, 2 * j:2 * j + 1] for j in range(Wo)], axis=2)


def _adaptive_avgpool_kernel(x_ref, o_ref):
    """PyTorch AdaptiveAvgPool2d semantics, NHWC, single lane-dense store."""
    _, Hin, Win, _ = x_ref.shape
    _, Hout, Wout, _ = o_ref.shape
    x = x_ref[...]
    if Hin == 1 and Win == 1:
        # Degenerate case (64x64 inputs land here): pure broadcast, no means.
        row = jnp.concatenate([x] * Wout, axis=2)            # (B, 1, Wout, C)
        o_ref[...] = jnp.concatenate([row] * Hout, axis=1)   # (B, Hout, Wout, C)
        return
    rows = []
    for i in range(Hout):
        h0 = (i * Hin) // Hout
        h1 = -((-(i + 1) * Hin) // Hout)                     # ceil
        cols = []
        for j in range(Wout):
            w0 = (j * Win) // Wout
            w1 = -((-(j + 1) * Win) // Wout)
            cols.append(jnp.mean(x[:, h0:h1, w0:w1, :], axis=(1, 2),
                                 keepdims=True))             # (B, 1, 1, C)
        rows.append(jnp.concatenate(cols, axis=2))           # (B, 1, Wout, C)
    o_ref[...] = jnp.concatenate(rows, axis=1)


def _fc_head_kernel(x_ref, w1_ref, b1_ref, w2_ref, b2_ref, o_ref, acc_ref):
    """Fused AlexNet._fc (9216->feature) + RoomEncoder.fc_room (feature->res)."""
    k = pl.program_id(0)

    @pl.when(k == 0)
    def _init():
        acc_ref[...] = jnp.zeros_like(acc_ref)

    acc_ref[...] += jnp.dot(x_ref[...], w1_ref[...],
                            preferred_element_type=jnp.float32)

    @pl.when(k == pl.num_programs(0) - 1)
    def _epilogue():
        h = (acc_ref[...] + b1_ref[...]).astype(w2_ref.dtype)   # _fc (no act)
        y = jnp.dot(h, w2_ref[...], preferred_element_type=jnp.float32)
        o_ref[...] = y + b2_ref[...]                            # fc_room


# ----------------------------------------------------------------------------
# Layer wrappers (JAX glue around the Pallas kernels)
# ----------------------------------------------------------------------------

def matmul_bias_act(x, w_p, b_p, n_out, *, relu):
    """act(x @ w + b).  x: (M, K) f32; w_p: (Kp, Np) bf16 zero-padded;
    b_p: (1, Np) f32 zero-padded.  Returns (M, n_out) f32."""
    M, K = x.shape
    Kp, Np = w_p.shape
    assert Kp % 128 == 0 and Np % 128 == 0 and Kp >= K

    tm = 256 if M > 256 else _round_up(M, 8)      # cap the M tile (v7x VMEM)
    Mp = _round_up(M, tm)
    tn = 256 if Np % 256 == 0 else 128            # lane-dense, MXU-sized N tile
    tk = _pick_k_tile(Kp)

    x_p = x.astype(jnp.bfloat16)
    if Mp != M or Kp != K:
        x_p = jnp.pad(x_p, ((0, Mp - M), (0, Kp - K)))

    out = pl.pallas_call(
        functools.partial(_matmul_bias_act_kernel, relu=relu),
        grid=(Mp // tm, Np // tn, Kp // tk),
        in_specs=[
            pl.BlockSpec((tm, tk), lambda i, j, k: (i, k)),
            pl.BlockSpec((tk, tn), lambda i, j, k: (k, j)),
            pl.BlockSpec((1, tn), lambda i, j, k: (0, j)),
        ],
        out_specs=pl.BlockSpec((tm, tn), lambda i, j, k: (i, j)),
        out_shape=jax.ShapeDtypeStruct((Mp, Np), jnp.float32),
        scratch_shapes=[pltpu.VMEM((tm, tn), jnp.float32)],
        compiler_params=pltpu.CompilerParams(
            dimension_semantics=("parallel", "parallel", "arbitrary"),
            vmem_limit_bytes=32 * 1024 * 1024,
        ),
    )(x_p, w_p, b_p)
    return out[:M, :n_out]


def conv2d(x, layer_params, cfg, *, relu=True):
    """NHWC conv: im2col gather is glue; matmul+bias+ReLU is the Pallas kernel."""
    B, H, W, Cin = x.shape
    kh, kw, stride, pad = cfg["kh"], cfg["kw"], cfg["stride"], cfg["pad"]
    cout = cfg["cout"]
    xp = jnp.pad(x, ((0, 0), (pad, pad), (pad, pad), (0, 0)))
    Hp, Wp = H + 2 * pad, W + 2 * pad
    Ho = (Hp - kh) // stride + 1
    Wo = (Wp - kw) // stride + 1
    # TODO(synk): fold the (ky, kx) taps into the matmul kernel as an extra
    # "arbitrary" grid reduction axis (K = Cin per tap) to remove the kh*kw x
    # im2col HBM read amplification at large resolutions.
    slabs = []
    for ky in range(kh):
        for kx in range(kw):
            slabs.append(xp[:, ky:ky + stride * (Ho - 1) + 1:stride,
                             kx:kx + stride * (Wo - 1) + 1:stride, :])
    # K-axis order is (ky, kx, cin); the weight matrix built at init matches.
    cols = jnp.stack(slabs, axis=3).reshape(B * Ho * Wo, kh * kw * Cin)
    y = matmul_bias_act(cols, layer_params["w"], layer_params["b"], cout,
                        relu=relu)
    return y.reshape(B, Ho, Wo, cout)


def maxpool3x3s2(x):
    B, H, W, C = x.shape
    Ho = (H - 3) // 2 + 1
    Wo = (W - 3) // 2 + 1
    return pl.pallas_call(
        _maxpool3x3s2_kernel,
        grid=(1,),
        in_specs=[pl.BlockSpec((B, H, W, C), lambda i: (0, 0, 0, 0))],
        out_specs=pl.BlockSpec((B, Ho, Wo, C), lambda i: (0, 0, 0, 0)),
        out_shape=jax.ShapeDtypeStruct((B, Ho, Wo, C), x.dtype),
    )(x)


def adaptive_avgpool(x, out_hw=(6, 6)):
    B, H, W, C = x.shape
    Ho, Wo = out_hw
    return pl.pallas_call(
        _adaptive_avgpool_kernel,
        grid=(1,),
        in_specs=[pl.BlockSpec((B, H, W, C), lambda i: (0, 0, 0, 0))],
        out_specs=pl.BlockSpec((B, Ho, Wo, C), lambda i: (0, 0, 0, 0)),
        out_shape=jax.ShapeDtypeStruct((B, Ho, Wo, C), x.dtype),
    )(x)


def fc_head(x, head, *, res):
    """Fused _fc + fc_room.  x: (B, 9216) f32 (NHWC-flattened)."""
    B, K = x.shape
    w1, b1, w2, b2 = head["w1"], head["b1"], head["w2"], head["b2"]
    Kp, N1p = w1.shape
    _, N2p = w2.shape
    Mp = _round_up(B, 8)
    tk = _pick_k_tile(Kp)

    x_p = x.astype(jnp.bfloat16)
    if Mp != B or Kp != K:
        x_p = jnp.pad(x_p, ((0, Mp - B), (0, Kp - K)))

    out = pl.pallas_call(
        _fc_head_kernel,
        grid=(Kp // tk,),
        in_specs=[
            pl.BlockSpec((Mp, tk), lambda k: (0, k)),
            pl.BlockSpec((tk, N1p), lambda k: (k, 0)),
            pl.BlockSpec((1, N1p), lambda k: (0, 0)),
            pl.BlockSpec((N1p, N2p), lambda k: (0, 0)),
            pl.BlockSpec((1, N2p), lambda k: (0, 0)),
        ],
        out_specs=pl.BlockSpec((Mp, N2p), lambda k: (0, 0)),
        out_shape=jax.ShapeDtypeStruct((Mp, N2p), jnp.float32),
        scratch_shapes=[pltpu.VMEM((Mp, N1p), jnp.float32)],
        compiler_params=pltpu.CompilerParams(
            dimension_semantics=("arbitrary",),
            vmem_limit_bytes=32 * 1024 * 1024,
        ),
    )(x_p, w1, b1, w2, b2)
    return out[:B, :res]


# ----------------------------------------------------------------------------
# RoomEncoder configuration, parameter init and forward pass
# ----------------------------------------------------------------------------

def alexnet_conv_configs(input_channels):
    # torchvision AlexNet.features (conv1 swapped to `input_channels`).
    return (
        dict(name="conv1", cin=input_channels, cout=64, kh=11, kw=11,
             stride=4, pad=2, pool=True),
        dict(name="conv2", cin=64, cout=192, kh=5, kw=5, stride=1, pad=2,
             pool=True),
        dict(name="conv3", cin=192, cout=384, kh=3, kw=3, stride=1, pad=1,
             pool=False),
        dict(name="conv4", cin=384, cout=256, kh=3, kw=3, stride=1, pad=1,
             pool=False),
        dict(name="conv5", cin=256, cout=256, kh=3, kw=3, stride=1, pad=1,
             pool=True),
    )


def init_params(key, conv_cfgs, feature_size=64, res=256):
    keys = iter(jax.random.split(key, 2 * len(conv_cfgs) + 4))

    def pad_matrix(wmat, bias):
        K, N = wmat.shape
        Kp, Np = _round_up(K, 128), _round_up(N, 128)
        w_p = jnp.pad(wmat.astype(jnp.bfloat16), ((0, Kp - K), (0, Np - N)))
        b_p = jnp.pad(bias.astype(jnp.float32), (0, Np - N)).reshape(1, Np)
        return w_p, b_p

    params = {}
    for cfg in conv_cfgs:
        cout, cin, kh, kw = cfg["cout"], cfg["cin"], cfg["kh"], cfg["kw"]
        fan_in = cin * kh * kw
        w_oihw = jax.random.normal(next(keys), (cout, cin, kh, kw),
                                   jnp.float32) / jnp.sqrt(fan_in)
        b = 0.01 * jax.random.normal(next(keys), (cout,), jnp.float32)
        # (Cout, Cin, kh, kw) -> (kh*kw*Cin, Cout): matches im2col (ky,kx,cin).
        wmat = jnp.transpose(w_oihw, (2, 3, 1, 0)).reshape(fan_in, cout)
        w_p, b_p = pad_matrix(wmat, b)
        params[cfg["name"]] = dict(w=w_p, b=b_p)

    # AlexNet._fc : Linear(9216 -> feature_size).  Rows are generated in the
    # PyTorch NCHW-flatten order (c, h, w); the flatten permutation is folded
    # into the weight here so the runtime flatten can stay NHWC-native.
    fc_w = jax.random.normal(next(keys), (256 * 6 * 6, feature_size),
                             jnp.float32) / jnp.sqrt(256 * 6 * 6)
    fc_b = 0.01 * jax.random.normal(next(keys), (feature_size,), jnp.float32)
    fc_w = fc_w.reshape(256, 6, 6, feature_size)            # (c, h, w, out)
    fc_w = jnp.transpose(fc_w, (1, 2, 0, 3)).reshape(256 * 6 * 6, feature_size)

    # RoomEncoder.fc_room : Linear(feature_size -> res), stored as (K, N).
    fcr_w = jax.random.normal(next(keys), (feature_size, res),
                              jnp.float32) / jnp.sqrt(feature_size)
    fcr_b = 0.01 * jax.random.normal(next(keys), (res,), jnp.float32)

    w1_p, b1_p = pad_matrix(fc_w, fc_b)                      # (9216, N1p)
    n1p = w1_p.shape[1]
    n2p = _round_up(res, 128)
    w2_p = jnp.pad(fcr_w.astype(jnp.bfloat16),
                   ((0, n1p - feature_size), (0, n2p - res)))
    b2_p = jnp.pad(fcr_b.astype(jnp.float32), (0, n2p - res)).reshape(1, n2p)
    params["head"] = dict(w1=w1_p, b1=b1_p, w2=w2_p, b2=b2_p)
    return params


def room_encoder_forward(x_nchw, params, *, conv_cfgs, res):
    # Input is NCHW (PyTorch convention); compute runs in NHWC (C on lanes).
    x = jnp.transpose(x_nchw, (0, 2, 3, 1)).astype(jnp.float32)

    # AlexNet.features
    # TODO(synk): fuse conv3->conv4->conv5->maxpool into a single kernel with
    # activations resident in VMEM (they are only a few hundred KB here).
    for cfg in conv_cfgs:
        x = conv2d(x, params[cfg["name"]], cfg, relu=True)
        if cfg["pool"]:
            x = maxpool3x3s2(x)

    # AlexNet.avgpool = AdaptiveAvgPool2d((6, 6))
    x = adaptive_avgpool(x, (6, 6))                   # (B, 6, 6, 256)

    # NHWC-native flatten (the NCHW permutation is folded into fc's weight).
    x = x.reshape(x.shape[0], -1)                     # (B, 9216)

    # Fused AlexNet._fc + RoomEncoder.fc_room.
    return fc_head(x, params["head"], res=res)        # (B, res)


if __name__ == "__main__":
    key = jax.random.PRNGKey(0)
    pkey, xkey = jax.random.split(key)

    input_channels, feature_size, res = 1, 64, 256
    conv_cfgs = alexnet_conv_configs(input_channels)
    params = init_params(pkey, conv_cfgs, feature_size=feature_size, res=res)

    # AlexNet's feature stack needs spatial size >= 63; use 64x64 NCHW input.
    x = jax.random.normal(xkey, (2, input_channels, 64, 64), dtype=jnp.float32)

    fwd = jax.jit(functools.partial(room_encoder_forward,
                                    conv_cfgs=conv_cfgs, res=res))
    out = jax.block_until_ready(fwd(x, params))

    assert out.shape == (2, res), out.shape
    assert bool(jnp.all(jnp.isfinite(out)))
    print("KERNEL_OK")
</pallas_src>

<mosaic_0001>
module attributes {stable_mosaic.version = 11 : i64} {
  func.func @_matmul_bias_act_kernel(%arg0: i32, %arg1: i32, %arg2: i32, %arg3: memref<256x128xbf16, #tpu.memory_space<vmem>>, %arg4: memref<128x128xbf16, #tpu.memory_space<vmem>>, %arg5: memref<1x128xf32, #tpu.memory_space<vmem>>, %arg6: memref<256x128xf32, #tpu.memory_space<vmem>>, %arg7: memref<256x128xf32, #tpu.memory_space<vmem>>) attributes {dimension_semantics = [#tpu.dimension_semantics<parallel>, #tpu.dimension_semantics<parallel>, #tpu.dimension_semantics<arbitrary>], iteration_bounds = array<i64: 2, 1, 1>, scalar_prefetch = 0 : i64, scratch_operands = 1 : i64, tpu.core_type = #tpu.core_type<tc>, window_params = [{transform_indices = @transform_0, window_bounds = array<i64: 256, 128>}, {transform_indices = @transform_1, window_bounds = array<i64: 128, 128>}, {transform_indices = @transform_2, window_bounds = array<i64: 1, 128>}, {transform_indices = @transform_3, window_bounds = array<i64: 256, 128>}]} {
    %c0_i32 = arith.constant 0 : i32
    %0 = arith.cmpi eq, %arg2, %c0_i32 : i32
    %1 = arith.extui %0 : i1 to i32
    %c0_i32_0 = arith.constant 0 : i32
    %2 = arith.cmpi ne, %1, %c0_i32_0 : i32
    scf.if %2 {
      %cst_10 = arith.constant 0.000000e+00 : f32
      %12 = vector.broadcast %cst_10 : f32 to vector<256x128xf32>
      %c0_11 = arith.constant 0 : index
      %c0_12 = arith.constant 0 : index
      %13 = vector.load %arg7[%c0_11, %c0_12] : memref<256x128xf32, #tpu.memory_space<vmem>>, vector<256x128xf32>
      tpu.vector_store %arg7[%c0_11, %c0_12], %12 {strides = array<i32>} : memref<256x128xf32, #tpu.memory_space<vmem>>, vector<256x128xf32>,
    } else {
    }
    %c0 = arith.constant 0 : index
    %c0_1 = arith.constant 0 : index
    %3 = vector.load %arg7[%c0, %c0_1] : memref<256x128xf32, #tpu.memory_space<vmem>>, vector<256x128xf32>
    %c0_2 = arith.constant 0 : index
    %c0_3 = arith.constant 0 : index
    %4 = vector.load %arg3[%c0_2, %c0_3] : memref<256x128xbf16, #tpu.memory_space<vmem>>, vector<256x128xbf16>
    %c0_4 = arith.constant 0 : index
    %c0_5 = arith.constant 0 : index
    %5 = vector.load %arg4[%c0_4, %c0_5] : memref<128x128xbf16, #tpu.memory_space<vmem>>, vector<128x128xbf16>
    %cst = arith.constant dense<0.000000e+00> : vector<256x128xf32>
    %6 = tpu.matmul %4, %5, %cst {dimension_numbers = #tpu.dot_dimension_numbers<[1], [0], [0], [1], [0, 0, 1, 1], [], []>} : vector<256x128xbf16>, vector<128x128xbf16>, vector<256x128xf32> -> vector<256x128xf32>
    %7 = arith.addf %3, %6 : vector<256x128xf32>
    %c0_6 = arith.constant 0 : index
    %c0_7 = arith.constant 0 : index
    %8 = vector.load %arg7[%c0_6, %c0_7] : memref<256x128xf32, #tpu.memory_space<vmem>>, vector<256x128xf32>
    tpu.vector_store %arg7[%c0_6, %c0_7], %7 {strides = array<i32>} : memref<256x128xf32, #tpu.memory_space<vmem>>, vector<256x128xf32>,
    %c0_i32_8 = arith.constant 0 : i32
    %9 = arith.cmpi eq, %arg2, %c0_i32_8 : i32
    %10 = arith.extui %9 : i1 to i32
    %c0_i32_9 = arith.constant 0 : i32
    %11 = arith.cmpi ne, %10, %c0_i32_9 : i32
    scf.if %11 {
      %c0_10 = arith.constant 0 : index
      %c0_11 = arith.constant 0 : index
      %12 = vector.load %arg7[%c0_10, %c0_11] : memref<256x128xf32, #tpu.memory_space<vmem>>, vector<256x128xf32>
      %c0_12 = arith.constant 0 : index
      %c0_13 = arith.constant 0 : index
      %13 = vector.load %arg5[%c0_12, %c0_13] : memref<1x128xf32, #tpu.memory_space<vmem>>, vector<1x128xf32>
      %14 = vector.broadcast %13 : vector<1x128xf32> to vector<256x128xf32>
      %15 = arith.addf %12, %14 : vector<256x128xf32>
      %cst_14 = arith.constant 0.000000e+00 : f32
      %16 = vector.broadcast %cst_14 : f32 to vector<256x128xf32>
      %17 = arith.maximumf %15, %16 : vector<256x128xf32>
      %c0_15 = arith.constant 0 : index
      %c0_16 = arith.constant 0 : index
      %18 = vector.load %arg6[%c0_15, %c0_16] : memref<256x128xf32, #tpu.memory_space<vmem>>, vector<256x128xf32>
      tpu.vector_store %arg6[%c0_15, %c0_16], %17 {strides = array<i32>} : memref<256x128xf32, #tpu.memory_space<vmem>>, vector<256x128xf32>,
    } else {
    }
    return
  }
  func.func @transform_0(%arg0: i32, %arg1: i32, %arg2: i32) -> (i32, i32) {
    %c0_i32 = arith.constant 0 : i32
    return %arg0, %arg2 : i32, i32
  }
  func.func @transform_1(%arg0: i32, %arg1: i32, %arg2: i32) -> (i32, i32) {
    %c0_i32 = arith.constant 0 : i32
    return %arg2, %arg1 : i32, i32
  }
  func.func @transform_2(%arg0: i32, %arg1: i32, %arg2: i32) -> (i32, i32) {
    %c0_i32 = arith.constant 0 : i32
    %c0_i32_0 = arith.constant 0 : i32
    return %c0_i32, %arg1 : i32, i32
  }
  func.func @transform_3(%arg0: i32, %arg1: i32, %arg2: i32) -> (i32, i32) {
    %c0_i32 = arith.constant 0 : i32
    return %arg0, %arg1 : i32, i32
  }
}

module attributes {stable_mosaic.version = 11 : i64} {
  func.func @_maxpool3x3s2_kernel(%arg0: i32, %arg1: memref<2x15x15x64xf32, #tpu.memory_space<vmem>>, %arg2: memref<2x7x7x64xf32, #tpu.memory_space<vmem>>) attributes {dimension_semantics = [#tpu.dimension_semantics<arbitrary>], iteration_bounds = array<i64: 1>, scalar_prefetch = 0 : i64, scratch_operands = 0 : i64, tpu.core_type = #tpu.core_type<tc>, window_params = [{pipeline_mode = #tpu.pipeline_mode<synchronous>, transform_indices = @transform_0, window_bounds = array<i64: 2, 15, 15, 64>}, {pipeline_mode = #tpu.pipeline_mode<synchronous>, transform_indices = @transform_1, window_bounds = array<i64: 2, 7, 7, 64>}]} {
    %c0 = arith.constant 0 : index
    %c0_0 = arith.constant 0 : index
    %c0_1 = arith.constant 0 : index
    %c0_2 = arith.constant 0 : index
    %0 = vector.load %arg1[%c0, %c0_0, %c0_1, %c0_2] : memref<2x15x15x64xf32, #tpu.memory_space<vmem>>, vector<2x15x15x64xf32>
    %1 = vector.extract_strided_slice %0 {offsets = [0, 0, 0, 0], sizes = [2, 13, 15, 64], strides = [1, 1, 1, 1]} : vector<2x15x15x64xf32> to vector<2x13x15x64xf32>
    %2 = vector.extract_strided_slice %0 {offsets = [0, 1, 0, 0], sizes = [2, 13, 15, 64], strides = [1, 1, 1, 1]} : vector<2x15x15x64xf32> to vector<2x13x15x64xf32>
    %3 = arith.maximumf %1, %2 : vector<2x13x15x64xf32>
    %4 = vector.extract_strided_slice %0 {offsets = [0, 2, 0, 0], sizes = [2, 13, 15, 64], strides = [1, 1, 1, 1]} : vector<2x15x15x64xf32> to vector<2x13x15x64xf32>
    %5 = arith.maximumf %3, %4 : vector<2x13x15x64xf32>
    %6 = vector.extract_strided_slice %5 {offsets = [0, 0, 0, 0], sizes = [2, 1, 15, 64], strides = [1, 1, 1, 1]} : vector<2x13x15x64xf32> to vector<2x1x15x64xf32>
    %7 = vector.extract_strided_slice %5 {offsets = [0, 2, 0, 0], sizes = [2, 1, 15, 64], strides = [1, 1, 1, 1]} : vector<2x13x15x64xf32> to vector<2x1x15x64xf32>
    %8 = vector.extract_strided_slice %5 {offsets = [0, 4, 0, 0], sizes = [2, 1, 15, 64], strides = [1, 1, 1, 1]} : vector<2x13x15x64xf32> to vector<2x1x15x64xf32>
    %9 = vector.extract_strided_slice %5 {offsets = [0, 6, 0, 0], sizes = [2, 1, 15, 64], strides = [1, 1, 1, 1]} : vector<2x13x15x64xf32> to vector<2x1x15x64xf32>
    %10 = vector.extract_strided_slice %5 {offsets = [0, 8, 0, 0], sizes = [2, 1, 15, 64], strides = [1, 1, 1, 1]} : vector<2x13x15x64xf32> to vector<2x1x15x64xf32>
    %11 = vector.extract_strided_slice %5 {offsets = [0, 10, 0, 0], sizes = [2, 1, 15, 64], strides = [1, 1, 1, 1]} : vector<2x13x15x64xf32> to vector<2x1x15x64xf32>
    %12 = vector.extract_strided_slice %5 {offsets = [0, 12, 0, 0], sizes = [2, 1, 15, 64], strides = [1, 1, 1, 1]} : vector<2x13x15x64xf32> to vector<2x1x15x64xf32>
    %13 = tpu.concatenate %6, %7, %8, %9, %10, %11, %12 in 1 : vector<2x1x15x64xf32>, vector<2x1x15x64xf32>, vector<2x1x15x64xf32>, vector<2x1x15x64xf32>, vector<2x1x15x64xf32>, vector<2x1x15x64xf32>, vector<2x1x15x64xf32> -> vector<2x7x15x64xf32>
    %14 = vector.extract_strided_slice %13 {offsets = [0, 0, 0, 0], sizes = [2, 7, 13, 64], strides = [1, 1, 1, 1]} : vector<2x7x15x64xf32> to vector<2x7x13x64xf32>
    %15 = vector.extract_strided_slice %13 {offsets = [0, 0, 1, 0], sizes = [2, 7, 13, 64], strides = [1, 1, 1, 1]} : vector<2x7x15x64xf32> to vector<2x7x13x64xf32>
    %16 = arith.maximumf %14, %15 : vector<2x7x13x64xf32>
    %17 = vector.extract_strided_slice %13 {offsets = [0, 0, 2, 0], sizes = [2, 7, 13, 64], strides = [1, 1, 1, 1]} : vector<2x7x15x64xf32> to vector<2x7x13x64xf32>
    %18 = arith.maximumf %16, %17 : vector<2x7x13x64xf32>
    %19 = vector.extract_strided_slice %18 {offsets = [0, 0, 0, 0], sizes = [2, 7, 1, 64], strides = [1, 1, 1, 1]} : vector<2x7x13x64xf32> to vector<2x7x1x64xf32>
    %20 = vector.extract_strided_slice %18 {offsets = [0, 0, 2, 0], sizes = [2, 7, 1, 64], strides = [1, 1, 1, 1]} : vector<2x7x13x64xf32> to vector<2x7x1x64xf32>
    %21 = vector.extract_strided_slice %18 {offsets = [0, 0, 4, 0], sizes = [2, 7, 1, 64], strides = [1, 1, 1, 1]} : vector<2x7x13x64xf32> to vector<2x7x1x64xf32>
    %22 = vector.extract_strided_slice %18 {offsets = [0, 0, 6, 0], sizes = [2, 7, 1, 64], strides = [1, 1, 1, 1]} : vector<2x7x13x64xf32> to vector<2x7x1x64xf32>
    %23 = vector.extract_strided_slice %18 {offsets = [0, 0, 8, 0], sizes = [2, 7, 1, 64], strides = [1, 1, 1, 1]} : vector<2x7x13x64xf32> to vector<2x7x1x64xf32>
    %24 = vector.extract_strided_slice %18 {offsets = [0, 0, 10, 0], sizes = [2, 7, 1, 64], strides = [1, 1, 1, 1]} : vector<2x7x13x64xf32> to vector<2x7x1x64xf32>
    %25 = vector.extract_strided_slice %18 {offsets = [0, 0, 12, 0], sizes = [2, 7, 1, 64], strides = [1, 1, 1, 1]} : vector<2x7x13x64xf32> to vector<2x7x1x64xf32>
    %26 = tpu.concatenate %19, %20, %21, %22, %23, %24, %25 in 2 : vector<2x7x1x64xf32>, vector<2x7x1x64xf32>, vector<2x7x1x64xf32>, vector<2x7x1x64xf32>, vector<2x7x1x64xf32>, vector<2x7x1x64xf32>, vector<2x7x1x64xf32> -> vector<2x7x7x64xf32>
    %c0_3 = arith.constant 0 : index
    %c0_4 = arith.constant 0 : index
    %c0_5 = arith.constant 0 : index
    %c0_6 = arith.constant 0 : index
    %27 = vector.load %arg2[%c0_3, %c0_4, %c0_5, %c0_6] : memref<2x7x7x64xf32, #tpu.memory_space<vmem>>, vector<2x7x7x64xf32>
    tpu.vector_store %arg2[%c0_3, %c0_4, %c0_5, %c0_6], %26 {strides = array<i32>} : memref<2x7x7x64xf32, #tpu.memory_space<vmem>>, vector<2x7x7x64xf32>,
    return
  }
  func.func @transform_0(%arg0: i32) -> (i32, i32, i32, i32) {
    %c0_i32 = arith.constant 0 : i32
    %c0_i32_0 = arith.constant 0 : i32
    %c0_i32_1 = arith.constant 0 : i32
    %c0_i32_2 = arith.constant 0 : i32
    %c0_i32_3 = arith.constant 0 : i32
    return %c0_i32, %c0_i32_0, %c0_i32_1, %c0_i32_2 : i32, i32, i32, i32
  }
  func.func @transform_1(%arg0: i32) -> (i32, i32, i32, i32) {
    %c0_i32 = arith.constant 0 : i32
    %c0_i32_0 = arith.constant 0 : i32
    %c0_i32_1 = arith.constant 0 : i32
    %c0_i32_2 = arith.constant 0 : i32
    %c0_i32_3 = arith.constant 0 : i32
    return %c0_i32, %c0_i32_0, %c0_i32_1, %c0_i32_2 : i32, i32, i32, i32
  }
}

module attributes {stable_mosaic.version = 11 : i64} {
  func.func @_matmul_bias_act_kernel(%arg0: i32, %arg1: i32, %arg2: i32, %arg3: memref<104x128xbf16, #tpu.memory_space<vmem>>, %arg4: memref<128x256xbf16, #tpu.memory_space<vmem>>, %arg5: memref<1x256xf32, #tpu.memory_space<vmem>>, %arg6: memref<104x256xf32, #tpu.memory_space<vmem>>, %arg7: memref<104x256xf32, #tpu.memory_space<vmem>>) attributes {dimension_semantics = [#tpu.dimension_semantics<parallel>, #tpu.dimension_semantics<parallel>, #tpu.dimension_semantics<arbitrary>], iteration_bounds = array<i64: 1, 1, 13>, scalar_prefetch = 0 : i64, scratch_operands = 1 : i64, tpu.core_type = #tpu.core_type<tc>, window_params = [{transform_indices = @transform_0, window_bounds = array<i64: 104, 128>}, {transform_indices = @transform_1, window_bounds = array<i64: 128, 256>}, {transform_indices = @transform_2, window_bounds = array<i64: 1, 256>}, {transform_indices = @transform_3, window_bounds = array<i64: 104, 256>}]} {
    %c0_i32 = arith.constant 0 : i32
    %0 = arith.cmpi eq, %arg2, %c0_i32 : i32
    %1 = arith.extui %0 : i1 to i32
    %c0_i32_0 = arith.constant 0 : i32
    %2 = arith.cmpi ne, %1, %c0_i32_0 : i32
    scf.if %2 {
      %cst_9 = arith.constant 0.000000e+00 : f32
      %12 = vector.broadcast %cst_9 : f32 to vector<104x256xf32>
      %c0_10 = arith.constant 0 : index
      %c0_11 = arith.constant 0 : index
      %13 = vector.load %arg7[%c0_10, %c0_11] : memref<104x256xf32, #tpu.memory_space<vmem>>, vector<104x256xf32>
      tpu.vector_store %arg7[%c0_10, %c0_11], %12 {strides = array<i32>} : memref<104x256xf32, #tpu.memory_space<vmem>>, vector<104x256xf32>,
    } else {
    }
    %c0 = arith.constant 0 : index
    %c0_1 = arith.constant 0 : index
    %3 = vector.load %arg7[%c0, %c0_1] : memref<104x256xf32, #tpu.memory_space<vmem>>, vector<104x256xf32>
    %c0_2 = arith.constant 0 : index
    %c0_3 = arith.constant 0 : index
    %4 = vector.load %arg3[%c0_2, %c0_3] : memref<104x128xbf16, #tpu.memory_space<vmem>>, vector<104x128xbf16>
    %c0_4 = arith.constant 0 : index
    %c0_5 = arith.constant 0 : index
    %5 = vector.load %arg4[%c0_4, %c0_5] : memref<128x256xbf16, #tpu.memory_space<vmem>>, vector<128x256xbf16>
    %cst = arith.constant dense<0.000000e+00> : vector<104x256xf32>
    %6 = tpu.matmul %4, %5, %cst {dimension_numbers = #tpu.dot_dimension_numbers<[1], [0], [0], [1], [0, 0, 1, 1], [], []>} : vector<104x128xbf16>, vector<128x256xbf16>, vector<104x256xf32> -> vector<104x256xf32>
    %7 = arith.addf %3, %6 : vector<104x256xf32>
    %c0_6 = arith.constant 0 : index
    %c0_7 = arith.constant 0 : index
    %8 = vector.load %arg7[%c0_6, %c0_7] : memref<104x256xf32, #tpu.memory_space<vmem>>, vector<104x256xf32>
    tpu.vector_store %arg7[%c0_6, %c0_7], %7 {strides = array<i32>} : memref<104x256xf32, #tpu.memory_space<vmem>>, vector<104x256xf32>,
    %c12_i32 = arith.constant 12 : i32
    %9 = arith.cmpi eq, %arg2, %c12_i32 : i32
    %10 = arith.extui %9 : i1 to i32
    %c0_i32_8 = arith.constant 0 : i32
    %11 = arith.cmpi ne, %10, %c0_i32_8 : i32
    scf.if %11 {
      %c0_9 = arith.constant 0 : index
      %c0_10 = arith.constant 0 : index
      %12 = vector.load %arg7[%c0_9, %c0_10] : memref<104x256xf32, #tpu.memory_space<vmem>>, vector<104x256xf32>
      %c0_11 = arith.constant 0 : index
      %c0_12 = arith.constant 0 : index
      %13 = vector.load %arg5[%c0_11, %c0_12] : memref<1x256xf32, #tpu.memory_space<vmem>>, vector<1x256xf32>
      %14 = vector.broadcast %13 : vector<1x256xf32> to vector<104x256xf32>
      %15 = arith.addf %12, %14 : vector<104x256xf32>
      %cst_13 = arith.constant 0.000000e+00 : f32
      %16 = vector.broadcast %cst_13 : f32 to vector<104x256xf32>
      %17 = arith.maximumf %15, %16 : vector<104x256xf32>
      %c0_14 = arith.constant 0 : index
      %c0_15 = arith.constant 0 : index
      %18 = vector.load %arg6[%c0_14, %c0_15] : memref<104x256xf32, #tpu.memory_space<vmem>>, vector<104x256xf32>
      tpu.vector_store %arg6[%c0_14, %c0_15], %17 {strides = array<i32>} : memref<104x256xf32, #tpu.memory_space<vmem>>, vector<104x256xf32>,
    } else {
    }
    return
  }
  func.func @transform_0(%arg0: i32, %arg1: i32, %arg2: i32) -> (i32, i32) {
    %c0_i32 = arith.constant 0 : i32
    return %arg0, %arg2 : i32, i32
  }
  func.func @transform_1(%arg0: i32, %arg1: i32, %arg2: i32) -> (i32, i32) {
    %c0_i32 = arith.constant 0 : i32
    return %arg2, %arg1 : i32, i32
  }
  func.func @transform_2(%arg0: i32, %arg1: i32, %arg2: i32) -> (i32, i32) {
    %c0_i32 = arith.constant 0 : i32
    %c0_i32_0 = arith.constant 0 : i32
    return %c0_i32, %arg1 : i32, i32
  }
  func.func @transform_3(%arg0: i32, %arg1: i32, %arg2: i32) -> (i32, i32) {
    %c0_i32 = arith.constant 0 : i32
    return %arg0, %arg1 : i32, i32
  }
}

module attributes {stable_mosaic.version = 11 : i64} {
  func.func @_maxpool3x3s2_kernel(%arg0: i32, %arg1: memref<2x7x7x192xf32, #tpu.memory_space<vmem>>, %arg2: memref<2x3x3x192xf32, #tpu.memory_space<vmem>>) attributes {dimension_semantics = [#tpu.dimension_semantics<arbitrary>], iteration_bounds = array<i64: 1>, scalar_prefetch = 0 : i64, scratch_operands = 0 : i64, tpu.core_type = #tpu.core_type<tc>, window_params = [{pipeline_mode = #tpu.pipeline_mode<synchronous>, transform_indices = @transform_0, window_bounds = array<i64: 2, 7, 7, 192>}, {pipeline_mode = #tpu.pipeline_mode<synchronous>, transform_indices = @transform_1, window_bounds = array<i64: 2, 3, 3, 192>}]} {
    %c0 = arith.constant 0 : index
    %c0_0 = arith.constant 0 : index
    %c0_1 = arith.constant 0 : index
    %c0_2 = arith.constant 0 : index
    %0 = vector.load %arg1[%c0, %c0_0, %c0_1, %c0_2] : memref<2x7x7x192xf32, #tpu.memory_space<vmem>>, vector<2x7x7x192xf32>
    %1 = vector.extract_strided_slice %0 {offsets = [0, 0, 0, 0], sizes = [2, 5, 7, 192], strides = [1, 1, 1, 1]} : vector<2x7x7x192xf32> to vector<2x5x7x192xf32>
    %2 = vector.extract_strided_slice %0 {offsets = [0, 1, 0, 0], sizes = [2, 5, 7, 192], strides = [1, 1, 1, 1]} : vector<2x7x7x192xf32> to vector<2x5x7x192xf32>
    %3 = arith.maximumf %1, %2 : vector<2x5x7x192xf32>
    %4 = vector.extract_strided_slice %0 {offsets = [0, 2, 0, 0], sizes = [2, 5, 7, 192], strides = [1, 1, 1, 1]} : vector<2x7x7x192xf32> to vector<2x5x7x192xf32>
    %5 = arith.maximumf %3, %4 : vector<2x5x7x192xf32>
    %6 = vector.extract_strided_slice %5 {offsets = [0, 0, 0, 0], sizes = [2, 1, 7, 192], strides = [1, 1, 1, 1]} : vector<2x5x7x192xf32> to vector<2x1x7x192xf32>
    %7 = vector.extract_strided_slice %5 {offsets = [0, 2, 0, 0], sizes = [2, 1, 7, 192], strides = [1, 1, 1, 1]} : vector<2x5x7x192xf32> to vector<2x1x7x192xf32>
    %8 = vector.extract_strided_slice %5 {offsets = [0, 4, 0, 0], sizes = [2, 1, 7, 192], strides = [1, 1, 1, 1]} : vector<2x5x7x192xf32> to vector<2x1x7x192xf32>
    %9 = tpu.concatenate %6, %7, %8 in 1 : vector<2x1x7x192xf32>, vector<2x1x7x192xf32>, vector<2x1x7x192xf32> -> vector<2x3x7x192xf32>
    %10 = vector.extract_strided_slice %9 {offsets = [0, 0, 0, 0], sizes = [2, 3, 5, 192], strides = [1, 1, 1, 1]} : vector<2x3x7x192xf32> to vector<2x3x5x192xf32>
    %11 = vector.extract_strided_slice %9 {offsets = [0, 0, 1, 0], sizes = [2, 3, 5, 192], strides = [1, 1, 1, 1]} : vector<2x3x7x192xf32> to vector<2x3x5x192xf32>
    %12 = arith.maximumf %10, %11 : vector<2x3x5x192xf32>
    %13 = vector.extract_strided_slice %9 {offsets = [0, 0, 2, 0], sizes = [2, 3, 5, 192], strides = [1, 1, 1, 1]} : vector<2x3x7x192xf32> to vector<2x3x5x192xf32>
    %14 = arith.maximumf %12, %13 : vector<2x3x5x192xf32>
    %15 = vector.extract_strided_slice %14 {offsets = [0, 0, 0, 0], sizes = [2, 3, 1, 192], strides = [1, 1, 1, 1]} : vector<2x3x5x192xf32> to vector<2x3x1x192xf32>
    %16 = vector.extract_strided_slice %14 {offsets = [0, 0, 2, 0], sizes = [2, 3, 1, 192], strides = [1, 1, 1, 1]} : vector<2x3x5x192xf32> to vector<2x3x1x192xf32>
    %17 = vector.extract_strided_slice %14 {offsets = [0, 0, 4, 0], sizes = [2, 3, 1, 192], strides = [1, 1, 1, 1]} : vector<2x3x5x192xf32> to vector<2x3x1x192xf32>
    %18 = tpu.concatenate %15, %16, %17 in 2 : vector<2x3x1x192xf32>, vector<2x3x1x192xf32>, vector<2x3x1x192xf32> -> vector<2x3x3x192xf32>
    %c0_3 = arith.constant 0 : index
    %c0_4 = arith.constant 0 : index
    %c0_5 = arith.constant 0 : index
    %c0_6 = arith.constant 0 : index
    %19 = vector.load %arg2[%c0_3, %c0_4, %c0_5, %c0_6] : memref<2x3x3x192xf32, #tpu.memory_space<vmem>>, vector<2x3x3x192xf32>
    tpu.vector_store %arg2[%c0_3, %c0_4, %c0_5, %c0_6], %18 {strides = array<i32>} : memref<2x3x3x192xf32, #tpu.memory_space<vmem>>, vector<2x3x3x192xf32>,
    return
  }
  func.func @transform_0(%arg0: i32) -> (i32, i32, i32, i32) {
    %c0_i32 = arith.constant 0 : i32
    %c0_i32_0 = arith.constant 0 : i32
    %c0_i32_1 = arith.constant 0 : i32
    %c0_i32_2 = arith.constant 0 : i32
    %c0_i32_3 = arith.constant 0 : i32
    return %c0_i32, %c0_i32_0, %c0_i32_1, %c0_i32_2 : i32, i32, i32, i32
  }
  func.func @transform_1(%arg0: i32) -> (i32, i32, i32, i32) {
    %c0_i32 = arith.constant 0 : i32
    %c0_i32_0 = arith.constant 0 : i32
    %c0_i32_1 = arith.constant 0 : i32
    %c0_i32_2 = arith.constant 0 : i32
    %c0_i32_3 = arith.constant 0 : i32
    return %c0_i32, %c0_i32_0, %c0_i32_1, %c0_i32_2 : i32, i32, i32, i32
  }
}

module attributes {stable_mosaic.version = 11 : i64} {
  func.func @_matmul_bias_act_kernel(%arg0: i32, %arg1: i32, %arg2: i32, %arg3: memref<24x256xbf16, #tpu.memory_space<vmem>>, %arg4: memref<256x128xbf16, #tpu.memory_space<vmem>>, %arg5: memref<1x128xf32, #tpu.memory_space<vmem>>, %arg6: memref<24x128xf32, #tpu.memory_space<vmem>>, %arg7: memref<24x128xf32, #tpu.memory_space<vmem>>) attributes {dimension_semantics = [#tpu.dimension_semantics<parallel>, #tpu.dimension_semantics<parallel>, #tpu.dimension_semantics<arbitrary>], iteration_bounds = array<i64: 1, 3, 7>, scalar_prefetch = 0 : i64, scratch_operands = 1 : i64, tpu.core_type = #tpu.core_type<tc>, window_params = [{transform_indices = @transform_0, window_bounds = array<i64: 24, 256>}, {transform_indices = @transform_1, window_bounds = array<i64: 256, 128>}, {transform_indices = @transform_2, window_bounds = array<i64: 1, 128>}, {transform_indices = @transform_3, window_bounds = array<i64: 24, 128>}]} {
    %c0_i32 = arith.constant 0 : i32
    %0 = arith.cmpi eq, %arg2, %c0_i32 : i32
    %1 = arith.extui %0 : i1 to i32
    %c0_i32_0 = arith.constant 0 : i32
    %2 = arith.cmpi ne, %1, %c0_i32_0 : i32
    scf.if %2 {
      %cst_9 = arith.constant 0.000000e+00 : f32
      %12 = vector.broadcast %cst_9 : f32 to vector<24x128xf32>
      %c0_10 = arith.constant 0 : index
      %c0_11 = arith.constant 0 : index
      %13 = vector.load %arg7[%c0_10, %c0_11] : memref<24x128xf32, #tpu.memory_space<vmem>>, vector<24x128xf32>
      tpu.vector_store %arg7[%c0_10, %c0_11], %12 {strides = array<i32>} : memref<24x128xf32, #tpu.memory_space<vmem>>, vector<24x128xf32>,
    } else {
    }
    %c0 = arith.constant 0 : index
    %c0_1 = arith.constant 0 : index
    %3 = vector.load %arg7[%c0, %c0_1] : memref<24x128xf32, #tpu.memory_space<vmem>>, vector<24x128xf32>
    %c0_2 = arith.constant 0 : index
    %c0_3 = arith.constant 0 : index
    %4 = vector.load %arg3[%c0_2, %c0_3] : memref<24x256xbf16, #tpu.memory_space<vmem>>, vector<24x256xbf16>
    %c0_4 = arith.constant 0 : index
    %c0_5 = arith.constant 0 : index
    %5 = vector.load %arg4[%c0_4, %c0_5] : memref<256x128xbf16, #tpu.memory_space<vmem>>, vector<256x128xbf16>
    %cst = arith.constant dense<0.000000e+00> : vector<24x128xf32>
    %6 = tpu.matmul %4, %5, %cst {dimension_numbers = #tpu.dot_dimension_numbers<[1], [0], [0], [1], [0, 0, 1, 1], [], []>} : vector<24x256xbf16>, vector<256x128xbf16>, vector<24x128xf32> -> vector<24x128xf32>
    %7 = arith.addf %3, %6 : vector<24x128xf32>
    %c0_6 = arith.constant 0 : index
    %c0_7 = arith.constant 0 : index
    %8 = vector.load %arg7[%c0_6, %c0_7] : memref<24x128xf32, #tpu.memory_space<vmem>>, vector<24x128xf32>
    tpu.vector_store %arg7[%c0_6, %c0_7], %7 {strides = array<i32>} : memref<24x128xf32, #tpu.memory_space<vmem>>, vector<24x128xf32>,
    %c6_i32 = arith.constant 6 : i32
    %9 = arith.cmpi eq, %arg2, %c6_i32 : i32
    %10 = arith.extui %9 : i1 to i32
    %c0_i32_8 = arith.constant 0 : i32
    %11 = arith.cmpi ne, %10, %c0_i32_8 : i32
    scf.if %11 {
      %c0_9 = arith.constant 0 : index
      %c0_10 = arith.constant 0 : index
      %12 = vector.load %arg7[%c0_9, %c0_10] : memref<24x128xf32, #tpu.memory_space<vmem>>, vector<24x128xf32>
      %c0_11 = arith.constant 0 : index
      %c0_12 = arith.constant 0 : index
      %13 = vector.load %arg5[%c0_11, %c0_12] : memref<1x128xf32, #tpu.memory_space<vmem>>, vector<1x128xf32>
      %14 = vector.broadcast %13 : vector<1x128xf32> to vector<24x128xf32>
      %15 = arith.addf %12, %14 : vector<24x128xf32>
      %cst_13 = arith.constant 0.000000e+00 : f32
      %16 = vector.broadcast %cst_13 : f32 to vector<24x128xf32>
      %17 = arith.maximumf %15, %16 : vector<24x128xf32>
      %c0_14 = arith.constant 0 : index
      %c0_15 = arith.constant 0 : index
      %18 = vector.load %arg6[%c0_14, %c0_15] : memref<24x128xf32, #tpu.memory_space<vmem>>, vector<24x128xf32>
      tpu.vector_store %arg6[%c0_14, %c0_15], %17 {strides = array<i32>} : memref<24x128xf32, #tpu.memory_space<vmem>>, vector<24x128xf32>,
    } else {
    }
    return
  }
  func.func @transform_0(%arg0: i32, %arg1: i32, %arg2: i32) -> (i32, i32) {
    %c0_i32 = arith.constant 0 : i32
    return %arg0, %arg2 : i32, i32
  }
  func.func @transform_1(%arg0: i32, %arg1: i32, %arg2: i32) -> (i32, i32) {
    %c0_i32 = arith.constant 0 : i32
    return %arg2, %arg1 : i32, i32
  }
  func.func @transform_2(%arg0: i32, %arg1: i32, %arg2: i32) -> (i32, i32) {
    %c0_i32 = arith.constant 0 : i32
    %c0_i32_0 = arith.constant 0 : i32
    return %c0_i32, %arg1 : i32, i32
  }
  func.func @transform_3(%arg0: i32, %arg1: i32, %arg2: i32) -> (i32, i32) {
    %c0_i32 = arith.constant 0 : i32
    return %arg0, %arg1 : i32, i32
  }
}

module attributes {stable_mosaic.version = 11 : i64} {
  func.func @_matmul_bias_act_kernel(%arg0: i32, %arg1: i32, %arg2: i32, %arg3: memref<24x128xbf16, #tpu.memory_space<vmem>>, %arg4: memref<128x256xbf16, #tpu.memory_space<vmem>>, %arg5: memref<1x256xf32, #tpu.memory_space<vmem>>, %arg6: memref<24x256xf32, #tpu.memory_space<vmem>>, %arg7: memref<24x256xf32, #tpu.memory_space<vmem>>) attributes {dimension_semantics = [#tpu.dimension_semantics<parallel>, #tpu.dimension_semantics<parallel>, #tpu.dimension_semantics<arbitrary>], iteration_bounds = array<i64: 1, 1, 27>, scalar_prefetch = 0 : i64, scratch_operands = 1 : i64, tpu.core_type = #tpu.core_type<tc>, window_params = [{transform_indices = @transform_0, window_bounds = array<i64: 24, 128>}, {transform_indices = @transform_1, window_bounds = array<i64: 128, 256>}, {transform_indices = @transform_2, window_bounds = array<i64: 1, 256>}, {transform_indices = @transform_3, window_bounds = array<i64: 24, 256>}]} {
    %c0_i32 = arith.constant 0 : i32
    %0 = arith.cmpi eq, %arg2, %c0_i32 : i32
    %1 = arith.extui %0 : i1 to i32
    %c0_i32_0 = arith.constant 0 : i32
    %2 = arith.cmpi ne, %1, %c0_i32_0 : i32
    scf.if %2 {
      %cst_9 = arith.constant 0.000000e+00 : f32
      %12 = vector.broadcast %cst_9 : f32 to vector<24x256xf32>
      %c0_10 = arith.constant 0 : index
      %c0_11 = arith.constant 0 : index
      %13 = vector.load %arg7[%c0_10, %c0_11] : memref<24x256xf32, #tpu.memory_space<vmem>>, vector<24x256xf32>
      tpu.vector_store %arg7[%c0_10, %c0_11], %12 {strides = array<i32>} : memref<24x256xf32, #tpu.memory_space<vmem>>, vector<24x256xf32>,
    } else {
    }
    %c0 = arith.constant 0 : index
    %c0_1 = arith.constant 0 : index
    %3 = vector.load %arg7[%c0, %c0_1] : memref<24x256xf32, #tpu.memory_space<vmem>>, vector<24x256xf32>
    %c0_2 = arith.constant 0 : index
    %c0_3 = arith.constant 0 : index
    %4 = vector.load %arg3[%c0_2, %c0_3] : memref<24x128xbf16, #tpu.memory_space<vmem>>, vector<24x128xbf16>
    %c0_4 = arith.constant 0 : index
    %c0_5 = arith.constant 0 : index
    %5 = vector.load %arg4[%c0_4, %c0_5] : memref<128x256xbf16, #tpu.memory_space<vmem>>, vector<128x256xbf16>
    %cst = arith.constant dense<0.000000e+00> : vector<24x256xf32>
    %6 = tpu.matmul %4, %5, %cst {dimension_numbers = #tpu.dot_dimension_numbers<[1], [0], [0], [1], [0, 0, 1, 1], [], []>} : vector<24x128xbf16>, vector<128x256xbf16>, vector<24x256xf32> -> vector<24x256xf32>
    %7 = arith.addf %3, %6 : vector<24x256xf32>
    %c0_6 = arith.constant 0 : index
    %c0_7 = arith.constant 0 : index
    %8 = vector.load %arg7[%c0_6, %c0_7] : memref<24x256xf32, #tpu.memory_space<vmem>>, vector<24x256xf32>
    tpu.vector_store %arg7[%c0_6, %c0_7], %7 {strides = array<i32>} : memref<24x256xf32, #tpu.memory_space<vmem>>, vector<24x256xf32>,
    %c26_i32 = arith.constant 26 : i32
    %9 = arith.cmpi eq, %arg2, %c26_i32 : i32
    %10 = arith.extui %9 : i1 to i32
    %c0_i32_8 = arith.constant 0 : i32
    %11 = arith.cmpi ne, %10, %c0_i32_8 : i32
    scf.if %11 {
      %c0_9 = arith.constant 0 : index
      %c0_10 = arith.constant 0 : index
      %12 = vector.load %arg7[%c0_9, %c0_10] : memref<24x256xf32, #tpu.memory_space<vmem>>, vector<24x256xf32>
      %c0_11 = arith.constant 0 : index
      %c0_12 = arith.constant 0 : index
      %13 = vector.load %arg5[%c0_11, %c0_12] : memref<1x256xf32, #tpu.memory_space<vmem>>, vector<1x256xf32>
      %14 = vector.broadcast %13 : vector<1x256xf32> to vector<24x256xf32>
      %15 = arith.addf %12, %14 : vector<24x256xf32>
      %cst_13 = arith.constant 0.000000e+00 : f32
      %16 = vector.broadcast %cst_13 : f32 to vector<24x256xf32>
      %17 = arith.maximumf %15, %16 : vector<24x256xf32>
      %c0_14 = arith.constant 0 : index
      %c0_15 = arith.constant 0 : index
      %18 = vector.load %arg6[%c0_14, %c0_15] : memref<24x256xf32, #tpu.memory_space<vmem>>, vector<24x256xf32>
      tpu.vector_store %arg6[%c0_14, %c0_15], %17 {strides = array<i32>} : memref<24x256xf32, #tpu.memory_space<vmem>>, vector<24x256xf32>,
    } else {
    }
    return
  }
  func.func @transform_0(%arg0: i32, %arg1: i32, %arg2: i32) -> (i32, i32) {
    %c0_i32 = arith.constant 0 : i32
    return %arg0, %arg2 : i32, i32
  }
  func.func @transform_1(%arg0: i32, %arg1: i32, %arg2: i32) -> (i32, i32) {
    %c0_i32 = arith.constant 0 : i32
    return %arg2, %arg1 : i32, i32
  }
  func.func @transform_2(%arg0: i32, %arg1: i32, %arg2: i32) -> (i32, i32) {
    %c0_i32 = arith.constant 0 : i32
    %c0_i32_0 = arith.constant 0 : i32
    return %c0_i32, %arg1 : i32, i32
  }
  func.func @transform_3(%arg0: i32, %arg1: i32, %arg2: i32) -> (i32, i32) {
    %c0_i32 = arith.constant 0 : i32
    return %arg0, %arg1 : i32, i32
  }
}

module attributes {stable_mosaic.version = 11 : i64} {
  func.func @_adaptive_avgpool_kernel(%arg0: i32, %arg1: memref<2x1x1x256xf32, #tpu.memory_space<vmem>>, %arg2: memref<2x6x6x256xf32, #tpu.memory_space<vmem>>) attributes {dimension_semantics = [#tpu.dimension_semantics<arbitrary>], iteration_bounds = array<i64: 1>, scalar_prefetch = 0 : i64, scratch_operands = 0 : i64, tpu.core_type = #tpu.core_type<tc>, window_params = [{pipeline_mode = #tpu.pipeline_mode<synchronous>, transform_indices = @transform_0, window_bounds = array<i64: 2, 1, 1, 256>}, {pipeline_mode = #tpu.pipeline_mode<synchronous>, transform_indices = @transform_1, window_bounds = array<i64: 2, 6, 6, 256>}]} {
    %c0 = arith.constant 0 : index
    %c0_0 = arith.constant 0 : index
    %c0_1 = arith.constant 0 : index
    %c0_2 = arith.constant 0 : index
    %0 = vector.load %arg1[%c0, %c0_0, %c0_1, %c0_2] : memref<2x1x1x256xf32, #tpu.memory_space<vmem>>, vector<2x1x1x256xf32>
    %1 = tpu.concatenate %0, %0, %0, %0, %0, %0 in 2 : vector<2x1x1x256xf32>, vector<2x1x1x256xf32>, vector<2x1x1x256xf32>, vector<2x1x1x256xf32>, vector<2x1x1x256xf32>, vector<2x1x1x256xf32> -> vector<2x1x6x256xf32>
    %2 = tpu.concatenate %1, %1, %1, %1, %1, %1 in 1 : vector<2x1x6x256xf32>, vector<2x1x6x256xf32>, vector<2x1x6x256xf32>, vector<2x1x6x256xf32>, vector<2x1x6x256xf32>, vector<2x1x6x256xf32> -> vector<2x6x6x256xf32>
    %c0_3 = arith.constant 0 : index
    %c0_4 = arith.constant 0 : index
    %c0_5 = arith.constant 0 : index
    %c0_6 = arith.constant 0 : index
    %3 = vector.load %arg2[%c0_3, %c0_4, %c0_5, %c0_6] : memref<2x6x6x256xf32, #tpu.memory_space<vmem>>, vector<2x6x6x256xf32>
    tpu.vector_store %arg2[%c0_3, %c0_4, %c0_5, %c0_6], %2 {strides = array<i32>} : memref<2x6x6x256xf32, #tpu.memory_space<vmem>>, vector<2x6x6x256xf32>,
    return
  }
  func.func @transform_0(%arg0: i32) -> (i32, i32, i32, i32) {
    %c0_i32 = arith.constant 0 : i32
    %c0_i32_0 = arith.constant 0 : i32
    %c0_i32_1 = arith.constant 0 : i32
    %c0_i32_2 = arith.constant 0 : i32
    %c0_i32_3 = arith.constant 0 : i32
    return %c0_i32, %c0_i32_0, %c0_i32_1, %c0_i32_2 : i32, i32, i32, i32
  }
  func.func @transform_1(%arg0: i32) -> (i32, i32, i32, i32) {
    %c0_i32 = arith.constant 0 : i32
    %c0_i32_0 = arith.constant 0 : i32
    %c0_i32_1 = arith.constant 0 : i32
    %c0_i32_2 = arith.constant 0 : i32
    %c0_i32_3 = arith.constant 0 : i32
    return %c0_i32, %c0_i32_0, %c0_i32_1, %c0_i32_2 : i32, i32, i32, i32
  }
}

module attributes {stable_mosaic.version = 11 : i64} {
  func.func @_matmul_bias_act_kernel(%arg0: i32, %arg1: i32, %arg2: i32, %arg3: memref<24x256xbf16, #tpu.memory_space<vmem>>, %arg4: memref<256x256xbf16, #tpu.memory_space<vmem>>, %arg5: memref<1x256xf32, #tpu.memory_space<vmem>>, %arg6: memref<24x256xf32, #tpu.memory_space<vmem>>, %arg7: memref<24x256xf32, #tpu.memory_space<vmem>>) attributes {dimension_semantics = [#tpu.dimension_semantics<parallel>, #tpu.dimension_semantics<parallel>, #tpu.dimension_semantics<arbitrary>], iteration_bounds = array<i64: 1, 1, 9>, scalar_prefetch = 0 : i64, scratch_operands = 1 : i64, tpu.core_type = #tpu.core_type<tc>, window_params = [{transform_indices = @transform_0, window_bounds = array<i64: 24, 256>}, {transform_indices = @transform_1, window_bounds = array<i64: 256, 256>}, {transform_indices = @transform_2, window_bounds = array<i64: 1, 256>}, {transform_indices = @transform_3, window_bounds = array<i64: 24, 256>}]} {
    %c0_i32 = arith.constant 0 : i32
    %0 = arith.cmpi eq, %arg2, %c0_i32 : i32
    %1 = arith.extui %0 : i1 to i32
    %c0_i32_0 = arith.constant 0 : i32
    %2 = arith.cmpi ne, %1, %c0_i32_0 : i32
    scf.if %2 {
      %cst_9 = arith.constant 0.000000e+00 : f32
      %12 = vector.broadcast %cst_9 : f32 to vector<24x256xf32>
      %c0_10 = arith.constant 0 : index
      %c0_11 = arith.constant 0 : index
      %13 = vector.load %arg7[%c0_10, %c0_11] : memref<24x256xf32, #tpu.memory_space<vmem>>, vector<24x256xf32>
      tpu.vector_store %arg7[%c0_10, %c0_11], %12 {strides = array<i32>} : memref<24x256xf32, #tpu.memory_space<vmem>>, vector<24x256xf32>,
    } else {
    }
    %c0 = arith.constant 0 : index
    %c0_1 = arith.constant 0 : index
    %3 = vector.load %arg7[%c0, %c0_1] : memref<24x256xf32, #tpu.memory_space<vmem>>, vector<24x256xf32>
    %c0_2 = arith.constant 0 : index
    %c0_3 = arith.constant 0 : index
    %4 = vector.load %arg3[%c0_2, %c0_3] : memref<24x256xbf16, #tpu.memory_space<vmem>>, vector<24x256xbf16>
    %c0_4 = arith.constant 0 : index
    %c0_5 = arith.constant 0 : index
    %5 = vector.load %arg4[%c0_4, %c0_5] : memref<256x256xbf16, #tpu.memory_space<vmem>>, vector<256x256xbf16>
    %cst = arith.constant dense<0.000000e+00> : vector<24x256xf32>
    %6 = tpu.matmul %4, %5, %cst {dimension_numbers = #tpu.dot_dimension_numbers<[1], [0], [0], [1], [0, 0, 1, 1], [], []>} : vector<24x256xbf16>, vector<256x256xbf16>, vector<24x256xf32> -> vector<24x256xf32>
    %7 = arith.addf %3, %6 : vector<24x256xf32>
    %c0_6 = arith.constant 0 : index
    %c0_7 = arith.constant 0 : index
    %8 = vector.load %arg7[%c0_6, %c0_7] : memref<24x256xf32, #tpu.memory_space<vmem>>, vector<24x256xf32>
    tpu.vector_store %arg7[%c0_6, %c0_7], %7 {strides = array<i32>} : memref<24x256xf32, #tpu.memory_space<vmem>>, vector<24x256xf32>,
    %c8_i32 = arith.constant 8 : i32
    %9 = arith.cmpi eq, %arg2, %c8_i32 : i32
    %10 = arith.extui %9 : i1 to i32
    %c0_i32_8 = arith.constant 0 : i32
    %11 = arith.cmpi ne, %10, %c0_i32_8 : i32
    scf.if %11 {
      %c0_9 = arith.constant 0 : index
      %c0_10 = arith.constant 0 : index
      %12 = vector.load %arg7[%c0_9, %c0_10] : memref<24x256xf32, #tpu.memory_space<vmem>>, vector<24x256xf32>
      %c0_11 = arith.constant 0 : index
      %c0_12 = arith.constant 0 : index
      %13 = vector.load %arg5[%c0_11, %c0_12] : memref<1x256xf32, #tpu.memory_space<vmem>>, vector<1x256xf32>
      %14 = vector.broadcast %13 : vector<1x256xf32> to vector<24x256xf32>
      %15 = arith.addf %12, %14 : vector<24x256xf32>
      %cst_13 = arith.constant 0.000000e+00 : f32
      %16 = vector.broadcast %cst_13 : f32 to vector<24x256xf32>
      %17 = arith.maximumf %15, %16 : vector<24x256xf32>
      %c0_14 = arith.constant 0 : index
      %c0_15 = arith.constant 0 : index
      %18 = vector.load %arg6[%c0_14, %c0_15] : memref<24x256xf32, #tpu.memory_space<vmem>>, vector<24x256xf32>
      tpu.vector_store %arg6[%c0_14, %c0_15], %17 {strides = array<i32>} : memref<24x256xf32, #tpu.memory_space<vmem>>, vector<24x256xf32>,
    } else {
    }
    return
  }
  func.func @transform_0(%arg0: i32, %arg1: i32, %arg2: i32) -> (i32, i32) {
    %c0_i32 = arith.constant 0 : i32
    return %arg0, %arg2 : i32, i32
  }
  func.func @transform_1(%arg0: i32, %arg1: i32, %arg2: i32) -> (i32, i32) {
    %c0_i32 = arith.constant 0 : i32
    return %arg2, %arg1 : i32, i32
  }
  func.func @transform_2(%arg0: i32, %arg1: i32, %arg2: i32) -> (i32, i32) {
    %c0_i32 = arith.constant 0 : i32
    %c0_i32_0 = arith.constant 0 : i32
    return %c0_i32, %arg1 : i32, i32
  }
  func.func @transform_3(%arg0: i32, %arg1: i32, %arg2: i32) -> (i32, i32) {
    %c0_i32 = arith.constant 0 : i32
    return %arg0, %arg1 : i32, i32
  }
}

module attributes {stable_mosaic.version = 11 : i64} {
  func.func @_maxpool3x3s2_kernel(%arg0: i32, %arg1: memref<2x3x3x256xf32, #tpu.memory_space<vmem>>, %arg2: memref<2x1x1x256xf32, #tpu.memory_space<vmem>>) attributes {dimension_semantics = [#tpu.dimension_semantics<arbitrary>], iteration_bounds = array<i64: 1>, scalar_prefetch = 0 : i64, scratch_operands = 0 : i64, tpu.core_type = #tpu.core_type<tc>, window_params = [{pipeline_mode = #tpu.pipeline_mode<synchronous>, transform_indices = @transform_0, window_bounds = array<i64: 2, 3, 3, 256>}, {pipeline_mode = #tpu.pipeline_mode<synchronous>, transform_indices = @transform_1, window_bounds = array<i64: 2, 1, 1, 256>}]} {
    %c0 = arith.constant 0 : index
    %c0_0 = arith.constant 0 : index
    %c0_1 = arith.constant 0 : index
    %c0_2 = arith.constant 0 : index
    %0 = vector.load %arg1[%c0, %c0_0, %c0_1, %c0_2] : memref<2x3x3x256xf32, #tpu.memory_space<vmem>>, vector<2x3x3x256xf32>
    %1 = vector.extract_strided_slice %0 {offsets = [0, 0, 0, 0], sizes = [2, 1, 3, 256], strides = [1, 1, 1, 1]} : vector<2x3x3x256xf32> to vector<2x1x3x256xf32>
    %2 = vector.extract_strided_slice %0 {offsets = [0, 1, 0, 0], sizes = [2, 1, 3, 256], strides = [1, 1, 1, 1]} : vector<2x3x3x256xf32> to vector<2x1x3x256xf32>
    %3 = arith.maximumf %1, %2 : vector<2x1x3x256xf32>
    %4 = vector.extract_strided_slice %0 {offsets = [0, 2, 0, 0], sizes = [2, 1, 3, 256], strides = [1, 1, 1, 1]} : vector<2x3x3x256xf32> to vector<2x1x3x256xf32>
    %5 = arith.maximumf %3, %4 : vector<2x1x3x256xf32>
    %6 = vector.extract_strided_slice %5 {offsets = [0, 0, 0, 0], sizes = [2, 1, 1, 256], strides = [1, 1, 1, 1]} : vector<2x1x3x256xf32> to vector<2x1x1x256xf32>
    %7 = vector.extract_strided_slice %5 {offsets = [0, 0, 1, 0], sizes = [2, 1, 1, 256], strides = [1, 1, 1, 1]} : vector<2x1x3x256xf32> to vector<2x1x1x256xf32>
    %8 = arith.maximumf %6, %7 : vector<2x1x1x256xf32>
    %9 = vector.extract_strided_slice %5 {offsets = [0, 0, 2, 0], sizes = [2, 1, 1, 256], strides = [1, 1, 1, 1]} : vector<2x1x3x256xf32> to vector<2x1x1x256xf32>
    %10 = arith.maximumf %8, %9 : vector<2x1x1x256xf32>
    %c0_3 = arith.constant 0 : index
    %c0_4 = arith.constant 0 : index
    %c0_5 = arith.constant 0 : index
    %c0_6 = arith.constant 0 : index
    %11 = vector.load %arg2[%c0_3, %c0_4, %c0_5, %c0_6] : memref<2x1x1x256xf32, #tpu.memory_space<vmem>>, vector<2x1x1x256xf32>
    tpu.vector_store %arg2[%c0_3, %c0_4, %c0_5, %c0_6], %10 {strides = array<i32>} : memref<2x1x1x256xf32, #tpu.memory_space<vmem>>, vector<2x1x1x256xf32>,
    return
  }
  func.func @transform_0(%arg0: i32) -> (i32, i32, i32, i32) {
    %c0_i32 = arith.constant 0 : i32
    %c0_i32_0 = arith.constant 0 : i32
    %c0_i32_1 = arith.constant 0 : i32
    %c0_i32_2 = arith.constant 0 : i32
    %c0_i32_3 = arith.constant 0 : i32
    return %c0_i32, %c0_i32_0, %c0_i32_1, %c0_i32_2 : i32, i32, i32, i32
  }
  func.func @transform_1(%arg0: i32) -> (i32, i32, i32, i32) {
    %c0_i32 = arith.constant 0 : i32
    %c0_i32_0 = arith.constant 0 : i32
    %c0_i32_1 = arith.constant 0 : i32
    %c0_i32_2 = arith.constant 0 : i32
    %c0_i32_3 = arith.constant 0 : i32
    return %c0_i32, %c0_i32_0, %c0_i32_1, %c0_i32_2 : i32, i32, i32, i32
  }
}

module attributes {stable_mosaic.version = 11 : i64} {
  func.func @_fc_head_kernel(%arg0: i32, %arg1: memref<8x1024xbf16, #tpu.memory_space<vmem>>, %arg2: memref<1024x128xbf16, #tpu.memory_space<vmem>>, %arg3: memref<1x128xf32, #tpu.memory_space<vmem>>, %arg4: memref<128x256xbf16, #tpu.memory_space<vmem>>, %arg5: memref<1x256xf32, #tpu.memory_space<vmem>>, %arg6: memref<8x256xf32, #tpu.memory_space<vmem>>, %arg7: memref<8x128xf32, #tpu.memory_space<vmem>>) attributes {dimension_semantics = [#tpu.dimension_semantics<arbitrary>], iteration_bounds = array<i64: 9>, scalar_prefetch = 0 : i64, scratch_operands = 1 : i64, tpu.core_type = #tpu.core_type<tc>, window_params = [{transform_indices = @transform_0, window_bounds = array<i64: 8, 1024>}, {transform_indices = @transform_1, window_bounds = array<i64: 1024, 128>}, {pipeline_mode = #tpu.pipeline_mode<synchronous>, transform_indices = @transform_2, window_bounds = array<i64: 1, 128>}, {pipeline_mode = #tpu.pipeline_mode<synchronous>, transform_indices = @transform_3, window_bounds = array<i64: 128, 256>}, {pipeline_mode = #tpu.pipeline_mode<synchronous>, transform_indices = @transform_4, window_bounds = array<i64: 1, 256>}, {pipeline_mode = #tpu.pipeline_mode<synchronous>, transform_indices = @transform_5, window_bounds = array<i64: 8, 256>}]} {
    %c0_i32 = arith.constant 0 : i32
    %0 = arith.cmpi eq, %arg0, %c0_i32 : i32
    %1 = arith.extui %0 : i1 to i32
    %c0_i32_0 = arith.constant 0 : i32
    %2 = arith.cmpi ne, %1, %c0_i32_0 : i32
    scf.if %2 {
      %cst_9 = arith.constant 0.000000e+00 : f32
      %12 = vector.broadcast %cst_9 : f32 to vector<8x128xf32>
      %c0_10 = arith.constant 0 : index
      %c0_11 = arith.constant 0 : index
      %13 = vector.load %arg7[%c0_10, %c0_11] : memref<8x128xf32, #tpu.memory_space<vmem>>, vector<8x128xf32>
      tpu.vector_store %arg7[%c0_10, %c0_11], %12 {strides = array<i32>} : memref<8x128xf32, #tpu.memory_space<vmem>>, vector<8x128xf32>,
    } else {
    }
    %c0 = arith.constant 0 : index
    %c0_1 = arith.constant 0 : index
    %3 = vector.load %arg7[%c0, %c0_1] : memref<8x128xf32, #tpu.memory_space<vmem>>, vector<8x128xf32>
    %c0_2 = arith.constant 0 : index
    %c0_3 = arith.constant 0 : index
    %4 = vector.load %arg1[%c0_2, %c0_3] : memref<8x1024xbf16, #tpu.memory_space<vmem>>, vector<8x1024xbf16>
    %c0_4 = arith.constant 0 : index
    %c0_5 = arith.constant 0 : index
    %5 = vector.load %arg2[%c0_4, %c0_5] : memref<1024x128xbf16, #tpu.memory_space<vmem>>, vector<1024x128xbf16>
    %cst = arith.constant dense<0.000000e+00> : vector<8x128xf32>
    %6 = tpu.matmul %4, %5, %cst {dimension_numbers = #tpu.dot_dimension_numbers<[1], [0], [0], [1], [0, 0, 1, 1], [], []>} : vector<8x1024xbf16>, vector<1024x128xbf16>, vector<8x128xf32> -> vector<8x128xf32>
    %7 = arith.addf %3, %6 : vector<8x128xf32>
    %c0_6 = arith.constant 0 : index
    %c0_7 = arith.constant 0 : index
    %8 = vector.load %arg7[%c0_6, %c0_7] : memref<8x128xf32, #tpu.memory_space<vmem>>, vector<8x128xf32>
    tpu.vector_store %arg7[%c0_6, %c0_7], %7 {strides = array<i32>} : memref<8x128xf32, #tpu.memory_space<vmem>>, vector<8x128xf32>,
    %c8_i32 = arith.constant 8 : i32
    %9 = arith.cmpi eq, %arg0, %c8_i32 : i32
    %10 = arith.extui %9 : i1 to i32
    %c0_i32_8 = arith.constant 0 : i32
    %11 = arith.cmpi ne, %10, %c0_i32_8 : i32
    scf.if %11 {
      %c0_9 = arith.constant 0 : index
      %c0_10 = arith.constant 0 : index
      %12 = vector.load %arg7[%c0_9, %c0_10] : memref<8x128xf32, #tpu.memory_space<vmem>>, vector<8x128xf32>
      %c0_11 = arith.constant 0 : index
      %c0_12 = arith.constant 0 : index
      %13 = vector.load %arg3[%c0_11, %c0_12] : memref<1x128xf32, #tpu.memory_space<vmem>>, vector<1x128xf32>
      %14 = vector.broadcast %13 : vector<1x128xf32> to vector<8x128xf32>
      %15 = arith.addf %12, %14 : vector<8x128xf32>
      %16 = arith.truncf %15 : vector<8x128xf32> to vector<8x128xbf16>
      %c0_13 = arith.constant 0 : index
      %c0_14 = arith.constant 0 : index
      %17 = vector.load %arg4[%c0_13, %c0_14] : memref<128x256xbf16, #tpu.memory_space<vmem>>, vector<128x256xbf16>
      %cst_15 = arith.constant dense<0.000000e+00> : vector<8x256xf32>
      %18 = tpu.matmul %16, %17, %cst_15 {dimension_numbers = #tpu.dot_dimension_numbers<[1], [0], [0], [1], [0, 0, 1, 1], [], []>} : vector<8x128xbf16>, vector<128x256xbf16>, vector<8x256xf32> -> vector<8x256xf32>
      %c0_16 = arith.constant 0 : index
      %c0_17 = arith.constant 0 : index
      %19 = vector.load %arg5[%c0_16, %c0_17] : memref<1x256xf32, #tpu.memory_space<vmem>>, vector<1x256xf32>
      %20 = vector.broadcast %19 : vector<1x256xf32> to vector<8x256xf32>
      %21 = arith.addf %18, %20 : vector<8x256xf32>
      %c0_18 = arith.constant 0 : index
      %c0_19 = arith.constant 0 : index
      %22 = vector.load %arg6[%c0_18, %c0_19] : memref<8x256xf32, #tpu.memory_space<vmem>>, vector<8x256xf32>
      tpu.vector_store %arg6[%c0_18, %c0_19], %21 {strides = array<i32>} : memref<8x256xf32, #tpu.memory_space<vmem>>, vector<8x256xf32>,
    } else {
    }
    return
  }
  func.func @transform_0(%arg0: i32) -> (i32, i32) {
    %c0_i32 = arith.constant 0 : i32
    %c0_i32_0 = arith.constant 0 : i32
    return %c0_i32, %arg0 : i32, i32
  }
  func.func @transform_1(%arg0: i32) -> (i32, i32) {
    %c0_i32 = arith.constant 0 : i32
    %c0_i32_0 = arith.constant 0 : i32
    return %arg0, %c0_i32 : i32, i32
  }
  func.func @transform_2(%arg0: i32) -> (i32, i32) {
    %c0_i32 = arith.constant 0 : i32
    %c0_i32_0 = arith.constant 0 : i32
    %c0_i32_1 = arith.constant 0 : i32
    return %c0_i32, %c0_i32_0 : i32, i32
  }
  func.func @transform_3(%arg0: i32) -> (i32, i32) {
    %c0_i32 = arith.constant 0 : i32
    %c0_i32_0 = arith.constant 0 : i32
    %c0_i32_1 = arith.constant 0 : i32
    return %c0_i32, %c0_i32_0 : i32, i32
  }
  func.func @transform_4(%arg0: i32) -> (i32, i32) {
    %c0_i32 = arith.constant 0 : i32
    %c0_i32_0 = arith.constant 0 : i32
    %c0_i32_1 = arith.constant 0 : i32
    return %c0_i32, %c0_i32_0 : i32, i32
  }
  func.func @transform_5(%arg0: i32) -> (i32, i32) {
    %c0_i32 = arith.constant 0 : i32
    %c0_i32_0 = arith.constant 0 : i32
    %c0_i32_1 = arith.constant 0 : i32
    return %c0_i32, %c0_i32_0 : i32, i32
  }
}

</mosaic_0001>

<bundles_post_ra>
// kernel: room_encoder_forward.10
= control target key start
LH: loop header
LB: loop body
LE: loop exit
PB: predicated region body
PF: predicated region fallthrough
CT: control target
= control target key end

     0   :  { %s1144_s12 = smov 0   ;;  %s1146_s13 = smov 0   ;;  %s1297_s0 = inlined_call_operand.vmem [shape: bf16[512,128], index: 0, kind: input, shape index: {}]   ;;  %s1298_s1 = inlined_call_operand.vmem [shape: bf16[128,128], index: 1, kind: input, shape index: {}]   ;;  %s1299_s2 = inlined_call_operand.vmem [shape: f32[1,128], index: 2, kind: input, shape index: {}]   ;;  %s1300_s3 = inlined_call_operand.vmem [shape: f32[512,128], index: 3, kind: output, shape index: {}]  }
   0x1   :  { %s1148_s14 = smov 0  }
   0x2 LB: > { %s32_s15 = sadd.s32 1, %s1118_s13  ;;  %p924_p0 = scmp.ge.s32.totalorder %s1122_s14, 1  ;;  %s1122_s14 = sphi %s1148_s14, %s13_s14   ;;  %s1118_s13 = sphi %s1146_s13, %s1302_s13   ;;  %s1114_s12 = sphi %s1144_s12, %s1301_s12  }
   0x3   : > { %p34_p1 = scmp.ge.s32.totalorder %s32_s15, 2  ;;  %p188_p2 = scmp.lt.s32.totalorder %s1122_s14, 3 }
   0x5   : > { %s1304_s15 = smov (%p34_p1, %s32_s15), 0  ;;  %p189_p3 = pnand %p924_p0, %p188_p2 }
   0x6   : > { %s925_s24 = sshll.u32 (!%p189_p3), %s1114_s12, 5 }
   0x7   : > { %192 = sbr.rel (%p189_p3) target bundleno = 239 (0xef), region = 32  ;;  %p230_p4 = scmp.lt.s32.totalorder (!%p189_p3), %s925_s24, 63 }
   0xc   : > { %v1050_v0 = vld [vmem:[%s1298_s1 + $0x38] sm:$0xff]  ;;  %v1049_v1 = vld [vmem:[%s1298_s1 + $0x30] sm:$0xff]  ;;  %v1048_v2 = vld [vmem:[%s1298_s1 + $0x28] sm:$0xff]  ;;  %s1306_s24 = smov (!%p230_p4, %s925_s24), 63 }
   0xd   : > { %519 = vmatpush.bf16.msra.mxu0 %v1050_v0  ;;  %1051 = vmatpush.bf16.msra.mxu1 %v1050_v0  ;;  %v1047_v3 = vld [vmem:[%s1298_s1 + $0x20] sm:$0xff]  ;;  %v1046_v4 = vld [vmem:[%s1298_s1 + $0x18] sm:$0xff]  ;;  %v1045_v5 = vld [vmem:[%s1298_s1 + $0x10] sm:$0xff]  ;;  %s926_s4 = sshll.u32 %s1306_s24, 2  ;;  %s928_s12 = sshll.u32 %s1306_s24, 3 }
   0xe   : > { %1052 = vmatpush.bf16.msra.mxu2 %v1050_v0  ;;  %1053 = vmatpush.bf16.msra.mxu3 %v1050_v0  ;;  %v1044_v6 = vld [vmem:[%s1298_s1 + $0x8] sm:$0xff]  ;;  %v1043_v7 = vld [vmem:[%s1298_s1] sm:$0xff]  ;;  %s1195_s9 = scalar_lea.vmem %s1297_s0, %s926_s4  ;;  %s1224_s18 = scalar_lea.vmem %s1300_s3, %s928_s12 }
   0xf   : > { %v1027_v8 = vld [vmem:[%s1195_s9] sm:$0xff]  ;;  %v1028_v12 = vld [vmem:[%s1195_s9 + $0x8] sm:$0xff]  ;;  %v1029_v16 = vld [vmem:[%s1195_s9 + $0x10] sm:$0xff] }
  0x10   : > { %v1031_v9 = vld [vmem:[%s1195_s9 + $0x20] sm:$0xff]  ;;  %v1032_v13 = vld [vmem:[%s1195_s9 + $0x28] sm:$0xff]  ;;  %v1033_v17 = vld [vmem:[%s1195_s9 + $0x30] sm:$0xff] }
  0x11   : > { %520 = vmatpush.bf16.msra.mxu0 %v1049_v1  ;;  %1054 = vmatpush.bf16.msra.mxu1 %v1049_v1  ;;  %v1035_v10 = vld [vmem:[%s1195_s9 + $0x40] sm:$0xff]  ;;  %v1036_v14 = vld [vmem:[%s1195_s9 + $0x48] sm:$0xff]  ;;  %v1037_v18 = vld [vmem:[%s1195_s9 + $0x50] sm:$0xff] }
  0x12   : > { %1055 = vmatpush.bf16.msra.mxu2 %v1049_v1  ;;  %1056 = vmatpush.bf16.msra.mxu3 %v1049_v1  ;;  %v1039_v11 = vld [vmem:[%s1195_s9 + $0x60] sm:$0xff]  ;;  %v1040_v15 = vld [vmem:[%s1195_s9 + $0x68] sm:$0xff]  ;;  %v1041_v19 = vld [vmem:[%s1195_s9 + $0x70] sm:$0xff] }
  0x13   : > { %v1030_v20 = vld [vmem:[%s1195_s9 + $0x18] sm:$0xff]  ;;  %v1216_v24 = vld [vmem:[%s1299_s2] ss:$0 sm:$0xff] }
  0x14   : > { %v1034_v21 = vld [vmem:[%s1195_s9 + $0x38] sm:$0xff] }
  0x15   : > { %521 = vmatpush.bf16.msra.mxu0 %v1048_v2  ;;  %1057 = vmatpush.bf16.msra.mxu1 %v1048_v2  ;;  %v1038_v22 = vld [vmem:[%s1195_s9 + $0x58] sm:$0xff] }
  0x16   : > { %1058 = vmatpush.bf16.msra.mxu2 %v1048_v2  ;;  %1059 = vmatpush.bf16.msra.mxu3 %v1048_v2  ;;  %v1042_v23 = vld [vmem:[%s1195_s9 + $0x78] sm:$0xff] }
  0x19   : > { %522 = vmatpush.bf16.msra.mxu0 %v1047_v3  ;;  %1060 = vmatpush.bf16.msra.mxu1 %v1047_v3 }
  0x1a   : > { %1061 = vmatpush.bf16.msra.mxu2 %v1047_v3  ;;  %1062 = vmatpush.bf16.msra.mxu3 %v1047_v3 }
  0x1d   : > { %523 = vmatpush.bf16.msra.mxu0 %v1046_v4  ;;  %1063 = vmatpush.bf16.msra.mxu1 %v1046_v4 }
  0x1e   : > { %1064 = vmatpush.bf16.msra.mxu2 %v1046_v4  ;;  %1065 = vmatpush.bf16.msra.mxu3 %v1046_v4 }
  0x21   : > { %524 = vmatpush.bf16.msra.mxu0 %v1045_v5  ;;  %1066 = vmatpush.bf16.msra.mxu1 %v1045_v5 }
  0x22   : > { %1067 = vmatpush.bf16.msra.mxu2 %v1045_v5  ;;  %1068 = vmatpush.bf16.msra.mxu3 %v1045_v5 }
  0x25   : > { %525 = vmatpush.bf16.msra.mxu0 %v1044_v6  ;;  %1069 = vmatpush.bf16.msra.mxu1 %v1044_v6 }
  0x26   : > { %1070 = vmatpush.bf16.msra.mxu2 %v1044_v6  ;;  %1071 = vmatpush.bf16.msra.mxu3 %v1044_v6 }
  0x29   : > { %526 = vmatpush.bf16.msra.mxu0 %v1043_v7  ;;  %1072 = vmatpush.bf16.msra.mxu1 %v1043_v7 }
  0x2a   : > { %1073 = vmatpush.bf16.msra.mxu2 %v1043_v7  ;;  %1074 = vmatpush.bf16.msra.mxu3 %v1043_v7 }
  0x2c   : > { %527 = vmatmul.bf16.vlgmr.msra.gmra.mxu0 %v1027_v8  ;;  %547 = vmatmul.bf16.vlgmr.msra.gmra.mxu1 %v1031_v9 }
  0x2d   : > { %567 = vmatmul.bf16.vlgmr.msra.gmra.mxu2 %v1035_v10  ;;  %587 = vmatmul.bf16.vlgmr.msra.gmra.mxu3 %v1039_v11 }
  0x3c   : > { %532 = vmatmul.bf16.gmra.mxu0 %v1028_v12  ;;  %552 = vmatmul.bf16.gmra.mxu1 %v1032_v13 }
  0x3d   : > { %572 = vmatmul.bf16.gmra.mxu2 %v1036_v14  ;;  %592 = vmatmul.bf16.gmra.mxu3 %v1040_v15 }
  0x4c   : > { %537 = vmatmul.bf16.gmra.mxu0 %v1029_v16  ;;  %557 = vmatmul.bf16.gmra.mxu1 %v1033_v17 }
  0x4d   : > { %577 = vmatmul.bf16.gmra.mxu2 %v1037_v18  ;;  %597 = vmatmul.bf16.gmra.mxu3 %v1041_v19 }
  0x5c   : > { %542 = vmatmul.bf16.gmra.mxu0 %v1030_v20  ;;  %562 = vmatmul.bf16.gmra.mxu1 %v1034_v21 }
  0x5d   : > { %582 = vmatmul.bf16.gmra.mxu2 %v1038_v22  ;;  %602 = vmatmul.bf16.gmra.mxu3 %v1042_v23 }
  0xa9   : > { %v528_v25 = vpop.f32.mrf.mxu0  ;;  %v548_v26 = vpop.f32.mrf.mxu1 }
  0xaa   : > { %v711_v27 = vadd.f32 %v1216_v24, %v528_v25  ;;  %v719_v28 = vadd.f32 %v1216_v24, %v548_v26 }
  0xac   : > { %v743_v29 = vmax.f32 %v711_v27, 0.0  ;;  %v751_v30 = vmax.f32 %v719_v28, 0.0 }
  0xae   : > { %775 = vst [vmem:[%s1224_s18] sm:$0xff] %v743_v29 }
  0xaf   : > { %783 = vst [vmem:[%s1224_s18 + $0x40] sm:$0xff] %v751_v30 }
  0xb0   : > { %v568_v31 = vpop.f32.mrf.mxu2  ;;  %v588_v32 = vpop.f32.mrf.mxu3 }
  0xb1   : > { %v727_v33 = vadd.f32 %v1216_v24, %v568_v31  ;;  %v735_v34 = vadd.f32 %v1216_v24, %v588_v32  ;;  %v530_v35 = vpop.f32.mrf.mxu0  ;;  %v550_v36 = vpop.f32.mrf.mxu1 }
  0xb2   : > { %v712_v37 = vadd.f32 %v1216_v24, %v530_v35  ;;  %v720_v38 = vadd.f32 %v1216_v24, %v550_v36 }
  0xb3   : > { %v759_v39 = vmax.f32 %v727_v33, 0.0  ;;  %v767_v40 = vmax.f32 %v735_v34, 0.0 }
  0xb4   : > { %v744_v41 = vmax.f32 %v712_v37, 0.0  ;;  %v752_v42 = vmax.f32 %v720_v38, 0.0 }
  0xb5   : > { %791 = vst [vmem:[%s1224_s18 + $0x80] sm:$0xff] %v759_v39 }
  0xb6   : > { %799 = vst [vmem:[%s1224_s18 + $0xc0] sm:$0xff] %v767_v40 }
  0xb7   : > { %776 = vst [vmem:[%s1224_s18 + $0x8] sm:$0xff] %v744_v41 }
  0xb8   : > { %784 = vst [vmem:[%s1224_s18 + $0x48] sm:$0xff] %v752_v42  ;;  %v570_v43 = vpop.f32.mrf.mxu2  ;;  %v590_v44 = vpop.f32.mrf.mxu3 }
  0xb9   : > { %v728_v45 = vadd.f32 %v1216_v24, %v570_v43  ;;  %v736_v46 = vadd.f32 %v1216_v24, %v590_v44  ;;  %v533_v47 = vpop.f32.mrf.mxu0  ;;  %v553_v48 = vpop.f32.mrf.mxu1 }
  0xba   : > { %v713_v49 = vadd.f32 %v1216_v24, %v533_v47  ;;  %v721_v50 = vadd.f32 %v1216_v24, %v553_v48 }
  0xbb   : > { %v760_v51 = vmax.f32 %v728_v45, 0.0  ;;  %v768_v52 = vmax.f32 %v736_v46, 0.0 }
  0xbc   : > { %v745_v53 = vmax.f32 %v713_v49, 0.0  ;;  %v753_v54 = vmax.f32 %v721_v50, 0.0 }
  0xbd   : > { %792 = vst [vmem:[%s1224_s18 + $0x88] sm:$0xff] %v760_v51 }
  0xbe   : > { %800 = vst [vmem:[%s1224_s18 + $0xc8] sm:$0xff] %v768_v52 }
  0xbf   : > { %777 = vst [vmem:[%s1224_s18 + $0x10] sm:$0xff] %v745_v53 }
  0xc0   : > { %785 = vst [vmem:[%s1224_s18 + $0x50] sm:$0xff] %v753_v54  ;;  %v573_v55 = vpop.f32.mrf.mxu2  ;;  %v593_v56 = vpop.f32.mrf.mxu3 }
  0xc1   : > { %v729_v57 = vadd.f32 %v1216_v24, %v573_v55  ;;  %v737_v58 = vadd.f32 %v1216_v24, %v593_v56  ;;  %v535_v59 = vpop.f32.mrf.mxu0  ;;  %v555_v60 = vpop.f32.mrf.mxu1 }
  0xc2   : > { %v714_v61 = vadd.f32 %v1216_v24, %v535_v59  ;;  %v722_v62 = vadd.f32 %v1216_v24, %v555_v60 }
  0xc3   : > { %v761_v63 = vmax.f32 %v729_v57, 0.0  ;;  %v769_v0 = vmax.f32 %v737_v58, 0.0 }
  0xc4   : > { %v746_v1 = vmax.f32 %v714_v61, 0.0  ;;  %v754_v2 = vmax.f32 %v722_v62, 0.0 }
  0xc5   : > { %793 = vst [vmem:[%s1224_s18 + $0x90] sm:$0xff] %v761_v63 }
  0xc6   : > { %801 = vst [vmem:[%s1224_s18 + $0xd0] sm:$0xff] %v769_v0 }
  0xc7   : > { %778 = vst [vmem:[%s1224_s18 + $0x18] sm:$0xff] %v746_v1 }
  0xc8   : > { %786 = vst [vmem:[%s1224_s18 + $0x58] sm:$0xff] %v754_v2  ;;  %v575_v3 = vpop.f32.mrf.mxu2  ;;  %v595_v4 = vpop.f32.mrf.mxu3 }
  0xc9   : > { %v730_v5 = vadd.f32 %v1216_v24, %v575_v3  ;;  %v738_v6 = vadd.f32 %v1216_v24, %v595_v4  ;;  %v538_v7 = vpop.f32.mrf.mxu0  ;;  %v558_v8 = vpop.f32.mrf.mxu1 }
  0xca   : > { %v715_v9 = vadd.f32 %v1216_v24, %v538_v7  ;;  %v723_v10 = vadd.f32 %v1216_v24, %v558_v8 }
  0xcb   : > { %v762_v11 = vmax.f32 %v730_v5, 0.0  ;;  %v770_v12 = vmax.f32 %v738_v6, 0.0 }
  0xcc   : > { %v747_v13 = vmax.f32 %v715_v9, 0.0  ;;  %v755_v14 = vmax.f32 %v723_v10, 0.0 }
  0xcd   : > { %794 = vst [vmem:[%s1224_s18 + $0x98] sm:$0xff] %v762_v11 }
  0xce   : > { %802 = vst [vmem:[%s1224_s18 + $0xd8] sm:$0xff] %v770_v12 }
  0xcf   : > { %779 = vst [vmem:[%s1224_s18 + $0x20] sm:$0xff] %v747_v13 }
  0xd0   : > { %787 = vst [vmem:[%s1224_s18 + $0x60] sm:$0xff] %v755_v14  ;;  %v578_v15 = vpop.f32.mrf.mxu2  ;;  %v598_v16 = vpop.f32.mrf.mxu3 }
  0xd1   : > { %v731_v17 = vadd.f32 %v1216_v24, %v578_v15  ;;  %v739_v18 = vadd.f32 %v1216_v24, %v598_v16  ;;  %v540_v19 = vpop.f32.mrf.mxu0  ;;  %v560_v20 = vpop.f32.mrf.mxu1 }
  0xd2   : > { %v716_v21 = vadd.f32 %v1216_v24, %v540_v19  ;;  %v724_v22 = vadd.f32 %v1216_v24, %v560_v20 }
  0xd3   : > { %v763_v23 = vmax.f32 %v731_v17, 0.0  ;;  %v771_v25 = vmax.f32 %v739_v18, 0.0 }
  0xd4   : > { %v748_v26 = vmax.f32 %v716_v21, 0.0  ;;  %v756_v27 = vmax.f32 %v724_v22, 0.0 }
  0xd5   : > { %795 = vst [vmem:[%s1224_s18 + $0xa0] sm:$0xff] %v763_v23 }
  0xd6   : > { %803 = vst [vmem:[%s1224_s18 + $0xe0] sm:$0xff] %v771_v25 }
  0xd7   : > { %780 = vst [vmem:[%s1224_s18 + $0x28] sm:$0xff] %v748_v26 }
  0xd8   : > { %788 = vst [vmem:[%s1224_s18 + $0x68] sm:$0xff] %v756_v27  ;;  %v580_v28 = vpop.f32.mrf.mxu2  ;;  %v600_v29 = vpop.f32.mrf.mxu3 }
  0xd9   : > { %v732_v30 = vadd.f32 %v1216_v24, %v580_v28  ;;  %v740_v31 = vadd.f32 %v1216_v24, %v600_v29  ;;  %v543_v32 = vpop.f32.mrf.mxu0  ;;  %v563_v33 = vpop.f32.mrf.mxu1 }
  0xda   : > { %v717_v34 = vadd.f32 %v1216_v24, %v543_v32  ;;  %v725_v35 = vadd.f32 %v1216_v24, %v563_v33 }
  0xdb   : > { %v764_v36 = vmax.f32 %v732_v30, 0.0  ;;  %v772_v37 = vmax.f32 %v740_v31, 0.0 }
  0xdc   : > { %v749_v38 = vmax.f32 %v717_v34, 0.0  ;;  %v757_v39 = vmax.f32 %v725_v35, 0.0 }
  0xdd   : > { %796 = vst [vmem:[%s1224_s18 + $0xa8] sm:$0xff] %v764_v36 }
  0xde   : > { %804 = vst [vmem:[%s1224_s18 + $0xe8] sm:$0xff] %v772_v37 }
  0xdf   : > { %781 = vst [vmem:[%s1224_s18 + $0x30] sm:$0xff] %v749_v38 }
  0xe0   : > { %789 = vst [vmem:[%s1224_s18 + $0x70] sm:$0xff] %v757_v39  ;;  %v583_v40 = vpop.f32.mrf.mxu2  ;;  %v603_v41 = vpop.f32.mrf.mxu3 }
  0xe1   : > { %v733_v42 = vadd.f32 %v1216_v24, %v583_v40  ;;  %v741_v43 = vadd.f32 %v1216_v24, %v603_v41  ;;  %v545_v44 = vpop.f32.mrf.mxu0  ;;  %v565_v45 = vpop.f32.mrf.mxu1 }
  0xe2   : > { %v718_v46 = vadd.f32 %v1216_v24, %v545_v44  ;;  %v726_v47 = vadd.f32 %v1216_v24, %v565_v45 }
  0xe3   : > { %v765_v48 = vmax.f32 %v733_v42, 0.0  ;;  %v773_v49 = vmax.f32 %v741_v43, 0.0 }
  0xe4   : > { %v750_v50 = vmax.f32 %v718_v46, 0.0  ;;  %v758_v51 = vmax.f32 %v726_v47, 0.0 }
  0xe5   : > { %797 = vst [vmem:[%s1224_s18 + $0xb0] sm:$0xff] %v765_v48 }
  0xe6   : > { %805 = vst [vmem:[%s1224_s18 + $0xf0] sm:$0xff] %v773_v49 }
  0xe7   : > { %782 = vst [vmem:[%s1224_s18 + $0x38] sm:$0xff] %v750_v50 }
  0xe8   : > { %790 = vst [vmem:[%s1224_s18 + $0x78] sm:$0xff] %v758_v51  ;;  %v585_v52 = vpop.f32.mrf.mxu2  ;;  %v605_v53 = vpop.f32.mrf.mxu3 }
  0xe9   : > { %v734_v54 = vadd.f32 %v1216_v24, %v585_v52  ;;  %v742_v55 = vadd.f32 %v1216_v24, %v605_v53 }
  0xeb   : > { %v766_v56 = vmax.f32 %v734_v54, 0.0  ;;  %v774_v57 = vmax.f32 %v742_v55, 0.0 }
  0xed   : > { %798 = vst [vmem:[%s1224_s18 + $0xb8] sm:$0xff] %v766_v56 }
  0xee   : > { %806 = vst [vmem:[%s1224_s18 + $0xf8] sm:$0xff] %v774_v57 }
  0xef PF: > { %s13_s14 = sadd.s32 1, %s1122_s14   ;;  %s1301_s12 = smov %s1118_s13 }
  0xf0   : > { %p10_p5 = scmp.ge.s32.totalorder %s13_s14, 4   ;;  %s1302_s13 = smov %s1304_s15 }
  0xf2   :  { %12 = sbr.rel (!%p10_p5) target bundleno = 2 (0x2), region = 76 }

// kernel: room_encoder_forward.11
= control target key start
LH: loop header
LB: loop body
LE: loop exit
PB: predicated region body
PF: predicated region fallthrough
CT: control target
= control target key end

     0   :  { %vm152_vm0 = vcmask 1046528   ;;  %vm251_vm1 = vcmask 1045504   ;;  %vm546_vm2 = vcmask 1040384   ;;  %vm561_vm3 = vcmask 1041408   ;;  %s1028_s0 = inlined_call_operand.vmem [shape: f32[2,15,15,64], index: 0, kind: input, shape index: {}]   ;;  %s1029_s1 = inlined_call_operand.vmem [shape: f32[2,7,7,64], index: 1, kind: output, shape index: {}]  }
   0x1   :  { %v8_v0 = vld [vmem:[%s1028_s0] sm:$0xff]  ;;  %v9_v1 = vld [vmem:[%s1028_s0 + $0x8] sm:$0x7f]  ;;  %v10_v2 = vld [vmem:[%s1028_s0 + $0x10] sm:$0xff]  ;;  %vm576_vm4 = vcmask 1042432   ;;  %vm591_vm5 = vcmask 1043456  }
   0x2   :  { %v11_v3 = vld [vmem:[%s1028_s0 + $0x18] sm:$0x7f]  ;;  %v12_v4 = vld [vmem:[%s1028_s0 + $0x20] sm:$0xff]  ;;  %v13_v5 = vld [vmem:[%s1028_s0 + $0x28] sm:$0x7f]  ;;  %v68_v6 = vmax.f32 %v8_v0, %v10_v2  ;;  %vm606_vm6 = vcmask 1044480  }
   0x3   :  { %v69_v7 = vmax.f32 %v9_v1, %v11_v3  ;;  %v14_v8 = vld [vmem:[%s1028_s0 + $0x30] sm:$0xff]  ;;  %v15_v9 = vld [vmem:[%s1028_s0 + $0x38] sm:$0x7f]  ;;  %v16_v10 = vld [vmem:[%s1028_s0 + $0x40] sm:$0xff]  ;;  %vm635_vm7 = vcmask 522240  }
   0x4   :  { %v96_v11 = vmax.f32 %v68_v6, %v12_v4  ;;  %v17_v12 = vld [vmem:[%s1028_s0 + $0x48] sm:$0x7f]  ;;  %v70_v13 = vmax.f32 %v12_v4, %v14_v8  ;;  %v71_v14 = vmax.f32 %v13_v5, %v15_v9  ;;  %v18_v15 = vld [vmem:[%s1028_s0 + $0x50] sm:$0xff]  ;;  %v19_v16 = vld [vmem:[%s1028_s0 + $0x58] sm:$0x7f] }
   0x5   :  { %v97_v17 = vmax.f32 %v69_v7, %v13_v5  ;;  %v72_v18 = vmax.f32 %v16_v10, %v18_v15  ;;  %v73_v19 = vmax.f32 %v17_v12, %v19_v16  ;;  %v20_v24 = vld [vmem:[%s1028_s0 + $0x60] sm:$0xff]  ;;  %v706_v25 = vld [vmem:[%s1028_s0 + $0x68] sm:$0x7f]  ;;  %v22_v38 = vld [vmem:[%s1028_s0 + $0x70] sm:$0xff] }
   0x6   :  { %v153_v20 = vrot.slane %v96_v11, 1  ;;  %v252_v21 = vrot.slane %v96_v11, 2  ;;  %v98_v22 = vmax.f32 %v70_v13, %v16_v10  ;;  %v99_v23 = vmax.f32 %v71_v14, %v17_v12  ;;  %v23_v63 = vld [vmem:[%s1028_s0 + $0x78] sm:$0x7f] }
   0x7   :  { %v154_v26 = vrot.slane %v97_v17, 1  ;;  %v253_v27 = vrot.slane %v97_v17, 2  ;;  %v100_v28 = vmax.f32 %v72_v18, %v20_v24  ;;  %v101_v29 = vmax.f32 %v73_v19, %v706_v25 }
   0x8   :  { %v156_v30 = vrot.slane %v98_v22, 1  ;;  %v157_v31 = vrot.slane %v99_v23, 1  ;;  %v255_v32 = vrot.slane %v98_v22, 2  ;;  %v256_v33 = vrot.slane %v99_v23, 2 }
   0x9   :  { %v155_v34 = vsel %vm152_vm0, %v153_v20, %v154_v26  ;;  %v224_v35 = vmax.f32 %v97_v17, %v154_v26  ;;  %v254_v36 = vsel %vm251_vm1, %v252_v21, %v253_v27  ;;  %v159_v37 = vrot.slane %v100_v28, 1  ;;  %v26_v17 = vld [vmem:[%s1028_s0 + $0x90] sm:$0xff] }
   0xa   :  { %v223_v39 = vmax.f32 %v96_v11, %v155_v34  ;;  %v158_v40 = vsel %vm152_vm0, %v156_v30, %v157_v31  ;;  %v226_v41 = vmax.f32 %v99_v23, %v157_v31  ;;  %v257_v42 = vsel %vm251_vm1, %v255_v32, %v256_v33  ;;  %v24_v11 = vld [vmem:[%s1028_s0 + $0x80] sm:$0xff]  ;;  %v27_v23 = vld [vmem:[%s1028_s0 + $0x98] sm:$0x7f]  ;;  %v30_v30 = vld [vmem:[%s1028_s0 + $0xb0] sm:$0xff] }
   0xb   :  { %v323_v43 = vmax.f32 %v224_v35, %v253_v27  ;;  %v225_v44 = vmax.f32 %v98_v22, %v158_v40  ;;  %v160_v45 = vrot.slane %v101_v29, 1  ;;  %v258_v46 = vrot.slane %v100_v28, 2  ;;  %v25_v22 = vld [vmem:[%s1028_s0 + $0x88] sm:$0x7f]  ;;  %v31_v35 = vld [vmem:[%s1028_s0 + $0xb8] sm:$0x7f] }
   0xc   :  { %v322_v47 = vmax.f32 %v223_v39, %v254_v36  ;;  %v325_v48 = vmax.f32 %v226_v41, %v256_v33  ;;  %v259_v49 = vrot.slane %v101_v29, 2  ;;  %v74_v50 = vmax.f32 %v20_v24, %v22_v38 }
   0xd   :  { %v462_v51 = vrot.slane %v323_v43, 4  ;;  %v490_v52 = vrot.slane %v323_v43, 5  ;;  %v518_v53 = vrot.slane %v323_v43, 6  ;;  %v324_v54 = vmax.f32 %v225_v44, %v257_v42 }
   0xe   :  { %v364_v55 = vrot.slane %v322_v47, 1  ;;  %v392_v56 = vrot.slane %v322_v47, 2  ;;  %v420_v57 = vrot.slane %v322_v47, 3  ;;  %v463_v58 = vrot.slane %v325_v48, 4 }
   0xf   :  { %v365_v59 = vrot.slane %v324_v54, 1  ;;  %v393_v60 = vrot.slane %v324_v54, 2  ;;  %v421_v61 = vrot.slane %v324_v54, 3  ;;  %v491_v62 = vrot.slane %v325_v48, 5 }
  0x10   :  { %v547_v0 = vsel %vm546_vm2, %v322_v47, %v364_v55  ;;  %v519_v1 = vrot.slane %v325_v48, 6  ;;  %v161_v2 = vsel %vm152_vm0, %v159_v37, %v160_v45  ;;  %v228_v3 = vmax.f32 %v101_v29, %v160_v45  ;;  %v29_v29 = vld [vmem:[%s1028_s0 + $0xa8] sm:$0x7f] }
  0x11   :  { %v562_v4 = vsel %vm561_vm3, %v547_v0, %v392_v56  ;;  %v548_v5 = vsel %vm546_vm2, %v324_v54, %v365_v59  ;;  %v227_v6 = vmax.f32 %v100_v28, %v161_v2  ;;  %v260_v7 = vsel %vm251_vm1, %v258_v46, %v259_v49  ;;  %v28_v28 = vld [vmem:[%s1028_s0 + $0xa0] sm:$0xff] }
  0x12   :  { %v577_v8 = vsel %vm576_vm4, %v562_v4, %v420_v57  ;;  %v563_v9 = vsel %vm561_vm3, %v548_v5, %v393_v60  ;;  %v327_v10 = vmax.f32 %v228_v3, %v259_v49  ;;  %v75_v12 = vmax.f32 %v706_v25, %v23_v63  ;;  %v32_v56 = vld [vmem:[%s1028_s0 + $0xc0] sm:$0xff]  ;;  %v780_v60 = vld [vmem:[%s1028_s0 + $0xc8] sm:$0x7f] }
  0x13   :  { %v592_v13 = vsel %vm591_vm5, %v577_v8, %v462_v51  ;;  %v578_v14 = vsel %vm576_vm4, %v563_v9, %v421_v61  ;;  %v326_v15 = vmax.f32 %v227_v6, %v260_v7  ;;  %v102_v16 = vmax.f32 %v74_v50, %v24_v11  ;;  %v34_v6 = vld [vmem:[%s1028_s0 + $0xd0] sm:$0xff] }
  0x14   :  { %v607_v18 = vsel %vm606_vm6, %v592_v13, %v490_v52  ;;  %v593_v19 = vsel %vm591_vm5, %v578_v14, %v463_v58  ;;  %v464_v20 = vrot.slane %v327_v10, 4  ;;  %v492_v21 = vrot.slane %v327_v10, 5 }
  0x15   :  { %v621_v24 = vsel %vm251_vm1, %v607_v18, %v518_v53  ;;  %v608_v25 = vsel %vm606_vm6, %v593_v19, %v491_v62  ;;  %v366_v26 = vrot.slane %v326_v15, 1  ;;  %v394_v27 = vrot.slane %v326_v15, 2 }
  0x16   :  { %636 = vst.msk [vmem:[%s1029_s1] sm:$0x7f] %vm635_vm7, %v621_v24  ;;  %v622_v31 = vsel %vm251_vm1, %v608_v25, %v519_v1  ;;  %v422_v32 = vrot.slane %v326_v15, 3  ;;  %v520_v33 = vrot.slane %v327_v10, 6  ;;  %v103_v34 = vmax.f32 %v75_v12, %v25_v22 }
  0x17   :  { %637 = vst.msk [vmem:[%s1029_s1 + $0x8] sm:$0x7f] %vm635_vm7, %v622_v31  ;;  %v549_v36 = vsel %vm546_vm2, %v326_v15, %v366_v26  ;;  %v162_v37 = vrot.slane %v102_v16, 1  ;;  %v261_v38 = vrot.slane %v102_v16, 2  ;;  %v76_v39 = vmax.f32 %v24_v11, %v26_v17 }
  0x18   :  { %v564_v40 = vsel %vm561_vm3, %v549_v36, %v394_v27  ;;  %v163_v41 = vrot.slane %v103_v34, 1  ;;  %v262_v42 = vrot.slane %v103_v34, 2  ;;  %v77_v43 = vmax.f32 %v25_v22, %v27_v23  ;;  %v35_v27 = vld [vmem:[%s1028_s0 + $0xd8] sm:$0x7f] }
  0x19   :  { %v579_v44 = vsel %vm576_vm4, %v564_v40, %v422_v32  ;;  %v104_v45 = vmax.f32 %v76_v39, %v28_v28  ;;  %v78_v46 = vmax.f32 %v28_v28, %v30_v30  ;;  %v79_v47 = vmax.f32 %v29_v29, %v31_v35  ;;  %v36_v32 = vld [vmem:[%s1028_s0 + $0xe0] sm:$0xff] }
  0x1a   :  { %v594_v48 = vsel %vm591_vm5, %v579_v44, %v464_v20  ;;  %v164_v49 = vsel %vm152_vm0, %v162_v37, %v163_v41  ;;  %v230_v50 = vmax.f32 %v103_v34, %v163_v41  ;;  %v263_v51 = vsel %vm251_vm1, %v261_v38, %v262_v42  ;;  %v40_v34 = vld [vmem:[%s1028_s0 + $0x100] sm:$0xff]  ;;  %v37_v44 = vld [vmem:[%s1028_s0 + $0xe8] sm:$0x7f] }
  0x1b   :  { %v609_v52 = vsel %vm606_vm6, %v594_v48, %v492_v21  ;;  %v229_v53 = vmax.f32 %v102_v16, %v164_v49  ;;  %v105_v54 = vmax.f32 %v77_v43, %v29_v29  ;;  %v165_v55 = vrot.slane %v104_v45, 1 }
  0x1c   :  { %v623_v57 = vsel %vm251_vm1, %v609_v52, %v520_v33  ;;  %v329_v58 = vmax.f32 %v230_v50, %v262_v42  ;;  %v264_v59 = vrot.slane %v104_v45, 2  ;;  %v106_v61 = vmax.f32 %v78_v46, %v32_v56  ;;  %v38_v33 = vld [vmem:[%s1028_s0 + $0xf0] sm:$0xff] }
  0x1d   :  { %638 = vst.msk [vmem:[%s1029_s1 + $0x10] sm:$0x7f] %vm635_vm7, %v623_v57  ;;  %v328_v62 = vmax.f32 %v229_v53, %v263_v51  ;;  %v166_v63 = vrot.slane %v105_v54, 1  ;;  %v265_v0 = vrot.slane %v105_v54, 2  ;;  %v107_v1 = vmax.f32 %v79_v47, %v780_v60  ;;  %v39_v47 = vld [vmem:[%s1028_s0 + $0xf8] sm:$0x7f] }
  0x1e   :  { %v465_v2 = vrot.slane %v329_v58, 4  ;;  %v493_v3 = vrot.slane %v329_v58, 5  ;;  %v521_v4 = vrot.slane %v329_v58, 6  ;;  %v168_v5 = vrot.slane %v106_v61, 1  ;;  %v41_v53 = vld [vmem:[%s1028_s0 + $0x108] sm:$0x7f] }
  0x1f   :  { %v367_v7 = vrot.slane %v328_v62, 1  ;;  %v395_v8 = vrot.slane %v328_v62, 2  ;;  %v423_v9 = vrot.slane %v328_v62, 3  ;;  %v167_v10 = vsel %vm152_vm0, %v165_v55, %v166_v63  ;;  %v42_v58 = vld [vmem:[%s1028_s0 + $0x110] sm:$0xff] }
  0x20   :  { %v231_v11 = vmax.f32 %v104_v45, %v167_v10  ;;  %v232_v12 = vmax.f32 %v105_v54, %v166_v63  ;;  %v266_v13 = vsel %vm251_vm1, %v264_v59, %v265_v0  ;;  %v169_v14 = vrot.slane %v107_v1, 1  ;;  %v43_v63 = vld [vmem:[%s1028_s0 + $0x118] sm:$0x7f] }
  0x21   :  { %v550_v15 = vsel %vm546_vm2, %v328_v62, %v367_v7  ;;  %v267_v16 = vrot.slane %v106_v61, 2  ;;  %v268_v17 = vrot.slane %v107_v1, 2  ;;  %v80_v18 = vmax.f32 %v32_v56, %v34_v6 }
  0x22   :  { %v565_v19 = vsel %vm561_vm3, %v550_v15, %v395_v8  ;;  %v330_v20 = vmax.f32 %v231_v11, %v266_v13  ;;  %v331_v21 = vmax.f32 %v232_v12, %v265_v0  ;;  %v170_v22 = vsel %vm152_vm0, %v168_v5, %v169_v14  ;;  %v44_v0 = vld [vmem:[%s1028_s0 + $0x120] sm:$0xff] }
  0x23   :  { %v580_v23 = vsel %vm576_vm4, %v565_v19, %v423_v9  ;;  %v233_v24 = vmax.f32 %v106_v61, %v170_v22  ;;  %v234_v25 = vmax.f32 %v107_v1, %v169_v14  ;;  %v269_v26 = vsel %vm251_vm1, %v267_v16, %v268_v17  ;;  %v45_v1 = vld [vmem:[%s1028_s0 + $0x128] sm:$0x7f]  ;;  %v46_v22 = vld [vmem:[%s1028_s0 + $0x130] sm:$0xff] }
  0x24   :  { %v595_v28 = vsel %vm591_vm5, %v580_v23, %v465_v2  ;;  %v368_v29 = vrot.slane %v330_v20, 1  ;;  %v396_v30 = vrot.slane %v330_v20, 2  ;;  %v424_v31 = vrot.slane %v330_v20, 3 }
  0x25   :  { %v610_v35 = vsel %vm606_vm6, %v595_v28, %v493_v3  ;;  %v466_v36 = vrot.slane %v331_v21, 4  ;;  %v494_v37 = vrot.slane %v331_v21, 5  ;;  %v522_v38 = vrot.slane %v331_v21, 6 }
  0x26   :  { %v624_v39 = vsel %vm251_vm1, %v610_v35, %v521_v4  ;;  %v551_v40 = vsel %vm546_vm2, %v330_v20, %v368_v29  ;;  %v332_v41 = vmax.f32 %v233_v24, %v269_v26  ;;  %v333_v42 = vmax.f32 %v234_v25, %v268_v17  ;;  %v866_v26 = vld [vmem:[%s1028_s0 + $0x138] sm:$0x7f] }
  0x27   :  { %639 = vst.msk [vmem:[%s1029_s1 + $0x18] sm:$0x7f] %vm635_vm7, %v624_v39  ;;  %v566_v43 = vsel %vm561_vm3, %v551_v40, %v396_v30  ;;  %v81_v45 = vmax.f32 %v780_v60, %v35_v27  ;;  %v108_v46 = vmax.f32 %v80_v18, %v36_v32  ;;  %v82_v48 = vmax.f32 %v38_v33, %v40_v34 }
  0x28   :  { %v581_v49 = vsel %vm576_vm4, %v566_v43, %v424_v31  ;;  %v369_v50 = vrot.slane %v332_v41, 1  ;;  %v397_v51 = vrot.slane %v332_v41, 2  ;;  %v425_v52 = vrot.slane %v332_v41, 3 }
  0x29   :  { %v596_v54 = vsel %vm591_vm5, %v581_v49, %v466_v36  ;;  %v467_v55 = vrot.slane %v333_v42, 4  ;;  %v495_v56 = vrot.slane %v333_v42, 5  ;;  %v523_v57 = vrot.slane %v333_v42, 6  ;;  %v48_v36 = vld [vmem:[%s1028_s0 + $0x140] sm:$0xff] }
  0x2a   :  { %v611_v59 = vsel %vm606_vm6, %v596_v54, %v494_v37  ;;  %v552_v60 = vsel %vm546_vm2, %v332_v41, %v369_v50  ;;  %v109_v61 = vmax.f32 %v81_v45, %v37_v44  ;;  %v171_v62 = vrot.slane %v108_v46, 1 }
  0x2b   :  { %v625_v2 = vsel %vm251_vm1, %v611_v59, %v522_v38  ;;  %v567_v3 = vsel %vm561_vm3, %v552_v60, %v397_v51  ;;  %v270_v4 = vrot.slane %v108_v46, 2  ;;  %v83_v5 = vmax.f32 %v39_v47, %v41_v53 }
  0x2c   :  { %640 = vst.msk [vmem:[%s1029_s1 + $0x20] sm:$0x7f] %vm635_vm7, %v625_v2  ;;  %v582_v6 = vsel %vm576_vm4, %v567_v3, %v425_v52  ;;  %v172_v7 = vrot.slane %v109_v61, 1  ;;  %v271_v8 = vrot.slane %v109_v61, 2  ;;  %v110_v9 = vmax.f32 %v82_v48, %v42_v58 }
  0x2d   :  { %v597_v10 = vsel %vm591_vm5, %v582_v6, %v467_v55  ;;  %v111_v11 = vmax.f32 %v83_v5, %v43_v63  ;;  %v84_v12 = vmax.f32 %v42_v58, %v44_v0  ;;  %v85_v13 = vmax.f32 %v43_v63, %v45_v1  ;;  %v52_v63 = vld [vmem:[%s1028_s0 + $0x160] sm:$0xff] }
  0x2e   :  { %v612_v14 = vsel %vm606_vm6, %v597_v10, %v495_v56  ;;  %v173_v15 = vsel %vm152_vm0, %v171_v62, %v172_v7  ;;  %v236_v16 = vmax.f32 %v109_v61, %v172_v7  ;;  %v272_v17 = vsel %vm251_vm1, %v270_v4, %v271_v8  ;;  %v50_v62 = vld [vmem:[%s1028_s0 + $0x150] sm:$0xff]  ;;  %v51_v7 = vld [vmem:[%s1028_s0 + $0x158] sm:$0x7f] }
  0x2f   :  { %v626_v18 = vsel %vm251_vm1, %v612_v14, %v523_v57  ;;  %v235_v19 = vmax.f32 %v108_v46, %v173_v15  ;;  %v174_v20 = vrot.slane %v110_v9, 1  ;;  %v175_v21 = vrot.slane %v111_v11, 1  ;;  %v49_v57 = vld [vmem:[%s1028_s0 + $0x148] sm:$0x7f]  ;;  %v55_v14 = vld [vmem:[%s1028_s0 + $0x178] sm:$0x7f] }
  0x30   :  { %641 = vst.msk [vmem:[%s1029_s1 + $0x28] sm:$0x7f] %vm635_vm7, %v626_v18  ;;  %v335_v23 = vmax.f32 %v236_v16, %v271_v8  ;;  %v273_v24 = vrot.slane %v110_v9, 2  ;;  %v274_v25 = vrot.slane %v111_v11, 2  ;;  %v112_v27 = vmax.f32 %v84_v12, %v46_v22 }
  0x31   :  { %v334_v28 = vmax.f32 %v235_v19, %v272_v17  ;;  %v176_v29 = vsel %vm152_vm0, %v174_v20, %v175_v21  ;;  %v238_v30 = vmax.f32 %v111_v11, %v175_v21  ;;  %v113_v31 = vmax.f32 %v85_v13, %v866_v26  ;;  %v54_v13 = vld [vmem:[%s1028_s0 + $0x170] sm:$0xff]  ;;  %v56_v20 = vld [vmem:[%s1028_s0 + $0x180] sm:$0xff]  ;;  %v57_v21 = vld [vmem:[%s1028_s0 + $0x188] sm:$0x7f] }
  0x32   :  { %v468_v32 = vrot.slane %v335_v23, 4  ;;  %v496_v33 = vrot.slane %v335_v23, 5  ;;  %v524_v34 = vrot.slane %v335_v23, 6  ;;  %v237_v35 = vmax.f32 %v110_v9, %v176_v29  ;;  %v53_v9 = vld [vmem:[%s1028_s0 + $0x168] sm:$0x7f] }
  0x33   :  { %v370_v37 = vrot.slane %v334_v28, 1  ;;  %v398_v38 = vrot.slane %v334_v28, 2  ;;  %v426_v39 = vrot.slane %v334_v28, 3  ;;  %v275_v40 = vsel %vm251_vm1, %v273_v24, %v274_v25 }
  0x34   :  { %v336_v41 = vmax.f32 %v237_v35, %v275_v40  ;;  %v337_v42 = vmax.f32 %v238_v30, %v274_v25  ;;  %v177_v43 = vrot.slane %v112_v27, 1  ;;  %v178_v44 = vrot.slane %v113_v31, 1 }
  0x35   :  { %v553_v45 = vsel %vm546_vm2, %v334_v28, %v370_v37  ;;  %v276_v46 = vrot.slane %v112_v27, 2  ;;  %v277_v47 = vrot.slane %v113_v31, 2  ;;  %v86_v48 = vmax.f32 %v46_v22, %v48_v36 }
  0x36   :  { %v568_v49 = vsel %vm561_vm3, %v553_v45, %v398_v38  ;;  %v371_v50 = vrot.slane %v336_v41, 1  ;;  %v399_v51 = vrot.slane %v336_v41, 2  ;;  %v427_v52 = vrot.slane %v336_v41, 3  ;;  %v929_v38 = vld [vmem:[%s1028_s0 + $0x190] sm:$0xff] }
  0x37   :  { %v583_v53 = vsel %vm576_vm4, %v568_v49, %v426_v39  ;;  %v469_v54 = vrot.slane %v337_v42, 4  ;;  %v497_v55 = vrot.slane %v337_v42, 5  ;;  %v525_v56 = vrot.slane %v337_v42, 6 }
  0x38   :  { %v598_v58 = vsel %vm591_vm5, %v583_v53, %v468_v32  ;;  %v554_v59 = vsel %vm546_vm2, %v336_v41, %v371_v50  ;;  %v179_v60 = vsel %vm152_vm0, %v177_v43, %v178_v44  ;;  %v240_v61 = vmax.f32 %v113_v31, %v178_v44 }
  0x39   :  { %v613_v0 = vsel %vm606_vm6, %v598_v58, %v496_v33  ;;  %v569_v1 = vsel %vm561_vm3, %v554_v59, %v399_v51  ;;  %v239_v2 = vmax.f32 %v112_v27, %v179_v60  ;;  %v278_v3 = vsel %vm251_vm1, %v276_v46, %v277_v47  ;;  %v59_v51 = vld [vmem:[%s1028_s0 + $0x198] sm:$0x7f] }
  0x3a   :  { %v627_v4 = vsel %vm251_vm1, %v613_v0, %v524_v34  ;;  %v584_v5 = vsel %vm576_vm4, %v569_v1, %v427_v52  ;;  %v339_v6 = vmax.f32 %v240_v61, %v277_v47  ;;  %v87_v8 = vmax.f32 %v866_v26, %v49_v57 }
  0x3b   :  { %642 = vst.msk [vmem:[%s1029_s1 + $0x30] sm:$0x7f] %vm635_vm7, %v627_v4  ;;  %v599_v10 = vsel %vm591_vm5, %v584_v5, %v469_v54  ;;  %v338_v11 = vmax.f32 %v239_v2, %v278_v3  ;;  %v114_v12 = vmax.f32 %v86_v48, %v50_v62  ;;  %v88_v15 = vmax.f32 %v50_v62, %v52_v63 }
  0x3c   :  { %v614_v16 = vsel %vm606_vm6, %v599_v10, %v497_v55  ;;  %v470_v17 = vrot.slane %v339_v6, 4  ;;  %v498_v18 = vrot.slane %v339_v6, 5  ;;  %v526_v19 = vrot.slane %v339_v6, 6 }
  0x3d   :  { %v628_v22 = vsel %vm251_vm1, %v614_v16, %v525_v56  ;;  %v372_v23 = vrot.slane %v338_v11, 1  ;;  %v400_v24 = vrot.slane %v338_v11, 2  ;;  %v428_v25 = vrot.slane %v338_v11, 3 }
  0x3e   :  { %643 = vst.msk [vmem:[%s1029_s1 + $0x38] sm:$0x7f] %vm635_vm7, %v628_v22  ;;  %v115_v26 = vmax.f32 %v87_v8, %v51_v7  ;;  %v180_v27 = vrot.slane %v114_v12, 1  ;;  %v279_v28 = vrot.slane %v114_v12, 2  ;;  %v89_v29 = vmax.f32 %v51_v7, %v53_v9 }
  0x3f   :  { %v555_v30 = vsel %vm546_vm2, %v338_v11, %v372_v23  ;;  %v116_v31 = vmax.f32 %v88_v15, %v54_v13  ;;  %v90_v32 = vmax.f32 %v54_v13, %v56_v20  ;;  %v91_v33 = vmax.f32 %v55_v14, %v57_v21 }
  0x40   :  { %v570_v34 = vsel %vm561_vm3, %v555_v30, %v400_v24  ;;  %v181_v35 = vrot.slane %v115_v26, 1  ;;  %v280_v36 = vrot.slane %v115_v26, 2  ;;  %v117_v37 = vmax.f32 %v89_v29, %v55_v14  ;;  %v62_v29 = vld [vmem:[%s1028_s0 + $0x1b0] sm:$0xff] }
  0x41   :  { %v585_v39 = vsel %vm576_vm4, %v570_v34, %v428_v25  ;;  %v183_v40 = vrot.slane %v116_v31, 1  ;;  %v282_v41 = vrot.slane %v116_v31, 2  ;;  %v118_v42 = vmax.f32 %v90_v32, %v929_v38  ;;  %v63_v34 = vld [vmem:[%s1028_s0 + $0x1b8] sm:$0x7f] }
  0x42   :  { %v600_v43 = vsel %vm591_vm5, %v585_v39, %v470_v17  ;;  %v182_v44 = vsel %vm152_vm0, %v180_v27, %v181_v35  ;;  %v242_v45 = vmax.f32 %v115_v26, %v181_v35  ;;  %v281_v46 = vsel %vm251_vm1, %v279_v28, %v280_v36  ;;  %v61_v17 = vld [vmem:[%s1028_s0 + $0x1a8] sm:$0x7f] }
  0x43   :  { %v615_v47 = vsel %vm606_vm6, %v600_v43, %v498_v18  ;;  %v241_v48 = vmax.f32 %v114_v12, %v182_v44  ;;  %v184_v49 = vrot.slane %v117_v37, 1  ;;  %v283_v50 = vrot.slane %v117_v37, 2  ;;  %v60_v12 = vld [vmem:[%s1028_s0 + $0x1a0] sm:$0xff]  ;;  %v65_v39 = vld [vmem:[%s1028_s0 + $0x1c8] sm:$0x7f] }
  0x44   :  { %v629_v52 = vsel %vm251_vm1, %v615_v47, %v526_v19  ;;  %v341_v53 = vmax.f32 %v242_v45, %v280_v36  ;;  %v119_v54 = vmax.f32 %v91_v33, %v59_v51  ;;  %v186_v55 = vrot.slane %v118_v42, 1 }
  0x45   :  { %644 = vst.msk [vmem:[%s1029_s1 + $0x40] sm:$0x7f] %vm635_vm7, %v629_v52  ;;  %v340_v56 = vmax.f32 %v241_v48, %v281_v46  ;;  %v185_v57 = vsel %vm152_vm0, %v183_v40, %v184_v49  ;;  %v244_v58 = vmax.f32 %v117_v37, %v184_v49  ;;  %v284_v59 = vsel %vm251_vm1, %v282_v41, %v283_v50  ;;  %v66_v48 = vld [vmem:[%s1028_s0 + $0x1d0] sm:$0xff]  ;;  %v67_v49 = vld [vmem:[%s1028_s0 + $0x1d8] sm:$0x7f] }
  0x46   :  { %v471_v60 = vrot.slane %v341_v53, 4  ;;  %v499_v61 = vrot.slane %v341_v53, 5  ;;  %v527_v62 = vrot.slane %v341_v53, 6  ;;  %v243_v63 = vmax.f32 %v116_v31, %v185_v57 }
  0x47   :  { %v373_v0 = vrot.slane %v340_v56, 1  ;;  %v401_v1 = vrot.slane %v340_v56, 2  ;;  %v429_v2 = vrot.slane %v340_v56, 3  ;;  %v343_v3 = vmax.f32 %v244_v58, %v283_v50 }
  0x48   :  { %v342_v4 = vmax.f32 %v243_v63, %v284_v59  ;;  %v187_v5 = vrot.slane %v119_v54, 1  ;;  %v285_v6 = vrot.slane %v118_v42, 2  ;;  %v286_v7 = vrot.slane %v119_v54, 2 }
  0x49   :  { %v556_v8 = vsel %vm546_vm2, %v340_v56, %v373_v0  ;;  %v472_v9 = vrot.slane %v343_v3, 4  ;;  %v500_v10 = vrot.slane %v343_v3, 5  ;;  %v528_v11 = vrot.slane %v343_v3, 6 }
  0x4a   :  { %v571_v13 = vsel %vm561_vm3, %v556_v8, %v401_v1  ;;  %v374_v14 = vrot.slane %v342_v4, 1  ;;  %v402_v15 = vrot.slane %v342_v4, 2  ;;  %v430_v16 = vrot.slane %v342_v4, 3 }
  0x4b   :  { %v586_v18 = vsel %vm576_vm4, %v571_v13, %v429_v2  ;;  %v188_v19 = vsel %vm152_vm0, %v186_v55, %v187_v5  ;;  %v246_v20 = vmax.f32 %v119_v54, %v187_v5  ;;  %v287_v21 = vsel %vm251_vm1, %v285_v6, %v286_v7 }
  0x4c   :  { %v601_v22 = vsel %vm591_vm5, %v586_v18, %v471_v60  ;;  %v557_v23 = vsel %vm546_vm2, %v342_v4, %v374_v14  ;;  %v245_v24 = vmax.f32 %v118_v42, %v188_v19  ;;  %v92_v25 = vmax.f32 %v929_v38, %v60_v12  ;;  %v64_v38 = vld [vmem:[%s1028_s0 + $0x1c0] sm:$0xff] }
  0x4d   :  { %v616_v26 = vsel %vm606_vm6, %v601_v22, %v499_v61  ;;  %v572_v27 = vsel %vm561_vm3, %v557_v23, %v402_v15  ;;  %v345_v28 = vmax.f32 %v246_v20, %v286_v7  ;;  %v93_v30 = vmax.f32 %v59_v51, %v61_v17 }
  0x4e   :  { %v630_v31 = vsel %vm251_vm1, %v616_v26, %v527_v62  ;;  %v587_v32 = vsel %vm576_vm4, %v572_v27, %v430_v16  ;;  %v344_v33 = vmax.f32 %v245_v24, %v287_v21  ;;  %v120_v35 = vmax.f32 %v92_v25, %v62_v29 }
  0x4f   :  { %645 = vst.msk [vmem:[%s1029_s1 + $0x48] sm:$0x7f] %vm635_vm7, %v630_v31  ;;  %v602_v36 = vsel %vm591_vm5, %v587_v32, %v472_v9  ;;  %v473_v37 = vrot.slane %v345_v28, 4  ;;  %v121_v45 = vmax.f32 %v93_v30, %v63_v34  ;;  %v501_v50 = vrot.slane %v345_v28, 5 }
  0x50   :  { %v617_v40 = vsel %vm606_vm6, %v602_v36, %v500_v10  ;;  %v375_v41 = vrot.slane %v344_v33, 1  ;;  %v403_v42 = vrot.slane %v344_v33, 2  ;;  %v431_v43 = vrot.slane %v344_v33, 3 }
  0x51   :  { %v631_v44 = vsel %vm251_vm1, %v617_v40, %v528_v11  ;;  %v189_v46 = vrot.slane %v120_v35, 1  ;;  %v288_v47 = vrot.slane %v120_v35, 2  ;;  %v94_v52 = vmax.f32 %v62_v29, %v64_v38 }
  0x52   :  { %646 = vst.msk [vmem:[%s1029_s1 + $0x50] sm:$0x7f] %vm635_vm7, %v631_v44  ;;  %v558_v51 = vsel %vm546_vm2, %v344_v33, %v375_v41  ;;  %v95_v53 = vmax.f32 %v63_v34, %v65_v39  ;;  %v529_v54 = vrot.slane %v345_v28, 6  ;;  %v190_v56 = vrot.slane %v121_v45, 1 }
  0x53   :  { %v573_v55 = vsel %vm561_vm3, %v558_v51, %v403_v42  ;;  %v289_v57 = vrot.slane %v121_v45, 2  ;;  %v122_v59 = vmax.f32 %v94_v52, %v66_v48 }
  0x54   :  { %v588_v58 = vsel %vm576_vm4, %v573_v55, %v431_v43  ;;  %v123_v60 = vmax.f32 %v95_v53, %v67_v49  ;;  %v191_v62 = vsel %vm152_vm0, %v189_v46, %v190_v56  ;;  %v248_v63 = vmax.f32 %v121_v45, %v190_v56 }
  0x55   :  { %v603_v61 = vsel %vm591_vm5, %v588_v58, %v473_v37  ;;  %v290_v0 = vsel %vm251_vm1, %v288_v47, %v289_v57  ;;  %v247_v2 = vmax.f32 %v120_v35, %v191_v62  ;;  %v192_v3 = vrot.slane %v122_v59, 1 }
  0x56   :  { %v618_v1 = vsel %vm606_vm6, %v603_v61, %v501_v50  ;;  %v193_v4 = vrot.slane %v123_v60, 1  ;;  %v347_v6 = vmax.f32 %v248_v63, %v289_v57  ;;  %v291_v7 = vrot.slane %v122_v59, 2 }
  0x57   :  { %v632_v5 = vsel %vm251_vm1, %v618_v1, %v529_v54  ;;  %v292_v8 = vrot.slane %v123_v60, 2  ;;  %v346_v9 = vmax.f32 %v247_v2, %v290_v0 }
  0x58   :  { %647 = vst.msk [vmem:[%s1029_s1 + $0x58] sm:$0x7f] %vm635_vm7, %v632_v5  ;;  %v194_v10 = vsel %vm152_vm0, %v192_v3, %v193_v4  ;;  %v250_v11 = vmax.f32 %v123_v60, %v193_v4  ;;  %v474_v17 = vrot.slane %v347_v6, 4  ;;  %v502_v20 = vrot.slane %v347_v6, 5 }
  0x59   :  { %v249_v12 = vmax.f32 %v122_v59, %v194_v10  ;;  %v376_v13 = vrot.slane %v346_v9, 1  ;;  %v404_v14 = vrot.slane %v346_v9, 2  ;;  %v432_v15 = vrot.slane %v346_v9, 3 }
  0x5a   :  { %v293_v16 = vsel %vm251_vm1, %v291_v7, %v292_v8  ;;  %v349_v19 = vmax.f32 %v250_v11, %v292_v8  ;;  %v530_v21 = vrot.slane %v347_v6, 6 }
  0x5b   :  { %v348_v18 = vmax.f32 %v249_v12, %v293_v16  ;;  %v559_v22 = vsel %vm546_vm2, %v346_v9, %v376_v13 }
  0x5c   :  { %v574_v23 = vsel %vm561_vm3, %v559_v22, %v404_v14  ;;  %v475_v28 = vrot.slane %v349_v19, 4  ;;  %v503_v30 = vrot.slane %v349_v19, 5  ;;  %v531_v33 = vrot.slane %v349_v19, 6 }
  0x5d   :  { %v377_v24 = vrot.slane %v348_v18, 1  ;;  %v405_v25 = vrot.slane %v348_v18, 2  ;;  %v433_v26 = vrot.slane %v348_v18, 3  ;;  %v589_v27 = vsel %vm576_vm4, %v574_v23, %v432_v15 }
  0x5e   :  { %v604_v29 = vsel %vm591_vm5, %v589_v27, %v474_v17 }
  0x5f   :  { %v560_v31 = vsel %vm546_vm2, %v348_v18, %v377_v24  ;;  %v619_v32 = vsel %vm606_vm6, %v604_v29, %v502_v20 }
  0x60   :  { %v575_v34 = vsel %vm561_vm3, %v560_v31, %v405_v25  ;;  %v633_v35 = vsel %vm251_vm1, %v619_v32, %v530_v21 }
  0x61   :  { %v590_v36 = vsel %vm576_vm4, %v575_v34, %v433_v26  ;;  %648 = vst.msk [vmem:[%s1029_s1 + $0x60] sm:$0x7f] %vm635_vm7, %v633_v35 }
  0x62   :  { %v605_v37 = vsel %vm591_vm5, %v590_v36, %v475_v28 }
  0x63   :  { %v620_v38 = vsel %vm606_vm6, %v605_v37, %v503_v30 }
  0x64   :  { %v634_v39 = vsel %vm251_vm1, %v620_v38, %v531_v33 }
  0x65   :  { %649 = vst.msk [vmem:[%s1029_s1 + $0x68] sm:$0x7f] %vm635_vm7, %v634_v39 }

// kernel: room_encoder_forward.12
= control target key start
LH: loop header
LB: loop body
LE: loop exit
PB: predicated region body
PF: predicated region fallthrough
CT: control target
= control target key end

     0   :  { %s1186_s12 = smov 0   ;;  %s1188_s13 = smov 0   ;;  %s1407_s0 = inlined_call_operand.vmem [shape: bf16[104,1664], index: 0, kind: input, shape index: {}]   ;;  %s1408_s1 = inlined_call_operand.vmem [shape: bf16[1664,256], index: 1, kind: input, shape index: {}]   ;;  %s1409_s2 = inlined_call_operand.vmem [shape: f32[1,256], index: 2, kind: input, shape index: {}]   ;;  %s1410_s3 = inlined_call_operand.vmem [shape: f32[104,256], index: 3, kind: output, shape index: {}]  }
   0x1   :  { %s1190_s14 = smov 0   ;;  %s1192_s15 = smov 0  }
   0x2   :  { %s1194_s16 = smov 0  }
   0x3 LB: > { %s25_s17 = sadd.s32 1, %s1159_s15  ;;  %p48_p1 = scmp.ne.s32.totalorder %s1151_s13, %s1147_s12  ;;  %s1163_s16 = sphi %s1194_s16, %s13_s16   ;;  %s1159_s15 = sphi %s1192_s15, %s1414_s15   ;;  %s1155_s14 = sphi %s1190_s14, %s1413_s14   ;;  %s1151_s13 = sphi %s1188_s13, %s1412_s13   ;;  %s1147_s12 = sphi %s1186_s12, %s1411_s12  }
   0x4   : > { %p26_p0 = scmp.ge.s32.totalorder %s25_s17, 13  ;;  %p49_p2 = scmp.eq.s32.totalorder %s1163_s16, 0 }
   0x5   : > { %s41_s19 = sadd.s32 1, %s1151_s13  ;;  %p943_p5 = scmp.ge.s32.totalorder %s1163_s16, 13 }
   0x6   : > { %s1416_s17 = smov (%p26_p0, %s25_s17), 0  ;;  %p50_p3 = por %p49_p2, %p48_p1 }
   0x7   : > { %s37_s18 = ssub.s32 %s1159_s15, %s1416_s17  ;;  %164 = sbr.rel (%p943_p5) target bundleno = 30 (0x1e), region = 20 }
   0x8   : > { %p39_p4 = scmp.eq.s32.totalorder %s37_s18, 0 }
   0xa   : > { %s1221_s20 = scalar_select %p39_p4, %s1151_s13, %s41_s19  }
   0xc   : > { %167 = sbr.rel (!%p50_p3) target bundleno = 30 (0x1e), region = 24  ;;  %s169_s21 = sand.u32 (%p50_p3), 1, %s1151_s13  }
   0xd   : > { %s944_s22 = sshll.u32 (%p50_p3), %s1159_s15, 2  ;;  %s1082_s23 = smul.u32 (%p50_p3), 52, %s169_s21 }
   0xe   : > { %s176_s26 = scalar_lea.vmem (%p50_p3), %s1407_s0, %s944_s22 }
   0xf   : > { %v193_v0 = vld [vmem:[%s176_s26] sm:$0xf] (%p50_p3)  ;;  %v195_v1 = vld [vmem:[%s176_s26 + $0x34] sm:$0xf] (%p50_p3)  ;;  %v197_v2 = vld [vmem:[%s176_s26 + $0x68] sm:$0xf] (%p50_p3) }
  0x10   : > { %s171_s27 = scalar_lea.vmem (%p50_p3), [#allocation3], %s1082_s23  ;;  %v199_v3 = vld [vmem:[%s176_s26 + $0x9c] sm:$0xf] (%p50_p3)  ;;  %v201_v4 = vld [vmem:[%s176_s26 + $0xd0] sm:$0xf] (%p50_p3) }
  0x11   : > { %194 = vst [vmem:[%s171_s27] sm:$0xf] %v193_v0  ;;  %v203_v5 = vld [vmem:[%s176_s26 + $0x104] sm:$0xf]  ;;  %v205_v6 = vld [vmem:[%s176_s26 + $0x138] sm:$0xf] }
  0x12   : > { %196 = vst [vmem:[%s171_s27 + $0x4] sm:$0xf] %v195_v1  ;;  %v207_v7 = vld [vmem:[%s176_s26 + $0x16c] sm:$0xf]  ;;  %v209_v8 = vld [vmem:[%s176_s26 + $0x1a0] sm:$0xf] }
  0x13   : > { %198 = vst [vmem:[%s171_s27 + $0x8] sm:$0xf] %v197_v2  ;;  %v211_v9 = vld [vmem:[%s176_s26 + $0x1d4] sm:$0xf]  ;;  %v213_v10 = vld [vmem:[%s176_s26 + $0x208] sm:$0xf] }
  0x14   : > { %200 = vst [vmem:[%s171_s27 + $0xc] sm:$0xf] %v199_v3  ;;  %v215_v11 = vld [vmem:[%s176_s26 + $0x23c] sm:$0xf]  ;;  %v217_v12 = vld [vmem:[%s176_s26 + $0x270] sm:$0xf] }
  0x15   : > { %202 = vst [vmem:[%s171_s27 + $0x10] sm:$0xf] %v201_v4 }
  0x16   : > { %204 = vst [vmem:[%s171_s27 + $0x14] sm:$0xf] %v203_v5 }
  0x17   : > { %206 = vst [vmem:[%s171_s27 + $0x18] sm:$0xf] %v205_v6 }
  0x18   : > { %208 = vst [vmem:[%s171_s27 + $0x1c] sm:$0xf] %v207_v7 }
  0x19   : > { %210 = vst [vmem:[%s171_s27 + $0x20] sm:$0xf] %v209_v8 }
  0x1a   : > { %212 = vst [vmem:[%s171_s27 + $0x24] sm:$0xf] %v211_v9 }
  0x1b   : > { %214 = vst [vmem:[%s171_s27 + $0x28] sm:$0xf] %v213_v10 }
  0x1c   : > { %216 = vst [vmem:[%s171_s27 + $0x2c] sm:$0xf] %v215_v11 }
  0x1d   : > { %218 = vst [vmem:[%s171_s27 + $0x30] sm:$0xf] %v217_v12 }
  0x1e PF: > { %p945_p6 = scmp.ge.s32.totalorder %s1163_s16, 1  ;;  %p282_p7 = scmp.lt.s32.totalorder %s1163_s16, 14 }
  0x20   : > { %p283_p8 = pnand %p945_p6, %p282_p7 }
  0x21   : > { %s289_s28 = sand.u32 (!%p283_p8), 1, %s1147_s12   ;;  %s946_s29 = sshll.u32 (!%p283_p8), %s1155_s14, 4 }
  0x22   : > { %286 = sbr.rel (%p283_p8) target bundleno = 326 (0x146), region = 69  ;;  %p334_p9 = scmp.lt.s32.totalorder (!%p283_p8), %s946_s29, 207 }
  0x23   : > { %s1083_s30 = smul.u32 (!%p283_p8), 52, %s289_s28  ;;  %p949_p10 = scmp.ne.s32.totalorder (!%p283_p8), %s1155_s14, 0 }
  0x25   : > { %s1238_s8 = scalar_lea.vmem (!%p283_p8), [#allocation3], %s1083_s30 }
  0x27   : > { %s1418_s29 = smov (!%p334_p9, %s946_s29), 207  ;;  %364 = sbr.rel (%p949_p10) target bundleno = 71 (0x47), region = 77 }
  0x28   : > { %s1043_s4 = sshll.u32 %s1418_s29, 3 }
  0x29   : > { %s1236_s7 = scalar_lea.vmem %s1408_s1, %s1043_s4 }
  0x2c   : > { %v1165_v13 = vmov 0.0  }
  0x2d   : > { %365 = vst [vmem:[#allocation2 + $0xb0] sm:$0xff] %v1165_v13 }
  0x2e   : > { %366 = vst [vmem:[#allocation2] sm:$0xff] %v1165_v13 }
  0x2f   : > { %367 = vst [vmem:[#allocation2 + $0x10] sm:$0xff] %v1165_v13 }
  0x30   : > { %368 = vst [vmem:[#allocation2 + $0x48] sm:$0xff] %v1165_v13 }
  0x31   : > { %369 = vst [vmem:[#allocation2 + $0x60] sm:$0xff] %v1165_v13 }
  0x32   : > { %370 = vst [vmem:[#allocation2 + $0x28] sm:$0xff] %v1165_v13 }
  0x33   : > { %371 = vst [vmem:[#allocation2 + $0x40] sm:$0xff] %v1165_v13 }
  0x34   : > { %372 = vst [vmem:[#allocation2 + $0x78] sm:$0xff] %v1165_v13 }
  0x35   : > { %373 = vst [vmem:[#allocation2 + $0x80] sm:$0xff] %v1165_v13 }
  0x36   : > { %374 = vst [vmem:[#allocation2 + $0xa8] sm:$0xff] %v1165_v13 }
  0x37   : > { %375 = vst [vmem:[#allocation2 + $0x50] sm:$0xff] %v1165_v13 }
  0x38   : > { %376 = vst [vmem:[#allocation2 + $0x30] sm:$0xff] %v1165_v13 }
  0x39   : > { %377 = vst [vmem:[#allocation2 + $0x88] sm:$0xff] %v1165_v13 }
  0x3a   : > { %378 = vst [vmem:[#allocation2 + $0x70] sm:$0xff] %v1165_v13 }
  0x3b   : > { %379 = vst [vmem:[#allocation2 + $0x8] sm:$0xff] %v1165_v13 }
  0x3c   : > { %380 = vst [vmem:[#allocation2 + $0x38] sm:$0xff] %v1165_v13 }
  0x3d   : > { %381 = vst [vmem:[#allocation2 + $0x20] sm:$0xff] %v1165_v13 }
  0x3e   : > { %382 = vst [vmem:[#allocation2 + $0xb8] sm:$0xff] %v1165_v13 }
  0x3f   : > { %383 = vst [vmem:[#allocation2 + $0x58] sm:$0xff] %v1165_v13 }
  0x40   : > { %384 = vst [vmem:[#allocation2 + $0xc8] sm:$0xff] %v1165_v13 }
  0x41   : > { %385 = vst [vmem:[#allocation2 + $0xa0] sm:$0xff] %v1165_v13 }
  0x42   : > { %386 = vst [vmem:[#allocation2 + $0x90] sm:$0xff] %v1165_v13 }
  0x43   : > { %387 = vst [vmem:[#allocation2 + $0x98] sm:$0xff] %v1165_v13 }
  0x44   : > { %388 = vst [vmem:[#allocation2 + $0x18] sm:$0xff] %v1165_v13 }
  0x45   : > { %389 = vst [vmem:[#allocation2 + $0xc0] sm:$0xff] %v1165_v13 }
  0x46   : > { %390 = vst [vmem:[#allocation2 + $0x68] sm:$0xff] %v1165_v13 }
  0x47 PF: > { %v1032_v14 = vld [vmem:[%s1236_s7 + $0x70] sm:$0xf]  ;;  %v1065_v15 = vld [vmem:[%s1236_s7 + $0x74] sm:$0xf0]  ;;  %v1064_v16 = vld [vmem:[%s1236_s7 + $0x74] sm:$0xf] }
  0x48   : > { %v1033_v17 = vor.u32 %v1065_v15, %v1032_v14  ;;  %v1034_v18 = vld [vmem:[%s1236_s7 + $0x78] sm:$0xf0]  ;;  %v1024_v19 = vld [vmem:[%s1236_s7 + $0x60] sm:$0xf]  ;;  %v1063_v20 = vld [vmem:[%s1236_s7 + $0x64] sm:$0xf0] }
  0x49   : > { %v1037_v21 = vor.u32 %v1064_v16, %v1034_v18  ;;  %v1062_v22 = vld [vmem:[%s1236_s7 + $0x64] sm:$0xf]  ;;  %v1026_v23 = vld [vmem:[%s1236_s7 + $0x68] sm:$0xf0]  ;;  %v1025_v24 = vor.u32 %v1063_v20, %v1024_v19  ;;  %v1016_v26 = vld [vmem:[%s1236_s7 + $0x50] sm:$0xf] }
  0x4a   : > { %1066 = vmatpush.bf16.msra.mxu2 %v1033_v17  ;;  %566 = vmatpush.bf16.msra.mxu0 %v1033_v17  ;;  %v1029_v25 = vor.u32 %v1062_v22, %v1026_v23  ;;  %v1061_v27 = vld [vmem:[%s1236_s7 + $0x54] sm:$0xf0]  ;;  %v1060_v28 = vld [vmem:[%s1236_s7 + $0x54] sm:$0xf]  ;;  %v1018_v29 = vld [vmem:[%s1236_s7 + $0x58] sm:$0xf0] }
  0x4b   : > { %609 = vmatpush.bf16.msra.mxu1 %v1037_v21  ;;  %1074 = vmatpush.bf16.msra.mxu3 %v1037_v21  ;;  %v1017_v30 = vor.u32 %v1061_v27, %v1016_v26  ;;  %v1021_v31 = vor.u32 %v1060_v28, %v1018_v29  ;;  %v1008_v32 = vld [vmem:[%s1236_s7 + $0x40] sm:$0xf]  ;;  %v1059_v33 = vld [vmem:[%s1236_s7 + $0x44] sm:$0xf0]  ;;  %v1058_v34 = vld [vmem:[%s1236_s7 + $0x44] sm:$0xf] }
  0x4c   : > { %v1010_v35 = vld [vmem:[%s1236_s7 + $0x48] sm:$0xf0]  ;;  %v1009_v36 = vor.u32 %v1059_v33, %v1008_v32  ;;  %v1000_v38 = vld [vmem:[%s1236_s7 + $0x30] sm:$0xf]  ;;  %v1057_v39 = vld [vmem:[%s1236_s7 + $0x34] sm:$0xf0] }
  0x4d   : > { %v1013_v37 = vor.u32 %v1058_v34, %v1010_v35  ;;  %v1056_v40 = vld [vmem:[%s1236_s7 + $0x34] sm:$0xf]  ;;  %v1002_v41 = vld [vmem:[%s1236_s7 + $0x38] sm:$0xf0]  ;;  %v1001_v42 = vor.u32 %v1057_v39, %v1000_v38  ;;  %v992_v44 = vld [vmem:[%s1236_s7 + $0x20] sm:$0xf] }
  0x4e   : > { %1067 = vmatpush.bf16.msra.mxu2 %v1025_v24  ;;  %567 = vmatpush.bf16.msra.mxu0 %v1025_v24  ;;  %v1005_v43 = vor.u32 %v1056_v40, %v1002_v41  ;;  %v1055_v45 = vld [vmem:[%s1236_s7 + $0x24] sm:$0xf0]  ;;  %v1054_v46 = vld [vmem:[%s1236_s7 + $0x24] sm:$0xf]  ;;  %v994_v47 = vld [vmem:[%s1236_s7 + $0x28] sm:$0xf0] }
  0x4f   : > { %610 = vmatpush.bf16.msra.mxu1 %v1029_v25  ;;  %1075 = vmatpush.bf16.msra.mxu3 %v1029_v25  ;;  %v993_v48 = vor.u32 %v1055_v45, %v992_v44  ;;  %v997_v49 = vor.u32 %v1054_v46, %v994_v47  ;;  %v984_v50 = vld [vmem:[%s1236_s7 + $0x10] sm:$0xf]  ;;  %v1053_v51 = vld [vmem:[%s1236_s7 + $0x14] sm:$0xf0]  ;;  %v1052_v52 = vld [vmem:[%s1236_s7 + $0x14] sm:$0xf] }
  0x50   : > { %v986_v53 = vld [vmem:[%s1236_s7 + $0x18] sm:$0xf0]  ;;  %v985_v54 = vor.u32 %v1053_v51, %v984_v50  ;;  %v976_v56 = vld [vmem:[%s1236_s7] sm:$0xf]  ;;  %v1051_v57 = vld [vmem:[%s1236_s7 + $0x4] sm:$0xf0] }
  0x51   : > { %v989_v55 = vor.u32 %v1052_v52, %v986_v53  ;;  %v1050_v58 = vld [vmem:[%s1236_s7 + $0x4] sm:$0xf]  ;;  %v978_v59 = vld [vmem:[%s1236_s7 + $0x8] sm:$0xf0]  ;;  %v977_v60 = vor.u32 %v1051_v57, %v976_v56  ;;  %v429_v3 = vld [vmem:[%s1238_s8 + $0x30] sm:$0xf] }
  0x52   : > { %1068 = vmatpush.bf16.msra.mxu2 %v1017_v30  ;;  %568 = vmatpush.bf16.msra.mxu0 %v1017_v30  ;;  %v981_v61 = vor.u32 %v1050_v58, %v978_v59  ;;  %v1047_v62 = vld [vmem:[%s1238_s8 + $0x18] sm:$0xff]  ;;  %v1044_v63 = vld [vmem:[%s1238_s8] sm:$0xff]  ;;  %v1045_v1 = vld [vmem:[%s1238_s8 + $0x8] sm:$0xff]  ;;  %v471_v4 = vunpack.c.l.b16 %v429_v3  ;;  %p1038_p11 = scmp.ne.s32.totalorder %s1155_s14, 12 }
  0x53   : > { %611 = vmatpush.bf16.msra.mxu1 %v1021_v31  ;;  %1076 = vmatpush.bf16.msra.mxu3 %v1021_v31  ;;  %v1048_v0 = vld [vmem:[%s1238_s8 + $0x20] sm:$0xff]  ;;  %v1049_v2 = vld [vmem:[%s1238_s8 + $0x28] sm:$0xff]  ;;  %v1046_v5 = vld [vmem:[%s1238_s8 + $0x10] sm:$0xff] }
  0x54   : > { %v478_v6 = vpack.c.b16 %v471_v4, %v471_v4  ;;  %v391_v7 = vld [vmem:[#allocation2 + $0xb0] sm:$0xff]  ;;  %v392_v8 = vld [vmem:[#allocation2] sm:$0xff]  ;;  %v403_v13 = vld [vmem:[#allocation2 + $0x88] sm:$0xff] }
  0x55   : > { %v408_v14 = vld [vmem:[#allocation2 + $0xb8] sm:$0xff]  ;;  %v393_v16 = vld [vmem:[#allocation2 + $0x10] sm:$0xff]  ;;  %v394_v18 = vld [vmem:[#allocation2 + $0x48] sm:$0xff] }
  0x56   : > { %1069 = vmatpush.bf16.msra.mxu2 %v1009_v36  ;;  %569 = vmatpush.bf16.msra.mxu0 %v1009_v36  ;;  %v405_v25 = vld [vmem:[#allocation2 + $0x8] sm:$0xff]  ;;  %v395_v28 = vld [vmem:[#allocation2 + $0x60] sm:$0xff]  ;;  %v412_v38 = vld [vmem:[#allocation2 + $0x90] sm:$0xff] }
  0x57   : > { %612 = vmatpush.bf16.msra.mxu1 %v1013_v37  ;;  %1077 = vmatpush.bf16.msra.mxu3 %v1013_v37  ;;  %v410_v26 = vld [vmem:[#allocation2 + $0xc8] sm:$0xff]  ;;  %v407_v37 = vld [vmem:[#allocation2 + $0x20] sm:$0xff]  ;;  %v414_v50 = vld [vmem:[#allocation2 + $0x18] sm:$0xff] }
  0x58   : > { %v396_v30 = vld [vmem:[#allocation2 + $0x28] sm:$0xff]  ;;  %v397_v40 = vld [vmem:[#allocation2 + $0x40] sm:$0xff] }
  0x59   : > { %v399_v52 = vld [vmem:[#allocation2 + $0x80] sm:$0xff] }
  0x5a   : > { %1070 = vmatpush.bf16.msra.mxu2 %v1001_v42  ;;  %570 = vmatpush.bf16.msra.mxu0 %v1001_v42  ;;  %v398_v42 = vld [vmem:[#allocation2 + $0x78] sm:$0xff] }
  0x5b   : > { %613 = vmatpush.bf16.msra.mxu1 %v1005_v43  ;;  %1078 = vmatpush.bf16.msra.mxu3 %v1005_v43 }
  0x5e   : > { %1071 = vmatpush.bf16.msra.mxu2 %v993_v48  ;;  %571 = vmatpush.bf16.msra.mxu0 %v993_v48 }
  0x5f   : > { %614 = vmatpush.bf16.msra.mxu1 %v997_v49  ;;  %1079 = vmatpush.bf16.msra.mxu3 %v997_v49  ;;  %v409_v49 = vld [vmem:[#allocation2 + $0x58] sm:$0xff] }
  0x62   : > { %1072 = vmatpush.bf16.msra.mxu2 %v985_v54  ;;  %572 = vmatpush.bf16.msra.mxu0 %v985_v54  ;;  %v400_v54 = vld [vmem:[#allocation2 + $0xa8] sm:$0xff] }
  0x63   : > { %615 = vmatpush.bf16.msra.mxu1 %v989_v55  ;;  %1080 = vmatpush.bf16.msra.mxu3 %v989_v55 }
  0x66   : > { %1073 = vmatpush.bf16.msra.mxu2 %v977_v60  ;;  %573 = vmatpush.bf16.msra.mxu0 %v977_v60 }
  0x67   : > { %616 = vmatpush.bf16.msra.mxu1 %v981_v61  ;;  %1081 = vmatpush.bf16.msra.mxu3 %v981_v61  ;;  %v411_v61 = vld [vmem:[#allocation2 + $0xa0] sm:$0xff] }
  0x69   : > { %589 = vmatmul.bf16.vlgmr.msra.gmra.mxu2 %v1047_v62  ;;  %574 = vmatmul.bf16.vlgmr.msra.gmra.mxu0 %v1044_v63 }
  0x6a   : > { %617 = vmatmul.bf16.vlgmr.msra.gmra.mxu1 %v1044_v63  ;;  %637 = vmatmul.bf16.vlgmr.msra.gmra.mxu3 %v1048_v0 }
  0x79   : > { %594 = vmatmul.bf16.gmra.mxu2 %v1048_v0  ;;  %579 = vmatmul.bf16.gmra.mxu0 %v1045_v1  ;;  %v401_v0 = vld [vmem:[#allocation2 + $0x50] sm:$0xff] }
  0x7a   : > { %622 = vmatmul.bf16.gmra.mxu1 %v1045_v1  ;;  %642 = vmatmul.bf16.gmra.mxu3 %v1049_v2 }
  0x89   : > { %599 = vmatmul.bf16.gmra.mxu2 %v1049_v2  ;;  %584 = vmatmul.bf16.gmra.mxu0 %v1046_v5  ;;  %v402_v2 = vld [vmem:[#allocation2 + $0x30] sm:$0xff] }
  0x8a   : > { %627 = vmatmul.bf16.gmra.mxu1 %v1046_v5  ;;  %647 = vmatmul.bf16.gmra.mxu3 %v478_v6 }
  0x99   : > { %604 = vmatmul.bf16.gmra.mxu2 %v478_v6 }
  0x9a   : > { %632 = vmatmul.bf16.gmra.mxu1 %v1047_v62  ;;  %v416_v62 = vld [vmem:[#allocation2 + $0x68] sm:$0xff] }
  0xe6   : > { %v575_v9 = vpop.f32.mrf.mxu0 }
  0xe7   : > { %v618_v10 = vpop.f32.mrf.mxu1  ;;  %v652_v11 = vadd.f32 %v575_v9, %v391_v7  ;;  %v413_v9 = vld [vmem:[#allocation2 + $0x98] sm:$0xff] }
  0xe8   : > { %v653_v12 = vadd.f32 %v618_v10, %v392_v8 }
  0xe9   : > { %678 = vst [vmem:[#allocation2 + $0xb0] sm:$0xff] %v652_v11 }
  0xea   : > { %679 = vst [vmem:[#allocation2] sm:$0xff] %v653_v12  ;;  %v404_v12 = vld [vmem:[#allocation2 + $0x70] sm:$0xff] }
  0xec   : > { %v590_v15 = vpop.f32.mrf.mxu2 }
  0xed   : > { %v664_v17 = vadd.f32 %v590_v15, %v403_v13  ;;  %v638_v19 = vpop.f32.mrf.mxu3 }
  0xee   : > { %v669_v20 = vadd.f32 %v638_v19, %v408_v14  ;;  %v577_v21 = vpop.f32.mrf.mxu0  ;;  %v406_v19 = vld [vmem:[#allocation2 + $0x38] sm:$0xff] }
  0xef   : > { %690 = vst [vmem:[#allocation2 + $0x88] sm:$0xff] %v664_v17  ;;  %v620_v22 = vpop.f32.mrf.mxu1  ;;  %v654_v23 = vadd.f32 %v577_v21, %v393_v16  ;;  %v415_v16 = vld [vmem:[#allocation2 + $0xc0] sm:$0xff] }
  0xf0   : > { %v655_v24 = vadd.f32 %v620_v22, %v394_v18  ;;  %695 = vst [vmem:[#allocation2 + $0xb8] sm:$0xff] %v669_v20 }
  0xf1   : > { %680 = vst [vmem:[#allocation2 + $0x10] sm:$0xff] %v654_v23 }
  0xf2   : > { %681 = vst [vmem:[#allocation2 + $0x48] sm:$0xff] %v655_v24 }
  0xf4   : > { %v592_v27 = vpop.f32.mrf.mxu2 }
  0xf5   : > { %v666_v29 = vadd.f32 %v592_v27, %v405_v25  ;;  %v640_v31 = vpop.f32.mrf.mxu3 }
  0xf6   : > { %v671_v32 = vadd.f32 %v640_v31, %v410_v26  ;;  %v580_v33 = vpop.f32.mrf.mxu0 }
  0xf7   : > { %692 = vst [vmem:[#allocation2 + $0x8] sm:$0xff] %v666_v29  ;;  %v623_v34 = vpop.f32.mrf.mxu1  ;;  %v656_v35 = vadd.f32 %v580_v33, %v395_v28 }
  0xf8   : > { %v657_v36 = vadd.f32 %v623_v34, %v396_v30  ;;  %697 = vst [vmem:[#allocation2 + $0xc8] sm:$0xff] %v671_v32 }
  0xf9   : > { %682 = vst [vmem:[#allocation2 + $0x60] sm:$0xff] %v656_v35 }
  0xfa   : > { %683 = vst [vmem:[#allocation2 + $0x28] sm:$0xff] %v657_v36 }
  0xfc   : > { %v595_v39 = vpop.f32.mrf.mxu2 }
  0xfd   : > { %v668_v41 = vadd.f32 %v595_v39, %v407_v37  ;;  %v643_v43 = vpop.f32.mrf.mxu3 }
  0xfe   : > { %v673_v44 = vadd.f32 %v643_v43, %v412_v38  ;;  %v582_v45 = vpop.f32.mrf.mxu0 }
  0xff   : > { %694 = vst [vmem:[#allocation2 + $0x20] sm:$0xff] %v668_v41  ;;  %v625_v46 = vpop.f32.mrf.mxu1  ;;  %v658_v47 = vadd.f32 %v582_v45, %v397_v40 }
 0x100   : > { %v659_v48 = vadd.f32 %v625_v46, %v398_v42  ;;  %699 = vst [vmem:[#allocation2 + $0x90] sm:$0xff] %v673_v44 }
 0x101   : > { %684 = vst [vmem:[#allocation2 + $0x40] sm:$0xff] %v658_v47 }
 0x102   : > { %685 = vst [vmem:[#allocation2 + $0x78] sm:$0xff] %v659_v48 }
 0x104   : > { %v597_v51 = vpop.f32.mrf.mxu2 }
 0x105   : > { %v670_v53 = vadd.f32 %v597_v51, %v409_v49  ;;  %v645_v55 = vpop.f32.mrf.mxu3 }
 0x106   : > { %v675_v56 = vadd.f32 %v645_v55, %v414_v50  ;;  %v585_v57 = vpop.f32.mrf.mxu0 }
 0x107   : > { %696 = vst [vmem:[#allocation2 + $0x58] sm:$0xff] %v670_v53  ;;  %v628_v58 = vpop.f32.mrf.mxu1  ;;  %v660_v59 = vadd.f32 %v585_v57, %v399_v52 }
 0x108   : > { %v661_v60 = vadd.f32 %v628_v58, %v400_v54  ;;  %701 = vst [vmem:[#allocation2 + $0x18] sm:$0xff] %v675_v56 }
 0x109   : > { %686 = vst [vmem:[#allocation2 + $0x80] sm:$0xff] %v660_v59 }
 0x10a   : > { %687 = vst [vmem:[#allocation2 + $0xa8] sm:$0xff] %v661_v60 }
 0x10c   : > { %v600_v63 = vpop.f32.mrf.mxu2 }
 0x10d   : > { %v672_v1 = vadd.f32 %v600_v63, %v411_v61  ;;  %v648_v3 = vpop.f32.mrf.mxu3 }
 0x10e   : > { %v677_v4 = vadd.f32 %v648_v3, %v416_v62  ;;  %v587_v5 = vpop.f32.mrf.mxu0 }
 0x10f   : > { %698 = vst [vmem:[#allocation2 + $0xa0] sm:$0xff] %v672_v1  ;;  %v630_v6 = vpop.f32.mrf.mxu1  ;;  %v662_v7 = vadd.f32 %v587_v5, %v401_v0 }
 0x110   : > { %v663_v8 = vadd.f32 %v630_v6, %v402_v2  ;;  %703 = vst [vmem:[#allocation2 + $0x68] sm:$0xff] %v677_v4 }
 0x111   : > { %688 = vst [vmem:[#allocation2 + $0x50] sm:$0xff] %v662_v7 }
 0x112   : > { %689 = vst [vmem:[#allocation2 + $0x30] sm:$0xff] %v663_v8 }
 0x114   : > { %v602_v10 = vpop.f32.mrf.mxu2 }
 0x115   : > { %v674_v11 = vadd.f32 %v602_v10, %v413_v9  ;;  %v650_v13 = vpop.f32.mrf.mxu3 }
 0x117   : > { %700 = vst [vmem:[#allocation2 + $0x98] sm:$0xff] %v674_v11  ;;  %v633_v14 = vpop.f32.mrf.mxu1 }
 0x118   : > { %v665_v15 = vadd.f32 %v633_v14, %v404_v12 }
 0x11a   : > { %691 = vst [vmem:[#allocation2 + $0x70] sm:$0xff] %v665_v15 }
 0x11c   : > { %v605_v17 = vpop.f32.mrf.mxu2 }
 0x11d   : > { %v676_v18 = vadd.f32 %v605_v17, %v415_v16 }
 0x11f   : > { %702 = vst [vmem:[#allocation2 + $0xc0] sm:$0xff] %v676_v18  ;;  %v635_v20 = vpop.f32.mrf.mxu1 }
 0x120   : > { %v667_v21 = vadd.f32 %v635_v20, %v406_v19  ;;  %707 = sbr.rel (%p1038_p11) target bundleno = 326 (0x146), region = 81 }
 0x122   : > { %693 = vst [vmem:[#allocation2 + $0x38] sm:$0xff] %v667_v21 }
 0x124   : > { %v607_v22 = vpop.f32.mrf.mxu2 }
 0x125   : > { %v708_v23 = vld [vmem:[#allocation2 + $0xb0] sm:$0xff]  ;;  %v734_v24 = vld [vmem:[%s1409_s2] sm:$0x3]  ;;  %v711_v29 = vld [vmem:[#allocation2 + $0x48] sm:$0xff] }
 0x126   : > { %v709_v25 = vld [vmem:[#allocation2] sm:$0xff]  ;;  %v1284_v26 = vperm.slane %v734_v24, 0  ;;  %v1286_v27 = vperm.slane %v734_v24, 1  ;;  %v710_v28 = vld [vmem:[#allocation2 + $0x10] sm:$0xff]  ;;  %v713_v31 = vld [vmem:[#allocation2 + $0x28] sm:$0xff] }
 0x127   : > { %v712_v30 = vld [vmem:[#allocation2 + $0x60] sm:$0xff]  ;;  %v715_v37 = vld [vmem:[#allocation2 + $0x78] sm:$0xff]  ;;  %v717_v45 = vld [vmem:[#allocation2 + $0xa8] sm:$0xff] }
 0x128   : > { %v714_v32 = vld [vmem:[#allocation2 + $0x40] sm:$0xff]  ;;  %v740_v33 = vadd.f32 %v1284_v26, %v708_v23  ;;  %v741_v34 = vadd.f32 %v1286_v27, %v709_v25  ;;  %v742_v35 = vadd.f32 %v1284_v26, %v710_v28  ;;  %v743_v36 = vadd.f32 %v1286_v27, %v711_v29  ;;  %v718_v48 = vld [vmem:[#allocation2 + $0x50] sm:$0xff]  ;;  %v720_v54 = vld [vmem:[#allocation2 + $0x88] sm:$0xff] }
 0x129   : > { %v744_v38 = vadd.f32 %v1284_v26, %v712_v30  ;;  %v745_v39 = vadd.f32 %v1286_v27, %v713_v31  ;;  %v716_v40 = vld [vmem:[#allocation2 + $0x80] sm:$0xff]  ;;  %v746_v44 = vadd.f32 %v1284_v26, %v714_v32  ;;  %v747_v47 = vadd.f32 %v1286_v27, %v715_v37  ;;  %v719_v51 = vld [vmem:[#allocation2 + $0x30] sm:$0xff]  ;;  %v722_v60 = vld [vmem:[#allocation2 + $0x8] sm:$0xff] }
 0x12a   : > { %v766_v41 = vmax.f32 %v740_v33, 0.0  ;;  %v767_v42 = vmax.f32 %v741_v34, 0.0  ;;  %v768_v43 = vmax.f32 %v742_v35, 0.0  ;;  %v769_v46 = vmax.f32 %v743_v36, 0.0  ;;  %v721_v57 = vld [vmem:[#allocation2 + $0x70] sm:$0xff]  ;;  %v723_v63 = vld [vmem:[#allocation2 + $0x38] sm:$0xff] }
 0x12b   : > { %v770_v49 = vmax.f32 %v744_v38, 0.0  ;;  %v748_v50 = vadd.f32 %v1284_v26, %v716_v40  ;;  %v771_v52 = vmax.f32 %v745_v39, 0.0  ;;  %v749_v53 = vadd.f32 %v1286_v27, %v717_v45  ;;  %v724_v2 = vld [vmem:[#allocation2 + $0x20] sm:$0xff]  ;;  %v725_v5 = vld [vmem:[#allocation2 + $0xb8] sm:$0xff]  ;;  %v727_v11 = vld [vmem:[#allocation2 + $0xc8] sm:$0xff] }
 0x12c   : > { %792 = vst [vmem:[%s1410_s3] sm:$0xff] %v766_v41  ;;  %v772_v55 = vmax.f32 %v746_v44, 0.0  ;;  %v750_v56 = vadd.f32 %v1284_v26, %v718_v48  ;;  %v773_v58 = vmax.f32 %v747_v47, 0.0  ;;  %v751_v59 = vadd.f32 %v1286_v27, %v719_v51  ;;  %v726_v8 = vld [vmem:[#allocation2 + $0x58] sm:$0xff]  ;;  %v728_v14 = vld [vmem:[#allocation2 + $0xa0] sm:$0xff]  ;;  %v729_v17 = vld [vmem:[#allocation2 + $0x90] sm:$0xff] }
 0x12d   : > { %793 = vst [vmem:[%s1410_s3 + $0x8] sm:$0xff] %v767_v42  ;;  %v774_v61 = vmax.f32 %v748_v50, 0.0  ;;  %v752_v62 = vadd.f32 %v1284_v26, %v720_v54  ;;  %v775_v0 = vmax.f32 %v749_v53, 0.0  ;;  %v753_v1 = vadd.f32 %v1286_v27, %v721_v57  ;;  %v730_v20 = vld [vmem:[#allocation2 + $0x98] sm:$0xff]  ;;  %v732_v28 = vld [vmem:[#allocation2 + $0xc0] sm:$0xff]  ;;  %v733_v31 = vld [vmem:[#allocation2 + $0x68] sm:$0xff] }
 0x12e   : > { %794 = vst [vmem:[%s1410_s3 + $0x10] sm:$0xff] %v768_v43  ;;  %v776_v3 = vmax.f32 %v750_v56, 0.0  ;;  %v754_v4 = vadd.f32 %v1284_v26, %v722_v60  ;;  %v777_v6 = vmax.f32 %v751_v59, 0.0  ;;  %v755_v7 = vadd.f32 %v1286_v27, %v723_v63  ;;  %v731_v23 = vld [vmem:[#allocation2 + $0x18] sm:$0xff] }
 0x12f   : > { %795 = vst [vmem:[%s1410_s3 + $0x18] sm:$0xff] %v769_v46  ;;  %v778_v9 = vmax.f32 %v752_v62, 0.0  ;;  %v756_v10 = vadd.f32 %v1284_v26, %v724_v2  ;;  %v779_v12 = vmax.f32 %v753_v1, 0.0  ;;  %v757_v13 = vadd.f32 %v1286_v27, %v725_v5 }
 0x130   : > { %796 = vst [vmem:[%s1410_s3 + $0x20] sm:$0xff] %v770_v49  ;;  %v780_v15 = vmax.f32 %v754_v4, 0.0  ;;  %v758_v16 = vadd.f32 %v1284_v26, %v726_v8  ;;  %v781_v18 = vmax.f32 %v755_v7, 0.0  ;;  %v759_v19 = vadd.f32 %v1286_v27, %v727_v11 }
 0x131   : > { %797 = vst [vmem:[%s1410_s3 + $0x28] sm:$0xff] %v771_v52  ;;  %v782_v21 = vmax.f32 %v756_v10, 0.0  ;;  %v760_v22 = vadd.f32 %v1284_v26, %v728_v14  ;;  %v783_v24 = vmax.f32 %v757_v13, 0.0  ;;  %v761_v25 = vadd.f32 %v1286_v27, %v729_v17 }
 0x132   : > { %798 = vst [vmem:[%s1410_s3 + $0x30] sm:$0xff] %v772_v55  ;;  %v784_v29 = vmax.f32 %v758_v16, 0.0  ;;  %v762_v30 = vadd.f32 %v1284_v26, %v730_v20  ;;  %v785_v32 = vmax.f32 %v759_v19, 0.0  ;;  %v763_v33 = vadd.f32 %v1286_v27, %v731_v23 }
 0x133   : > { %799 = vst [vmem:[%s1410_s3 + $0x38] sm:$0xff] %v773_v58  ;;  %v786_v34 = vmax.f32 %v760_v22, 0.0  ;;  %v764_v35 = vadd.f32 %v1284_v26, %v732_v28  ;;  %v787_v36 = vmax.f32 %v761_v25, 0.0  ;;  %v765_v37 = vadd.f32 %v1286_v27, %v733_v31 }
 0x134   : > { %800 = vst [vmem:[%s1410_s3 + $0x40] sm:$0xff] %v774_v61  ;;  %v788_v38 = vmax.f32 %v762_v30, 0.0  ;;  %v789_v39 = vmax.f32 %v763_v33, 0.0 }
 0x135   : > { %801 = vst [vmem:[%s1410_s3 + $0x48] sm:$0xff] %v775_v0  ;;  %v790_v26 = vmax.f32 %v764_v35, 0.0  ;;  %v791_v27 = vmax.f32 %v765_v37, 0.0 }
 0x136   : > { %802 = vst [vmem:[%s1410_s3 + $0x50] sm:$0xff] %v776_v3 }
 0x137   : > { %803 = vst [vmem:[%s1410_s3 + $0x58] sm:$0xff] %v777_v6 }
 0x138   : > { %804 = vst [vmem:[%s1410_s3 + $0x60] sm:$0xff] %v778_v9 }
 0x139   : > { %805 = vst [vmem:[%s1410_s3 + $0x68] sm:$0xff] %v779_v12 }
 0x13a   : > { %806 = vst [vmem:[%s1410_s3 + $0x70] sm:$0xff] %v780_v15 }
 0x13b   : > { %807 = vst [vmem:[%s1410_s3 + $0x78] sm:$0xff] %v781_v18 }
 0x13c   : > { %808 = vst [vmem:[%s1410_s3 + $0x80] sm:$0xff] %v782_v21 }
 0x13d   : > { %809 = vst [vmem:[%s1410_s3 + $0x88] sm:$0xff] %v783_v24 }
 0x13e   : > { %810 = vst [vmem:[%s1410_s3 + $0x90] sm:$0xff] %v784_v29 }
 0x13f   : > { %811 = vst [vmem:[%s1410_s3 + $0x98] sm:$0xff] %v785_v32 }
 0x140   : > { %812 = vst [vmem:[%s1410_s3 + $0xa0] sm:$0xff] %v786_v34 }
 0x141   : > { %813 = vst [vmem:[%s1410_s3 + $0xa8] sm:$0xff] %v787_v36 }
 0x142   : > { %814 = vst [vmem:[%s1410_s3 + $0xb0] sm:$0xff] %v788_v38 }
 0x143   : > { %815 = vst [vmem:[%s1410_s3 + $0xb8] sm:$0xff] %v789_v39 }
 0x144   : > { %816 = vst [vmem:[%s1410_s3 + $0xc0] sm:$0xff] %v790_v26 }
 0x145   : > { %817 = vst [vmem:[%s1410_s3 + $0xc8] sm:$0xff] %v791_v27 }
 0x146 PF: > { %s13_s16 = sadd.s32 1, %s1163_s16   ;;  %s1411_s12 = smov %s1151_s13 }
 0x147   : > { %p10_p12 = scmp.ge.s32.totalorder %s13_s16, 15   ;;  %s1412_s13 = smov %s1221_s20 }
 0x148   : > { %s1413_s14 = smov %s1159_s15  ;;  %s1414_s15 = smov %s1416_s17 }
 0x149   :  { %12 = sbr.rel (!%p10_p12) target bundleno = 3 (0x3), region = 122 }

// kernel: room_encoder_forward.13
= control target key start
LH: loop header
LB: loop body
LE: loop exit
PB: predicated region body
PF: predicated region fallthrough
CT: control target
= control target key end

     0   :  { %vm204_vm0 = vcmask 1040384   ;;  %vm217_vm1 = vcmask 1041408   ;;  %vm261_vm2 = vcmask 1042432   ;;  %vm262_vm3 = vcmask 522244   ;;  %s434_s0 = inlined_call_operand.vmem [shape: f32[2,7,7,192], index: 0, kind: input, shape index: {}]   ;;  %s435_s1 = inlined_call_operand.vmem [shape: f32[2,3,3,192], index: 1, kind: output, shape index: {}]  }
   0x1   :  { %v8_v0 = vld [vmem:[%s434_s0] sm:$0x7f]  ;;  %v9_v1 = vld [vmem:[%s434_s0 + $0x8] sm:$0x7f]  ;;  %v10_v2 = vld [vmem:[%s434_s0 + $0x10] sm:$0x7f] }
   0x2   :  { %v11_v3 = vld [vmem:[%s434_s0 + $0x18] sm:$0x7f]  ;;  %v12_v4 = vld [vmem:[%s434_s0 + $0x20] sm:$0x7f]  ;;  %v13_v5 = vld [vmem:[%s434_s0 + $0x28] sm:$0x7f]  ;;  %v36_v6 = vmax.f32 %v8_v0, %v10_v2 }
   0x3   :  { %v37_v7 = vmax.f32 %v9_v1, %v11_v3  ;;  %v14_v8 = vld [vmem:[%s434_s0 + $0x30] sm:$0x7f]  ;;  %v15_v9 = vld [vmem:[%s434_s0 + $0x38] sm:$0x7f]  ;;  %v16_v11 = vld [vmem:[%s434_s0 + $0x40] sm:$0x7f] }
   0x4   :  { %v48_v10 = vmax.f32 %v36_v6, %v12_v4  ;;  %v17_v12 = vld [vmem:[%s434_s0 + $0x48] sm:$0x7f]  ;;  %v38_v13 = vmax.f32 %v12_v4, %v14_v8  ;;  %v39_v14 = vmax.f32 %v13_v5, %v15_v9  ;;  %v18_v16 = vld [vmem:[%s434_s0 + $0x50] sm:$0x7f]  ;;  %v19_v17 = vld [vmem:[%s434_s0 + $0x58] sm:$0x7f] }
   0x5   :  { %v49_v15 = vmax.f32 %v37_v7, %v13_v5  ;;  %v20_v22 = vld [vmem:[%s434_s0 + $0x60] sm:$0x7f]  ;;  %v21_v23 = vld [vmem:[%s434_s0 + $0x68] sm:$0x7f]  ;;  %v40_v26 = vmax.f32 %v16_v11, %v18_v16  ;;  %v41_v27 = vmax.f32 %v17_v12, %v19_v17  ;;  %v22_v28 = vld [vmem:[%s434_s0 + $0x70] sm:$0x7f] }
   0x6   :  { %v72_v18 = vrot.slane %v48_v10, 1  ;;  %v108_v19 = vrot.slane %v48_v10, 2  ;;  %v50_v20 = vmax.f32 %v38_v13, %v16_v11  ;;  %v51_v21 = vmax.f32 %v39_v14, %v17_v12  ;;  %v24_v29 = vld [vmem:[%s434_s0 + $0x80] sm:$0x7f]  ;;  %v23_v62 = vld [vmem:[%s434_s0 + $0x78] sm:$0x7f]  ;;  %vm346_vm5 = vmor %vm262_vm3, %vm261_vm2 }
   0x7   :  { %v73_v24 = vrot.slane %v49_v15, 1  ;;  %v109_v25 = vrot.slane %v49_v15, 2  ;;  %vm248_vm4 = vcmask 1043456   ;;  %v52_v36 = vmax.f32 %v40_v26, %v20_v22  ;;  %v25_v63 = vld [vmem:[%s434_s0 + $0x88] sm:$0x7f] }
   0x8   :  { %v96_v30 = vmax.f32 %v48_v10, %v72_v18  ;;  %v74_v31 = vrot.slane %v50_v20, 1  ;;  %v75_v32 = vrot.slane %v51_v21, 1  ;;  %v110_v33 = vrot.slane %v50_v20, 2  ;;  %v26_v9 = vld [vmem:[%s434_s0 + $0x90] sm:$0x7f] }
   0x9   :  { %v97_v34 = vmax.f32 %v49_v15, %v73_v24  ;;  %v111_v35 = vrot.slane %v51_v21, 2  ;;  %v53_v37 = vmax.f32 %v41_v27, %v21_v23  ;;  %v42_v41 = vmax.f32 %v22_v28, %v24_v29  ;;  %v28_v10 = vld [vmem:[%s434_s0 + $0xa0] sm:$0x7f]  ;;  %v27_v14 = vld [vmem:[%s434_s0 + $0x98] sm:$0x7f] }
   0xa   :  { %v132_v38 = vmax.f32 %v96_v30, %v108_v19  ;;  %v98_v39 = vmax.f32 %v50_v20, %v74_v31  ;;  %v99_v40 = vmax.f32 %v51_v21, %v75_v32  ;;  %v76_v43 = vrot.slane %v52_v36, 1  ;;  %v29_v20 = vld [vmem:[%s434_s0 + $0xa8] sm:$0x7f]  ;;  %v30_v21 = vld [vmem:[%s434_s0 + $0xb0] sm:$0x7f] }
   0xb   :  { %v133_v42 = vmax.f32 %v97_v34, %v109_v25  ;;  %v77_v44 = vrot.slane %v53_v37, 1  ;;  %v112_v45 = vrot.slane %v52_v36, 2  ;;  %v113_v61 = vrot.slane %v53_v37, 2  ;;  %v31_v25 = vld [vmem:[%s434_s0 + $0xb8] sm:$0x7f] }
   0xc   :  { %v156_v46 = vrot.slane %v132_v38, 1  ;;  %v180_v47 = vrot.slane %v132_v38, 2  ;;  %v134_v48 = vmax.f32 %v98_v39, %v110_v33  ;;  %v135_v49 = vmax.f32 %v99_v40, %v111_v35  ;;  %v32_v27 = vld [vmem:[%s434_s0 + $0xc0] sm:$0x7f]  ;;  %v33_v32 = vld [vmem:[%s434_s0 + $0xc8] sm:$0x7f] }
   0xd   :  { %v157_v50 = vrot.slane %v133_v42, 1  ;;  %v181_v51 = vrot.slane %v133_v42, 2  ;;  %v100_v52 = vmax.f32 %v52_v36, %v76_v43  ;;  %v101_v53 = vmax.f32 %v53_v37, %v77_v44  ;;  %v34_v40 = vld [vmem:[%s434_s0 + $0xd0] sm:$0x7f]  ;;  %v35_v44 = vld [vmem:[%s434_s0 + $0xd8] sm:$0x7f] }
   0xe   :  { %v205_v54 = vsel %vm204_vm0, %v132_v38, %v156_v46  ;;  %v158_v55 = vrot.slane %v134_v48, 1  ;;  %v159_v56 = vrot.slane %v135_v49, 1  ;;  %v182_v57 = vrot.slane %v134_v48, 2 }
   0xf   :  { %v206_v58 = vsel %vm204_vm0, %v133_v42, %v157_v50  ;;  %v218_v59 = vsel %vm217_vm1, %v205_v54, %v180_v47  ;;  %v183_v60 = vrot.slane %v135_v49, 2  ;;  %v136_v3 = vmax.f32 %v100_v52, %v112_v45 }
  0x10   :  { %v219_v0 = vsel %vm217_vm1, %v206_v58, %v181_v51  ;;  %v207_v1 = vsel %vm204_vm0, %v134_v48, %v158_v55  ;;  %v208_v2 = vsel %vm204_vm0, %v135_v49, %v159_v56  ;;  %v137_v8 = vmax.f32 %v101_v53, %v113_v61 }
  0x11   :  { %v242_v4 = vrot.slane %v219_v0, 4  ;;  %v220_v6 = vsel %vm217_vm1, %v207_v1, %v182_v57  ;;  %v221_v7 = vsel %vm217_vm1, %v208_v2, %v183_v60  ;;  %v160_v12 = vrot.slane %v136_v3, 1 }
  0x12   :  { %v243_v11 = vrot.slane %v221_v7, 4  ;;  %v184_v13 = vrot.slane %v136_v3, 2  ;;  %v43_v15 = vmax.f32 %v23_v62, %v25_v63  ;;  %v161_v17 = vrot.slane %v137_v8, 1 }
  0x13   :  { %v249_v16 = vsel %vm248_vm4, %v218_v59, %v242_v4  ;;  %v185_v18 = vrot.slane %v137_v8, 2  ;;  %v54_v19 = vmax.f32 %v42_v41, %v26_v9  ;;  %v209_v23 = vsel %vm204_vm0, %v136_v3, %v160_v12 }
  0x14   :  { %264 = vst.msk [vmem:[%s435_s1] sm:$0x77] %vm346_vm5, %v249_v16  ;;  %v250_v22 = vsel %vm248_vm4, %v220_v6, %v243_v11  ;;  %v55_v24 = vmax.f32 %v43_v15, %v27_v14  ;;  %v44_v26 = vmax.f32 %v26_v9, %v28_v10  ;;  %v210_v28 = vsel %vm204_vm0, %v137_v8, %v161_v17 }
  0x15   :  { %265 = vst.msk [vmem:[%s435_s1 + $0x8] sm:$0x77] %vm346_vm5, %v250_v22  ;;  %v222_v29 = vsel %vm217_vm1, %v209_v23, %v184_v13  ;;  %v78_v30 = vrot.slane %v54_v19, 1  ;;  %v114_v31 = vrot.slane %v54_v19, 2  ;;  %v223_v33 = vsel %vm217_vm1, %v210_v28, %v185_v18 }
  0x16   :  { %v79_v34 = vrot.slane %v55_v24, 1  ;;  %v115_v35 = vrot.slane %v55_v24, 2  ;;  %v45_v36 = vmax.f32 %v27_v14, %v29_v20  ;;  %v244_v37 = vrot.slane %v223_v33, 4 }
  0x17   :  { %v102_v38 = vmax.f32 %v54_v19, %v78_v30  ;;  %v56_v39 = vmax.f32 %v44_v26, %v30_v21  ;;  %v46_v41 = vmax.f32 %v30_v21, %v32_v27  ;;  %v47_v45 = vmax.f32 %v31_v25, %v33_v32 }
  0x18   :  { %v103_v42 = vmax.f32 %v55_v24, %v79_v34  ;;  %v57_v43 = vmax.f32 %v45_v36, %v31_v25  ;;  %v251_v46 = vsel %vm248_vm4, %v222_v29, %v244_v37 }
  0x19   :  { %v138_v47 = vmax.f32 %v102_v38, %v114_v31  ;;  %v80_v48 = vrot.slane %v56_v39, 1  ;;  %v116_v49 = vrot.slane %v56_v39, 2  ;;  %266 = vst.msk [vmem:[%s435_s1 + $0x10] sm:$0x77] %vm346_vm5, %v251_v46  ;;  %v58_v53 = vmax.f32 %v46_v41, %v34_v40 }
  0x1a   :  { %v139_v50 = vmax.f32 %v103_v42, %v115_v35  ;;  %v81_v51 = vrot.slane %v57_v43, 1  ;;  %v117_v52 = vrot.slane %v57_v43, 2  ;;  %v59_v57 = vmax.f32 %v47_v45, %v35_v44 }
  0x1b   :  { %v162_v54 = vrot.slane %v138_v47, 1  ;;  %v186_v55 = vrot.slane %v138_v47, 2  ;;  %v104_v56 = vmax.f32 %v56_v39, %v80_v48  ;;  %v82_v61 = vrot.slane %v58_v53, 1 }
  0x1c   :  { %v163_v58 = vrot.slane %v139_v50, 1  ;;  %v187_v59 = vrot.slane %v139_v50, 2  ;;  %v105_v60 = vmax.f32 %v57_v43, %v81_v51  ;;  %v83_v0 = vrot.slane %v59_v57, 1 }
  0x1d   :  { %v211_v62 = vsel %vm204_vm0, %v138_v47, %v162_v54  ;;  %v140_v63 = vmax.f32 %v104_v56, %v116_v49  ;;  %v118_v1 = vrot.slane %v58_v53, 2  ;;  %v106_v6 = vmax.f32 %v58_v53, %v82_v61 }
  0x1e   :  { %v212_v2 = vsel %vm204_vm0, %v139_v50, %v163_v58  ;;  %v224_v3 = vsel %vm217_vm1, %v211_v62, %v186_v55  ;;  %v141_v4 = vmax.f32 %v105_v60, %v117_v52  ;;  %v107_v10 = vmax.f32 %v59_v57, %v83_v0 }
  0x1f   :  { %v225_v7 = vsel %vm217_vm1, %v212_v2, %v187_v59  ;;  %v164_v8 = vrot.slane %v140_v63, 1  ;;  %v188_v9 = vrot.slane %v140_v63, 2  ;;  %v119_v14 = vrot.slane %v59_v57, 2 }
  0x20   :  { %v245_v11 = vrot.slane %v225_v7, 4  ;;  %v165_v12 = vrot.slane %v141_v4, 1  ;;  %v189_v13 = vrot.slane %v141_v4, 2  ;;  %v142_v16 = vmax.f32 %v106_v6, %v118_v1 }
  0x21   :  { %v213_v15 = vsel %vm204_vm0, %v140_v63, %v164_v8  ;;  %v143_v19 = vmax.f32 %v107_v10, %v119_v14 }
  0x22   :  { %v252_v17 = vsel %vm248_vm4, %v224_v3, %v245_v11  ;;  %v214_v18 = vsel %vm204_vm0, %v141_v4, %v165_v12  ;;  %v226_v20 = vsel %vm217_vm1, %v213_v15, %v188_v9  ;;  %v166_v22 = vrot.slane %v142_v16, 1 }
  0x23   :  { %267 = vst.msk [vmem:[%s435_s1 + $0x18] sm:$0x77] %vm346_vm5, %v252_v17  ;;  %v227_v21 = vsel %vm217_vm1, %v214_v18, %v189_v13  ;;  %v190_v23 = vrot.slane %v142_v16, 2  ;;  %v167_v25 = vrot.slane %v143_v19, 1  ;;  %v191_v26 = vrot.slane %v143_v19, 2 }
  0x24   :  { %v246_v24 = vrot.slane %v227_v21, 4  ;;  %v215_v27 = vsel %vm204_vm0, %v142_v16, %v166_v22 }
  0x25   :  { %v216_v29 = vsel %vm204_vm0, %v143_v19, %v167_v25  ;;  %v228_v30 = vsel %vm217_vm1, %v215_v27, %v190_v23 }
  0x26   :  { %v253_v28 = vsel %vm248_vm4, %v226_v20, %v246_v24  ;;  %v229_v31 = vsel %vm217_vm1, %v216_v29, %v191_v26 }
  0x27   :  { %268 = vst.msk [vmem:[%s435_s1 + $0x20] sm:$0x77] %vm346_vm5, %v253_v28  ;;  %v247_v32 = vrot.slane %v229_v31, 4 }
  0x29   :  { %v254_v33 = vsel %vm248_vm4, %v228_v30, %v247_v32 }
  0x2a   :  { %269 = vst.msk [vmem:[%s435_s1 + $0x28] sm:$0x77] %vm346_vm5, %v254_v33 }

// kernel: room_encoder_forward.14
= control target key start
LH: loop header
LB: loop body
LE: loop exit
PB: predicated region body
PF: predicated region fallthrough
CT: control target
= control target key end

     0   :  { %s1424_s0 = inlined_call_operand.vmem [shape: bf16[24,1792], index: 0, kind: input, shape index: {}]   ;;  %s1425_s1 = inlined_call_operand.vmem [shape: bf16[1792,384], index: 1, kind: input, shape index: {}]   ;;  %s1426_s2 = inlined_call_operand.vmem [shape: f32[1,384], index: 2, kind: input, shape index: {}]   ;;  %s1427_s3 = inlined_call_operand.vmem [shape: f32[24,384], index: 3, kind: output, shape index: {}]  }
   0x1   :  { %1429 = sst [smem:[#allocation7_spill]] %s1424_s0 }
   0x2   :  { %1430 = sst [smem:[#allocation8_spill]] %s1425_s1 }
   0x3   :  { %s1150_s12 = smov 0   ;;  %s1152_s13 = smov 0  }
   0x4   :  { %s1154_s14 = smov 0   ;;  %s1156_s15 = smov 0  }
   0x5   :  { %s1158_s16 = smov 0   ;;  %s1160_s17 = smov 0  }
   0x6   :  { %s1162_s18 = smov 0   ;;  %s1164_s19 = smov 0  }
   0x7   :  { %s1166_s20 = smov 0   ;;  %s1168_s21 = smov 0  }
   0x8   :  { %s1170_s22 = smov 0  }
   0x9 LB: > { %s823_s23 = sadd.s32 4294967295, %s1127_s22   ;;  %s25_s24 = sadd.s32 1, %s1119_s20  ;;  %s1127_s22 = sphi %s1170_s22, %s13_s22   ;;  %s1123_s21 = sphi %s1168_s21, %s1447_s21   ;;  %s1119_s20 = sphi %s1166_s20, %s1446_s20   ;;  %s1115_s19 = sphi %s1164_s19, %s1445_s19   ;;  %s1111_s18 = sphi %s1162_s18, %s1444_s18   ;;  %s1107_s17 = sphi %s1160_s17, %s1443_s17   ;;  %s1103_s16 = sphi %s1158_s16, %s1442_s16   ;;  %s1099_s15 = sphi %s1156_s15, %s1441_s15   ;;  %s1095_s14 = sphi %s1154_s14, %s1440_s14   ;;  %s1091_s13 = sphi %s1152_s13, %s1439_s13   ;;  %s1087_s12 = sphi %s1150_s12, %s1438_s12  }
   0xa   : > { %p26_p0 = scmp.ge.s32.totalorder %s25_s24, 7  ;;  %s28_s25 = sadd.s32 1, %s1123_s21 }
   0xb   : > { %s41_s26 = sadd.s32 1, %s1107_s17  ;;  %p48_p1 = scmp.ne.s32.totalorder %s1107_s17, %s1103_s16 }
   0xc   : > { %s1449_s24 = smov (%p26_p0, %s25_s24), 0  ;;  %s1451_s25 = smov (!%p26_p0, %s28_s25), %s1123_s21 }
   0xd   : > { %s37_s27 = ssub.s32 %s1119_s20, %s1449_s24  ;;  %p49_p2 = scmp.eq.s32.totalorder %s1127_s22, 0 }
   0xe   : > { %p30_p3 = scmp.ge.s32.totalorder %s1451_s25, 3  ;;  %p39_p4 = scmp.eq.s32.totalorder %s37_s27, 0 }
   0xf   : > { %p1217_p5 = por %p49_p2, %p48_p1  ;;  %s69_s29 = sadd.s32 1, %s1099_s15 }
  0x10   : > { %s1453_s25 = smov (%p30_p3, %s1451_s25), 0  ;;  %p76_p6 = scmp.ne.s32.totalorder %s1099_s15, %s1095_s14 }
  0x11   : > { %1432 = sst [smem:[#allocation6_spill]] %s1453_s25  ;;  %s65_s4 = ssub.s32 %s1123_s21, %s1453_s25 }
  0x12   : > { %s1225_s30 = scalar_select %p39_p4, %s1107_s17, %s41_s26  }
  0x13   : > { %s66_s5 = sor.u32 %s65_s4, %s37_s27  ;;  %p121_p7 = scmp.eq.s32.totalorder %s65_s4, 0 }
  0x14   : > { %p67_p8 = scmp.eq.s32.totalorder %s66_s5, 0  ;;  %p1231_p9 = por %p76_p6, %p49_p2 }
  0x15   : > { %s123_s7 = sadd.s32 1, %s1091_s13  ;;  %p133_p10 = scmp.ne.s32.totalorder %s1091_s13, %s1087_s12 }
  0x16   : > { %s1239_s8 = scalar_select %p67_p8, %s1099_s15, %s69_s29  }
  0x17   : > { %s1242_s9 = scalar_select %p121_p7, %s1091_s13, %s123_s7  }
  0x18   : > { %p134_p11 = scmp.eq.s32.totalorder %s823_s23, 20  ;;  %p826_p13 = scmp.ge.s32.totalorder %s1127_s22, 21 }
  0x1a   : > { %p1244_p12 = por %p134_p11, %p133_p10  ;;  %156 = sbr.rel (%p826_p13) target bundleno = 86 (0x56), region = 16 }
  0x1f   : > { %159 = sbr.rel (!%p1217_p5) target bundleno = 44 (0x2c), region = 20  ;;  %s161_s11 = sand.u32 (%p1217_p5), 1, %s1107_s17  }
  0x20   : > { %s912_s26 = sshll.u32 (%p1217_p5), %s1119_s20, 3  ;;  %s947_s27 = smul.u32 (%p1217_p5), 24, %s161_s11 }
  0x21   : > { %s1435_s0 = sld [smem:[#allocation7_spill]] (%p1217_p5) }
  0x22   : > { %s163_s23 = scalar_lea.vmem (%p1217_p5), [#allocation3], %s947_s27 }
  0x27   : > { %s169_s5 = scalar_lea.vmem %s1435_s0, %s912_s26 }
  0x28   : > { %v202_v0 = vld [vmem:[%s169_s5] sm:$0xff]  ;;  %v204_v1 = vld [vmem:[%s169_s5 + $0x38] sm:$0xff]  ;;  %v206_v2 = vld [vmem:[%s169_s5 + $0x70] sm:$0xff] }
  0x29   : > { %203 = vst [vmem:[%s163_s23] sm:$0xff] %v202_v0 }
  0x2a   : > { %205 = vst [vmem:[%s163_s23 + $0x8] sm:$0xff] %v204_v1 }
  0x2b   : > { %207 = vst [vmem:[%s163_s23 + $0x10] sm:$0xff] %v206_v2 }
  0x2c PF: > { %213 = sbr.rel (!%p1231_p9) target bundleno = 86 (0x56), region = 58  ;;  %s215_s28 = sand.u32 (%p1231_p9), 1, %s1099_s15  }
  0x2d   : > { %s948_s7 = smul.u32 (%p1231_p9), 96, %s1119_s20  ;;  %s829_s11 = sshll.u32 (%p1231_p9), %s215_s28, 7 }
  0x2e   : > { %s1436_s1 = sld [smem:[#allocation8_spill]] (%p1231_p9)  ;;  %s1269_s6 = scalar_lea.vmem (%p1231_p9), [#allocation4], %s829_s11 }
  0x2f   : > { %s220_s25 = sadd.s32 (%p1231_p9), %s1123_s21, %s948_s7 }
  0x30   : > { %s832_s29 = sshll.u32 (%p1231_p9), %s220_s25, 2 }
  0x34   : > { %s1264_s5 = scalar_lea.vmem %s1436_s1, %s832_s29 }
  0x35   : > { %v239_v3 = vld [vmem:[%s1264_s5] sm:$0xf]  ;;  %v241_v4 = vld [vmem:[%s1264_s5 + $0xc] sm:$0xf]  ;;  %v243_v5 = vld [vmem:[%s1264_s5 + $0x18] sm:$0xf] }
  0x36   : > { %240 = vst [vmem:[%s1269_s6] sm:$0xf] %v239_v3  ;;  %v245_v6 = vld [vmem:[%s1264_s5 + $0x24] sm:$0xf]  ;;  %v247_v7 = vld [vmem:[%s1264_s5 + $0x30] sm:$0xf] }
  0x37   : > { %242 = vst [vmem:[%s1269_s6 + $0x4] sm:$0xf] %v241_v4  ;;  %v249_v8 = vld [vmem:[%s1264_s5 + $0x3c] sm:$0xf]  ;;  %v251_v9 = vld [vmem:[%s1264_s5 + $0x48] sm:$0xf] }
  0x38   : > { %244 = vst [vmem:[%s1269_s6 + $0x8] sm:$0xf] %v243_v5  ;;  %v253_v10 = vld [vmem:[%s1264_s5 + $0x54] sm:$0xf]  ;;  %v255_v11 = vld [vmem:[%s1264_s5 + $0x60] sm:$0xf] }
  0x39   : > { %246 = vst [vmem:[%s1269_s6 + $0xc] sm:$0xf] %v245_v6  ;;  %v257_v12 = vld [vmem:[%s1264_s5 + $0x6c] sm:$0xf]  ;;  %v259_v13 = vld [vmem:[%s1264_s5 + $0x78] sm:$0xf] }
  0x3a   : > { %248 = vst [vmem:[%s1269_s6 + $0x10] sm:$0xf] %v247_v7  ;;  %v261_v14 = vld [vmem:[%s1264_s5 + $0x84] sm:$0xf]  ;;  %v263_v15 = vld [vmem:[%s1264_s5 + $0x90] sm:$0xf] }
  0x3b   : > { %250 = vst [vmem:[%s1269_s6 + $0x14] sm:$0xf] %v249_v8  ;;  %v265_v16 = vld [vmem:[%s1264_s5 + $0x9c] sm:$0xf]  ;;  %v267_v17 = vld [vmem:[%s1264_s5 + $0xa8] sm:$0xf] }
  0x3c   : > { %252 = vst [vmem:[%s1269_s6 + $0x18] sm:$0xf] %v251_v9  ;;  %v269_v18 = vld [vmem:[%s1264_s5 + $0xb4] sm:$0xf]  ;;  %v271_v19 = vld [vmem:[%s1264_s5 + $0xc0] sm:$0xf] }
  0x3d   : > { %254 = vst [vmem:[%s1269_s6 + $0x1c] sm:$0xf] %v253_v10  ;;  %v273_v20 = vld [vmem:[%s1264_s5 + $0xcc] sm:$0xf]  ;;  %v275_v21 = vld [vmem:[%s1264_s5 + $0xd8] sm:$0xf] }
  0x3e   : > { %256 = vst [vmem:[%s1269_s6 + $0x20] sm:$0xf] %v255_v11  ;;  %v277_v22 = vld [vmem:[%s1264_s5 + $0xe4] sm:$0xf]  ;;  %v279_v23 = vld [vmem:[%s1264_s5 + $0xf0] sm:$0xf] }
  0x3f   : > { %258 = vst [vmem:[%s1269_s6 + $0x24] sm:$0xf] %v257_v12  ;;  %v281_v24 = vld [vmem:[%s1264_s5 + $0xfc] sm:$0xf]  ;;  %v283_v25 = vld [vmem:[%s1264_s5 + $0x108] sm:$0xf] }
  0x40   : > { %260 = vst [vmem:[%s1269_s6 + $0x28] sm:$0xf] %v259_v13  ;;  %v285_v26 = vld [vmem:[%s1264_s5 + $0x114] sm:$0xf]  ;;  %v287_v27 = vld [vmem:[%s1264_s5 + $0x120] sm:$0xf] }
  0x41   : > { %262 = vst [vmem:[%s1269_s6 + $0x2c] sm:$0xf] %v261_v14  ;;  %v289_v28 = vld [vmem:[%s1264_s5 + $0x12c] sm:$0xf]  ;;  %v291_v29 = vld [vmem:[%s1264_s5 + $0x138] sm:$0xf] }
  0x42   : > { %264 = vst [vmem:[%s1269_s6 + $0x30] sm:$0xf] %v263_v15  ;;  %v293_v30 = vld [vmem:[%s1264_s5 + $0x144] sm:$0xf]  ;;  %v295_v31 = vld [vmem:[%s1264_s5 + $0x150] sm:$0xf] }
  0x43   : > { %266 = vst [vmem:[%s1269_s6 + $0x34] sm:$0xf] %v265_v16  ;;  %v297_v32 = vld [vmem:[%s1264_s5 + $0x15c] sm:$0xf]  ;;  %v299_v33 = vld [vmem:[%s1264_s5 + $0x168] sm:$0xf] }
  0x44   : > { %268 = vst [vmem:[%s1269_s6 + $0x38] sm:$0xf] %v267_v17  ;;  %v301_v34 = vld [vmem:[%s1264_s5 + $0x174] sm:$0xf] }
  0x45   : > { %270 = vst [vmem:[%s1269_s6 + $0x3c] sm:$0xf] %v269_v18 }
  0x46   : > { %272 = vst [vmem:[%s1269_s6 + $0x40] sm:$0xf] %v271_v19 }
  0x47   : > { %274 = vst [vmem:[%s1269_s6 + $0x44] sm:$0xf] %v273_v20 }
  0x48   : > { %276 = vst [vmem:[%s1269_s6 + $0x48] sm:$0xf] %v275_v21 }
  0x49   : > { %278 = vst [vmem:[%s1269_s6 + $0x4c] sm:$0xf] %v277_v22 }
  0x4a   : > { %280 = vst [vmem:[%s1269_s6 + $0x50] sm:$0xf] %v279_v23 }
  0x4b   : > { %282 = vst [vmem:[%s1269_s6 + $0x54] sm:$0xf] %v281_v24 }
  0x4c   : > { %284 = vst [vmem:[%s1269_s6 + $0x58] sm:$0xf] %v283_v25 }
  0x4d   : > { %286 = vst [vmem:[%s1269_s6 + $0x5c] sm:$0xf] %v285_v26 }
  0x4e   : > { %288 = vst [vmem:[%s1269_s6 + $0x60] sm:$0xf] %v287_v27 }
  0x4f   : > { %290 = vst [vmem:[%s1269_s6 + $0x64] sm:$0xf] %v289_v28 }
  0x50   : > { %292 = vst [vmem:[%s1269_s6 + $0x68] sm:$0xf] %v291_v29 }
  0x51   : > { %294 = vst [vmem:[%s1269_s6 + $0x6c] sm:$0xf] %v293_v30 }
  0x52   : > { %296 = vst [vmem:[%s1269_s6 + $0x70] sm:$0xf] %v295_v31 }
  0x53   : > { %298 = vst [vmem:[%s1269_s6 + $0x74] sm:$0xf] %v297_v32 }
  0x54   : > { %300 = vst [vmem:[%s1269_s6 + $0x78] sm:$0xf] %v299_v33 }
  0x55   : > { %302 = vst [vmem:[%s1269_s6 + $0x7c] sm:$0xf] %v301_v34 }
  0x56 PF: > { %p833_p0 = scmp.ge.s32.totalorder %s1127_s22, 1  ;;  %p395_p1 = scmp.lt.s32.totalorder %s1127_s22, 22 }
  0x58   : > { %p396_p2 = pnand %p833_p0, %p395_p1 }
  0x59   : > { %s402_s25 = sand.u32 (!%p396_p2), 1, %s1103_s16   ;;  %s409_s27 = sand.u32 (!%p396_p2), 1, %s1095_s14  }
  0x5a   : > { %399 = sbr.rel (%p396_p2) target bundleno = 297 (0x129), region = 103  ;;  %s834_s28 = sshll.u32 (!%p396_p2), %s409_s27, 7 }
  0x5b   : > { %s949_s23 = smul.u32 (!%p396_p2), 24, %s402_s25  ;;  %s435_s7 = sand.u32 (!%p396_p2), 1, %s1087_s12  }
  0x5c   : > { %s950_s11 = smul.u32 (!%p396_p2), 24, %s435_s7  ;;  %p441_p3 = scmp.lt.s32.totalorder (!%p396_p2), %s1115_s19, 2 }
  0x5d   : > { %s1345_s6 = scalar_lea.vmem (!%p396_p2), [#allocation3], %s949_s23  ;;  %s1347_s0 = scalar_lea.vmem (!%p396_p2), [#allocation4], %s834_s28 }
  0x5e   : > { %s1349_s1 = scalar_lea.vmem (!%p396_p2), [#allocation5], %s950_s11  ;;  %p835_p4 = scmp.ne.s32.totalorder (!%p396_p2), %s1111_s18, 0 }
  0x5f   : > { %s1339_s29 = scalar_select %p441_p3, %s1115_s19, 2 }
  0x60   : > { %448 = sbr.rel (%p835_p4) target bundleno = 105 (0x69), region = 115 }
  0x61   : > { %s443_s5 = scalar_lea.vmem %s1426_s2, %s1339_s29 }
  0x65   : > { %v1129_v35 = vmov 0.0  }
  0x66   : > { %449 = vst [vmem:[#allocation2 + $0x10] sm:$0xff] %v1129_v35 }
  0x67   : > { %450 = vst [vmem:[#allocation2] sm:$0xff] %v1129_v35 }
  0x68   : > { %451 = vst [vmem:[#allocation2 + $0x8] sm:$0xff] %v1129_v35 }
  0x69 PF: > { %v922_v36 = vld [vmem:[%s1347_s0 + $0x38] sm:$0xff]  ;;  %v921_v38 = vld [vmem:[%s1347_s0 + $0x30] sm:$0xff]  ;;  %v920_v40 = vld [vmem:[%s1347_s0 + $0x28] sm:$0xff]  ;;  %p908_p5 = scmp.ne.s32.totalorder %s1111_s18, 6 }
  0x6a   : > { %v930_v37 = vld [vmem:[%s1347_s0 + $0x78] sm:$0xff]  ;;  %603 = vmatpush.bf16.msra.mxu0 %v922_v36  ;;  %931 = vmatpush.bf16.msra.mxu2 %v922_v36  ;;  %v929_v39 = vld [vmem:[%s1347_s0 + $0x70] sm:$0xff]  ;;  %v928_v41 = vld [vmem:[%s1347_s0 + $0x68] sm:$0xff] }
  0x6b   : > { %621 = vmatpush.bf16.msra.mxu1 %v930_v37  ;;  %939 = vmatpush.bf16.msra.mxu3 %v930_v37  ;;  %v919_v42 = vld [vmem:[%s1347_s0 + $0x20] sm:$0xff]  ;;  %v918_v44 = vld [vmem:[%s1347_s0 + $0x18] sm:$0xff]  ;;  %v917_v46 = vld [vmem:[%s1347_s0 + $0x10] sm:$0xff] }
  0x6c   : > { %v927_v43 = vld [vmem:[%s1347_s0 + $0x60] sm:$0xff]  ;;  %v926_v45 = vld [vmem:[%s1347_s0 + $0x58] sm:$0xff]  ;;  %v925_v47 = vld [vmem:[%s1347_s0 + $0x50] sm:$0xff] }
  0x6d   : > { %v916_v48 = vld [vmem:[%s1347_s0 + $0x8] sm:$0xff]  ;;  %v457_v49 = vld [vmem:[%s1345_s6 + $0x10] sm:$0xff]  ;;  %v914_v54 = vld [vmem:[%s1345_s6 + $0x4] sm:$0xf0] }
  0x6e   : > { %604 = vmatpush.bf16.msra.mxu0 %v921_v38  ;;  %932 = vmatpush.bf16.msra.mxu2 %v921_v38  ;;  %v924_v50 = vld [vmem:[%s1347_s0 + $0x48] sm:$0xff]  ;;  %v497_v51 = vunpack.c.l.b16 %v457_v49  ;;  %v915_v52 = vld [vmem:[%s1347_s0] sm:$0xff]  ;;  %v498_v55 = vunpack.c.h.b16 %v457_v49  ;;  %v840_v58 = vld [vmem:[%s1345_s6 + $0x8] sm:$0xf0] }
  0x6f   : > { %622 = vmatpush.bf16.msra.mxu1 %v929_v39  ;;  %940 = vmatpush.bf16.msra.mxu3 %v929_v39  ;;  %v838_v53 = vld [vmem:[%s1345_s6] sm:$0xf]  ;;  %v923_v56 = vld [vmem:[%s1347_s0 + $0x40] sm:$0xff]  ;;  %v913_v57 = vld [vmem:[%s1345_s6 + $0x4] sm:$0xf] }
  0x70   : > { %v839_v59 = vor.u32 %v914_v54, %v838_v53  ;;  %v501_v60 = vpack.c.b16 %v497_v51, %v497_v51  ;;  %v843_v61 = vor.u32 %v913_v57, %v840_v58  ;;  %v502_v62 = vpack.c.b16 %v498_v55, %v498_v55  ;;  %v452_v0 = vld [vmem:[#allocation2 + $0x10] sm:$0xff]  ;;  %v454_v5 = vld [vmem:[#allocation2 + $0x8] sm:$0xff]  ;;  %v453_v9 = vld [vmem:[#allocation2] sm:$0xff] }
  0x72   : > { %605 = vmatpush.bf16.msra.mxu0 %v920_v40  ;;  %933 = vmatpush.bf16.msra.mxu2 %v920_v40 }
  0x73   : > { %623 = vmatpush.bf16.msra.mxu1 %v928_v41  ;;  %941 = vmatpush.bf16.msra.mxu3 %v928_v41 }
  0x76   : > { %606 = vmatpush.bf16.msra.mxu0 %v919_v42  ;;  %934 = vmatpush.bf16.msra.mxu2 %v919_v42 }
  0x77   : > { %624 = vmatpush.bf16.msra.mxu1 %v927_v43  ;;  %942 = vmatpush.bf16.msra.mxu3 %v927_v43 }
  0x7a   : > { %607 = vmatpush.bf16.msra.mxu0 %v918_v44  ;;  %935 = vmatpush.bf16.msra.mxu2 %v918_v44 }
  0x7b   : > { %625 = vmatpush.bf16.msra.mxu1 %v926_v45  ;;  %943 = vmatpush.bf16.msra.mxu3 %v926_v45 }
  0x7e   : > { %608 = vmatpush.bf16.msra.mxu0 %v917_v46  ;;  %936 = vmatpush.bf16.msra.mxu2 %v917_v46 }
  0x7f   : > { %626 = vmatpush.bf16.msra.mxu1 %v925_v47  ;;  %944 = vmatpush.bf16.msra.mxu3 %v925_v47 }
  0x82   : > { %609 = vmatpush.bf16.msra.mxu0 %v916_v48  ;;  %937 = vmatpush.bf16.msra.mxu2 %v916_v48 }
  0x83   : > { %627 = vmatpush.bf16.msra.mxu1 %v924_v50  ;;  %945 = vmatpush.bf16.msra.mxu3 %v924_v50 }
  0x86   : > { %610 = vmatpush.bf16.msra.mxu0 %v915_v52  ;;  %938 = vmatpush.bf16.msra.mxu2 %v915_v52 }
  0x87   : > { %628 = vmatpush.bf16.msra.mxu1 %v923_v56  ;;  %946 = vmatpush.bf16.msra.mxu3 %v923_v56 }
  0x89   : > { %611 = vmatmul.bf16.vlgmr.msra.gmra.mxu0 %v839_v59  ;;  %616 = vmatmul.bf16.vlgmr.msra.gmra.mxu2 %v501_v60 }
  0x8a   : > { %629 = vmatmul.bf16.vlgmr.msra.gmra.mxu1 %v843_v61  ;;  %634 = vmatmul.bf16.vlgmr.msra.gmra.mxu3 %v502_v62 }
 0x106   : > { %v612_v63 = vpop.f32.mrf.mxu0 }
 0x107   : > { %v630_v1 = vpop.f32.mrf.mxu1 }
 0x108   : > { %v631_v2 = vadd.f32 %v630_v1, %v612_v63 }
 0x10a   : > { %v639_v3 = vadd.f32 %v631_v2, %v452_v0 }
 0x10c   : > { %642 = vst [vmem:[#allocation2 + $0x10] sm:$0xff] %v639_v3  ;;  %v617_v4 = vpop.f32.mrf.mxu2 }
 0x10d   : > { %v635_v6 = vpop.f32.mrf.mxu3 }
 0x10e   : > { %v636_v7 = vadd.f32 %v635_v6, %v617_v4  ;;  %v614_v8 = vpop.f32.mrf.mxu0 }
 0x10f   : > { %v632_v10 = vpop.f32.mrf.mxu1 }
 0x110   : > { %v641_v11 = vadd.f32 %v636_v7, %v454_v5  ;;  %v633_v12 = vadd.f32 %v632_v10, %v614_v8 }
 0x111   : > { %648 = sbr.rel (%p908_p5) target bundleno = 289 (0x121), region = 119 }
 0x112   : > { %644 = vst [vmem:[#allocation2 + $0x8] sm:$0xff] %v641_v11  ;;  %v640_v13 = vadd.f32 %v633_v12, %v453_v9 }
 0x114   : > { %643 = vst [vmem:[#allocation2] sm:$0xff] %v640_v13  ;;  %v619_v14 = vpop.f32.mrf.mxu2 }
 0x115   : > { %v637_v15 = vpop.f32.mrf.mxu3 }
 0x116   : > { %v649_v16 = vld [vmem:[#allocation2 + $0x10] sm:$0xff]  ;;  %v1040_v17 = vld [vmem:[%s443_s5] ss:$0 sm:$0xff] }
 0x117   : > { %v656_v20 = vadd.f32 %v1040_v17, %v649_v16 }
 0x119   : > { %v651_v19 = vld [vmem:[#allocation2 + $0x8] sm:$0xff]  ;;  %v659_v23 = vmax.f32 %v656_v20, 0.0 }
 0x11a   : > { %v658_v22 = vadd.f32 %v1040_v17, %v651_v19 }
 0x11b   : > { %v650_v18 = vld [vmem:[#allocation2] sm:$0xff]  ;;  %662 = vst [vmem:[%s1349_s1] sm:$0xff] %v659_v23 }
 0x11c   : > { %v657_v21 = vadd.f32 %v1040_v17, %v650_v18  ;;  %v661_v25 = vmax.f32 %v658_v22, 0.0 }
 0x11e   : > { %v660_v24 = vmax.f32 %v657_v21, 0.0  ;;  %664 = vst [vmem:[%s1349_s1 + $0x10] sm:$0xff] %v661_v25 }
 0x120   : > { %663 = vst [vmem:[%s1349_s1 + $0x8] sm:$0xff] %v660_v24 }
 0x121 PF: > { %671 = sbr.rel (!%p1244_p12) target bundleno = 297 (0x129), region = 123  ;;  %s909_s14 = sshll.u32 (%p1244_p12), %s1115_s19, 3 }
 0x122   : > { %v709_v26 = vld [vmem:[%s1349_s1] sm:$0xff] (%p1244_p12)  ;;  %s676_s25 = scalar_lea.vmem (%p1244_p12), %s1427_s3, %s909_s14 }
 0x123   : > { %710 = vst [vmem:[%s676_s25] sm:$0xff] (%p1244_p12), %v709_v26 }
 0x125   : > { %v713_v28 = vld [vmem:[%s1349_s1 + $0x10] sm:$0xff] (%p1244_p12) }
 0x126   : > { %714 = vst [vmem:[%s676_s25 + $0x30] sm:$0xff] %v713_v28 }
 0x127   : > { %v711_v27 = vld [vmem:[%s1349_s1 + $0x8] sm:$0xff] }
 0x128   : > { %712 = vst [vmem:[%s676_s25 + $0x18] sm:$0xff] %v711_v27 }
 0x129 PF: > { %s13_s22 = sadd.s32 1, %s1127_s22   ;;  %s1437_s10 = sld [smem:[#allocation6_spill]] }
 0x12a   : > { %p10_p6 = scmp.ge.s32.totalorder %s13_s22, 23   ;;  %s1438_s12 = smov %s1091_s13 }
 0x12b   : > { %s1439_s13 = smov %s1242_s9  ;;  %s1440_s14 = smov %s1099_s15 }
 0x12c   : > { %s1441_s15 = smov %s1239_s8  ;;  %s1442_s16 = smov %s1107_s17 }
 0x12d   : > { %s1443_s17 = smov %s1225_s30  ;;  %s1444_s18 = smov %s1119_s20 }
 0x12e   : > { %s1445_s19 = smov %s1123_s21  ;;  %s1446_s20 = smov %s1449_s24 }
 0x12f   : > { %s1447_s21 = smov %s1437_s10  ;;  %12 = sbr.rel (!%p10_p6) target bundleno = 9 (0x9), region = 203 }

// kernel: room_encoder_forward.15
= control target key start
LH: loop header
LB: loop body
LE: loop exit
PB: predicated region body
PF: predicated region fallthrough
CT: control target
= control target key end

     0   :  { %s871_s12 = smov 0   ;;  %s873_s13 = smov 0   ;;  %s1000_s0 = inlined_call_operand.vmem [shape: bf16[24,3456], index: 0, kind: input, shape index: {}]   ;;  %s1001_s1 = inlined_call_operand.vmem [shape: bf16[3456,256], index: 1, kind: input, shape index: {}]   ;;  %s1002_s2 = inlined_call_operand.vmem [shape: f32[1,256], index: 2, kind: input, shape index: {}]   ;;  %s1003_s3 = inlined_call_operand.vmem [shape: f32[24,256], index: 3, kind: output, shape index: {}]  }
   0x1   :  { %s875_s14 = smov 0   ;;  %s877_s15 = smov 0  }
   0x2   :  { %s879_s16 = smov 0  }
   0x3 LB: > { %s25_s17 = sadd.s32 1, %s844_s15  ;;  %p48_p1 = scmp.ne.s32.totalorder %s836_s13, %s832_s12  ;;  %s848_s16 = sphi %s879_s16, %s13_s16   ;;  %s844_s15 = sphi %s877_s15, %s1007_s15   ;;  %s840_s14 = sphi %s875_s14, %s1006_s14   ;;  %s836_s13 = sphi %s873_s13, %s1005_s13   ;;  %s832_s12 = sphi %s871_s12, %s1004_s12  }
   0x4   : > { %p26_p0 = scmp.ge.s32.totalorder %s25_s17, 27  ;;  %p49_p2 = scmp.eq.s32.totalorder %s848_s16, 0 }
   0x5   : > { %s41_s19 = sadd.s32 1, %s836_s13  ;;  %p653_p5 = scmp.ge.s32.totalorder %s848_s16, 27 }
   0x6   : > { %s1009_s17 = smov (%p26_p0, %s25_s17), 0  ;;  %p50_p3 = por %p49_p2, %p48_p1 }
   0x7   : > { %s37_s18 = ssub.s32 %s844_s15, %s1009_s17  ;;  %164 = sbr.rel (%p653_p5) target bundleno = 20 (0x14), region = 20 }
   0x8   : > { %p39_p4 = scmp.eq.s32.totalorder %s37_s18, 0 }
   0xa   : > { %s906_s20 = scalar_select %p39_p4, %s836_s13, %s41_s19  }
   0xc   : > { %167 = sbr.rel (!%p50_p3) target bundleno = 20 (0x14), region = 24  ;;  %s169_s21 = sand.u32 (%p50_p3), 1, %s836_s13  }
   0xd   : > { %s654_s22 = sshll.u32 (%p50_p3), %s844_s15, 2  ;;  %s767_s23 = smul.u32 (%p50_p3), 12, %s169_s21 }
   0xe   : > { %s176_s26 = scalar_lea.vmem (%p50_p3), %s1000_s0, %s654_s22 }
   0xf   : > { %v193_v0 = vld [vmem:[%s176_s26] sm:$0xf] (%p50_p3)  ;;  %v195_v1 = vld [vmem:[%s176_s26 + $0x6c] sm:$0xf] (%p50_p3)  ;;  %v197_v2 = vld [vmem:[%s176_s26 + $0xd8] sm:$0xf] (%p50_p3) }
  0x10   : > { %s171_s27 = scalar_lea.vmem (%p50_p3), [#allocation3], %s767_s23 }
  0x11   : > { %194 = vst [vmem:[%s171_s27] sm:$0xf] %v193_v0 }
  0x12   : > { %196 = vst [vmem:[%s171_s27 + $0x4] sm:$0xf] %v195_v1 }
  0x13   : > { %198 = vst [vmem:[%s171_s27 + $0x8] sm:$0xf] %v197_v2 }
  0x14 PF: > { %p655_p6 = scmp.ge.s32.totalorder %s848_s16, 1  ;;  %p242_p7 = scmp.lt.s32.totalorder %s848_s16, 28 }
  0x16   : > { %p243_p8 = pnand %p655_p6, %p242_p7 }
  0x17   : > { %s249_s28 = sand.u32 (!%p243_p8), 1, %s832_s12   ;;  %s656_s29 = sshll.u32 (!%p243_p8), %s840_s14, 4 }
  0x18   : > { %246 = sbr.rel (%p243_p8) target bundleno = 229 (0xe5), region = 69  ;;  %p294_p9 = scmp.lt.s32.totalorder (!%p243_p8), %s656_s29, 431 }
  0x19   : > { %s918_s30 = smul.u32 (!%p243_p8), 12, %s249_s28  ;;  %p659_p10 = scmp.ne.s32.totalorder (!%p243_p8), %s840_s14, 0 }
  0x1b   : > { %s251_s8 = scalar_lea.vmem (!%p243_p8), [#allocation3], %s918_s30 }
  0x1d   : > { %s1011_s29 = smov (!%p294_p9, %s656_s29), 431  ;;  %324 = sbr.rel (%p659_p10) target bundleno = 41 (0x29), region = 77 }
  0x1e   : > { %s733_s4 = sshll.u32 %s1011_s29, 3 }
  0x1f   : > { %s923_s7 = scalar_lea.vmem %s1001_s1, %s733_s4 }
  0x22   : > { %v850_v3 = vmov 0.0  }
  0x23   : > { %325 = vst [vmem:[#allocation2 + $0x28] sm:$0xff] %v850_v3 }
  0x24   : > { %326 = vst [vmem:[#allocation2 + $0x10] sm:$0xff] %v850_v3 }
  0x25   : > { %327 = vst [vmem:[#allocation2 + $0x8] sm:$0xff] %v850_v3 }
  0x26   : > { %328 = vst [vmem:[#allocation2] sm:$0xff] %v850_v3 }
  0x27   : > { %329 = vst [vmem:[#allocation2 + $0x18] sm:$0xff] %v850_v3 }
  0x28   : > { %330 = vst [vmem:[#allocation2 + $0x20] sm:$0xff] %v850_v3 }
  0x29 PF: > { %v722_v4 = vld [vmem:[%s923_s7 + $0x70] sm:$0xf]  ;;  %v750_v5 = vld [vmem:[%s923_s7 + $0x74] sm:$0xf0]  ;;  %v749_v6 = vld [vmem:[%s923_s7 + $0x74] sm:$0xf] }
  0x2a   : > { %v723_v7 = vor.u32 %v750_v5, %v722_v4  ;;  %v724_v8 = vld [vmem:[%s923_s7 + $0x78] sm:$0xf0]  ;;  %v714_v9 = vld [vmem:[%s923_s7 + $0x60] sm:$0xf]  ;;  %v748_v10 = vld [vmem:[%s923_s7 + $0x64] sm:$0xf0] }
  0x2b   : > { %v727_v11 = vor.u32 %v749_v6, %v724_v8  ;;  %v747_v12 = vld [vmem:[%s923_s7 + $0x64] sm:$0xf]  ;;  %v716_v13 = vld [vmem:[%s923_s7 + $0x68] sm:$0xf0]  ;;  %v715_v14 = vor.u32 %v748_v10, %v714_v9  ;;  %v706_v16 = vld [vmem:[%s923_s7 + $0x50] sm:$0xf] }
  0x2c   : > { %446 = vmatpush.bf16.msra.mxu0 %v723_v7  ;;  %751 = vmatpush.bf16.msra.mxu2 %v723_v7  ;;  %v719_v15 = vor.u32 %v747_v12, %v716_v13  ;;  %v746_v17 = vld [vmem:[%s923_s7 + $0x54] sm:$0xf0]  ;;  %v745_v18 = vld [vmem:[%s923_s7 + $0x54] sm:$0xf]  ;;  %v708_v19 = vld [vmem:[%s923_s7 + $0x58] sm:$0xf0] }
  0x2d   : > { %464 = vmatpush.bf16.msra.mxu1 %v727_v11  ;;  %759 = vmatpush.bf16.msra.mxu3 %v727_v11  ;;  %v707_v20 = vor.u32 %v746_v17, %v706_v16  ;;  %v711_v21 = vor.u32 %v745_v18, %v708_v19  ;;  %v698_v22 = vld [vmem:[%s923_s7 + $0x40] sm:$0xf]  ;;  %v744_v23 = vld [vmem:[%s923_s7 + $0x44] sm:$0xf0]  ;;  %v743_v24 = vld [vmem:[%s923_s7 + $0x44] sm:$0xf] }
  0x2e   : > { %v700_v25 = vld [vmem:[%s923_s7 + $0x48] sm:$0xf0]  ;;  %v699_v26 = vor.u32 %v744_v23, %v698_v22  ;;  %v690_v28 = vld [vmem:[%s923_s7 + $0x30] sm:$0xf]  ;;  %v742_v29 = vld [vmem:[%s923_s7 + $0x34] sm:$0xf0] }
  0x2f   : > { %v703_v27 = vor.u32 %v743_v24, %v700_v25  ;;  %v741_v30 = vld [vmem:[%s923_s7 + $0x34] sm:$0xf]  ;;  %v692_v31 = vld [vmem:[%s923_s7 + $0x38] sm:$0xf0]  ;;  %v691_v32 = vor.u32 %v742_v29, %v690_v28  ;;  %v682_v34 = vld [vmem:[%s923_s7 + $0x20] sm:$0xf] }
  0x30   : > { %447 = vmatpush.bf16.msra.mxu0 %v715_v14  ;;  %752 = vmatpush.bf16.msra.mxu2 %v715_v14  ;;  %v695_v33 = vor.u32 %v741_v30, %v692_v31  ;;  %v740_v35 = vld [vmem:[%s923_s7 + $0x24] sm:$0xf0]  ;;  %v739_v36 = vld [vmem:[%s923_s7 + $0x24] sm:$0xf]  ;;  %v684_v37 = vld [vmem:[%s923_s7 + $0x28] sm:$0xf0] }
  0x31   : > { %465 = vmatpush.bf16.msra.mxu1 %v719_v15  ;;  %760 = vmatpush.bf16.msra.mxu3 %v719_v15  ;;  %v683_v38 = vor.u32 %v740_v35, %v682_v34  ;;  %v687_v39 = vor.u32 %v739_v36, %v684_v37  ;;  %v674_v40 = vld [vmem:[%s923_s7 + $0x10] sm:$0xf]  ;;  %v738_v41 = vld [vmem:[%s923_s7 + $0x14] sm:$0xf0]  ;;  %v737_v42 = vld [vmem:[%s923_s7 + $0x14] sm:$0xf] }
  0x32   : > { %v676_v43 = vld [vmem:[%s923_s7 + $0x18] sm:$0xf0]  ;;  %v675_v44 = vor.u32 %v738_v41, %v674_v40  ;;  %v339_v45 = vld [vmem:[%s251_s8 + $0x8] sm:$0xf]  ;;  %v666_v47 = vld [vmem:[%s923_s7] sm:$0xf] }
  0x33   : > { %v679_v46 = vor.u32 %v737_v42, %v676_v43  ;;  %v736_v48 = vld [vmem:[%s923_s7 + $0x4] sm:$0xf0]  ;;  %v735_v49 = vld [vmem:[%s923_s7 + $0x4] sm:$0xf]  ;;  %v668_v50 = vld [vmem:[%s923_s7 + $0x8] sm:$0xf0]  ;;  %v361_v51 = vunpack.c.l.b16 %v339_v45 }
  0x34   : > { %448 = vmatpush.bf16.msra.mxu0 %v707_v20  ;;  %753 = vmatpush.bf16.msra.mxu2 %v707_v20  ;;  %v667_v52 = vor.u32 %v736_v48, %v666_v47  ;;  %v671_v53 = vor.u32 %v735_v49, %v668_v50  ;;  %v734_v54 = vld [vmem:[%s251_s8] sm:$0xff]  ;;  %v331_v56 = vld [vmem:[#allocation2 + $0x28] sm:$0xff]  ;;  %p728_p11 = scmp.ne.s32.totalorder %s840_s14, 26 }
  0x35   : > { %466 = vmatpush.bf16.msra.mxu1 %v711_v21  ;;  %761 = vmatpush.bf16.msra.mxu3 %v711_v21  ;;  %v363_v55 = vpack.c.b16 %v361_v51, %v361_v51  ;;  %v332_v57 = vld [vmem:[#allocation2 + $0x10] sm:$0xff]  ;;  %v335_v62 = vld [vmem:[#allocation2 + $0x18] sm:$0xff]  ;;  %v336_v63 = vld [vmem:[#allocation2 + $0x20] sm:$0xff] }
  0x36   : > { %v333_v1 = vld [vmem:[#allocation2 + $0x8] sm:$0xff]  ;;  %v334_v4 = vld [vmem:[#allocation2] sm:$0xff] }
  0x38   : > { %449 = vmatpush.bf16.msra.mxu0 %v699_v26  ;;  %754 = vmatpush.bf16.msra.mxu2 %v699_v26 }
  0x39   : > { %467 = vmatpush.bf16.msra.mxu1 %v703_v27  ;;  %762 = vmatpush.bf16.msra.mxu3 %v703_v27 }
  0x3c   : > { %450 = vmatpush.bf16.msra.mxu0 %v691_v32  ;;  %755 = vmatpush.bf16.msra.mxu2 %v691_v32 }
  0x3d   : > { %468 = vmatpush.bf16.msra.mxu1 %v695_v33  ;;  %763 = vmatpush.bf16.msra.mxu3 %v695_v33 }
  0x40   : > { %451 = vmatpush.bf16.msra.mxu0 %v683_v38  ;;  %756 = vmatpush.bf16.msra.mxu2 %v683_v38 }
  0x41   : > { %469 = vmatpush.bf16.msra.mxu1 %v687_v39  ;;  %764 = vmatpush.bf16.msra.mxu3 %v687_v39 }
  0x44   : > { %452 = vmatpush.bf16.msra.mxu0 %v675_v44  ;;  %757 = vmatpush.bf16.msra.mxu2 %v675_v44 }
  0x45   : > { %470 = vmatpush.bf16.msra.mxu1 %v679_v46  ;;  %765 = vmatpush.bf16.msra.mxu3 %v679_v46 }
  0x48   : > { %453 = vmatpush.bf16.msra.mxu0 %v667_v52  ;;  %758 = vmatpush.bf16.msra.mxu2 %v667_v52 }
  0x49   : > { %471 = vmatpush.bf16.msra.mxu1 %v671_v53  ;;  %766 = vmatpush.bf16.msra.mxu3 %v671_v53 }
  0x4b   : > { %454 = vmatmul.bf16.vlgmr.msra.gmra.mxu0 %v734_v54  ;;  %459 = vmatmul.bf16.vlgmr.msra.gmra.mxu2 %v363_v55 }
  0x4c   : > { %472 = vmatmul.bf16.vlgmr.msra.gmra.mxu1 %v734_v54  ;;  %477 = vmatmul.bf16.vlgmr.msra.gmra.mxu3 %v363_v55 }
  0xc8   : > { %v455_v58 = vpop.f32.mrf.mxu0 }
  0xc9   : > { %v482_v59 = vadd.f32 %v455_v58, %v331_v56  ;;  %v473_v60 = vpop.f32.mrf.mxu1 }
  0xca   : > { %v483_v61 = vadd.f32 %v473_v60, %v332_v57 }
  0xcb   : > { %488 = vst [vmem:[#allocation2 + $0x28] sm:$0xff] %v482_v59 }
  0xcc   : > { %489 = vst [vmem:[#allocation2 + $0x10] sm:$0xff] %v483_v61 }
  0xce   : > { %v460_v0 = vpop.f32.mrf.mxu2 }
  0xcf   : > { %v486_v2 = vadd.f32 %v460_v0, %v335_v62  ;;  %v478_v3 = vpop.f32.mrf.mxu3 }
  0xd0   : > { %v487_v5 = vadd.f32 %v478_v3, %v336_v63  ;;  %v457_v6 = vpop.f32.mrf.mxu0 }
  0xd1   : > { %492 = vst [vmem:[#allocation2 + $0x18] sm:$0xff] %v486_v2  ;;  %v484_v7 = vadd.f32 %v457_v6, %v333_v1  ;;  %v475_v8 = vpop.f32.mrf.mxu1 }
  0xd2   : > { %493 = vst [vmem:[#allocation2 + $0x20] sm:$0xff] %v487_v5  ;;  %v485_v9 = vadd.f32 %v475_v8, %v334_v4 }
  0xd3   : > { %490 = vst [vmem:[#allocation2 + $0x8] sm:$0xff] %v484_v7  ;;  %497 = sbr.rel (%p728_p11) target bundleno = 229 (0xe5), region = 81 }
  0xd4   : > { %491 = vst [vmem:[#allocation2] sm:$0xff] %v485_v9 }
  0xd6   : > { %v462_v10 = vpop.f32.mrf.mxu2 }
  0xd7   : > { %v480_v11 = vpop.f32.mrf.mxu3 }
  0xd8   : > { %v498_v12 = vld [vmem:[#allocation2 + $0x28] sm:$0xff]  ;;  %v504_v13 = vld [vmem:[%s1002_s2] sm:$0x3]  ;;  %v499_v14 = vld [vmem:[#allocation2 + $0x10] sm:$0xff] }
  0xd9   : > { %v506_v15 = vperm.slane %v504_v13, 0  ;;  %v507_v16 = vperm.slane %v504_v13, 1  ;;  %v502_v19 = vld [vmem:[#allocation2 + $0x18] sm:$0xff]  ;;  %v503_v20 = vld [vmem:[#allocation2 + $0x20] sm:$0xff] }
  0xda   : > { %v500_v17 = vld [vmem:[#allocation2 + $0x8] sm:$0xff] }
  0xdb   : > { %v501_v18 = vld [vmem:[#allocation2] sm:$0xff]  ;;  %v510_v21 = vadd.f32 %v506_v15, %v498_v12  ;;  %v511_v22 = vadd.f32 %v507_v16, %v499_v14  ;;  %v512_v23 = vadd.f32 %v506_v15, %v500_v17  ;;  %v514_v25 = vadd.f32 %v506_v15, %v502_v19 }
  0xdc   : > { %v513_v24 = vadd.f32 %v507_v16, %v501_v18  ;;  %v515_v26 = vadd.f32 %v507_v16, %v503_v20 }
  0xdd   : > { %v516_v27 = vmax.f32 %v510_v21, 0.0  ;;  %v517_v28 = vmax.f32 %v511_v22, 0.0  ;;  %v518_v29 = vmax.f32 %v512_v23, 0.0  ;;  %v520_v31 = vmax.f32 %v514_v25, 0.0 }
  0xde   : > { %v519_v30 = vmax.f32 %v513_v24, 0.0  ;;  %v521_v32 = vmax.f32 %v515_v26, 0.0 }
  0xdf   : > { %522 = vst [vmem:[%s1003_s3] sm:$0xff] %v516_v27 }
  0xe0   : > { %523 = vst [vmem:[%s1003_s3 + $0x8] sm:$0xff] %v517_v28 }
  0xe1   : > { %524 = vst [vmem:[%s1003_s3 + $0x10] sm:$0xff] %v518_v29 }
  0xe2   : > { %525 = vst [vmem:[%s1003_s3 + $0x18] sm:$0xff] %v519_v30 }
  0xe3   : > { %526 = vst [vmem:[%s1003_s3 + $0x20] sm:$0xff] %v520_v31 }
  0xe4   : > { %527 = vst [vmem:[%s1003_s3 + $0x28] sm:$0xff] %v521_v32 }
  0xe5 PF: > { %s13_s16 = sadd.s32 1, %s848_s16   ;;  %s1004_s12 = smov %s836_s13 }
  0xe6   : > { %p10_p12 = scmp.ge.s32.totalorder %s13_s16, 29   ;;  %s1005_s13 = smov %s906_s20 }
  0xe7   : > { %s1006_s14 = smov %s844_s15  ;;  %s1007_s15 = smov %s1009_s17 }
  0xe8   :  { %12 = sbr.rel (!%p10_p12) target bundleno = 3 (0x3), region = 122 }

// kernel: room_encoder_forward.18
= control target key start
LH: loop header
LB: loop body
LE: loop exit
PB: predicated region body
PF: predicated region fallthrough
CT: control target
= control target key end

     0   :  { %s156_s0 = inlined_call_operand.vmem [shape: f32[2,1,1,256], index: 0, kind: input, shape index: {}]   ;;  %s157_s1 = inlined_call_operand.vmem [shape: f32[2,6,6,256], index: 1, kind: output, shape index: {}]  }
   0x1   :  { %v8_v0 = vld [vmem:[%s156_s0] sm:$0x3]  ;;  %v9_v3 = vld [vmem:[%s156_s0 + $0x2] sm:$0x3] }
   0x2   :  { %v12_v1 = vperm.slane %v8_v0, 0  ;;  %v13_v2 = vperm.slane %v8_v0, 1  ;;  %v14_v4 = vperm.slane %v9_v3, 0  ;;  %v15_v5 = vperm.slane %v9_v3, 1 }
   0x4   :  { %40 = vst [vmem:[%s157_s1] sm:$0x3f] %v12_v1 }
   0x5   :  { %42 = vst [vmem:[%s157_s1 + $0x10] sm:$0x3f] %v12_v1 }
   0x6   :  { %44 = vst [vmem:[%s157_s1 + $0x20] sm:$0x3f] %v12_v1 }
   0x7   :  { %46 = vst [vmem:[%s157_s1 + $0x30] sm:$0x3f] %v12_v1 }
   0x8   :  { %48 = vst [vmem:[%s157_s1 + $0x40] sm:$0x3f] %v12_v1 }
   0x9   :  { %50 = vst [vmem:[%s157_s1 + $0x50] sm:$0x3f] %v12_v1 }
   0xa   :  { %41 = vst [vmem:[%s157_s1 + $0x8] sm:$0x3f] %v13_v2 }
   0xb   :  { %43 = vst [vmem:[%s157_s1 + $0x18] sm:$0x3f] %v13_v2 }
   0xc   :  { %45 = vst [vmem:[%s157_s1 + $0x28] sm:$0x3f] %v13_v2 }
   0xd   :  { %47 = vst [vmem:[%s157_s1 + $0x38] sm:$0x3f] %v13_v2 }
   0xe   :  { %49 = vst [vmem:[%s157_s1 + $0x48] sm:$0x3f] %v13_v2 }
   0xf   :  { %51 = vst [vmem:[%s157_s1 + $0x58] sm:$0x3f] %v13_v2 }
  0x10   :  { %52 = vst [vmem:[%s157_s1 + $0x60] sm:$0x3f] %v14_v4 }
  0x11   :  { %54 = vst [vmem:[%s157_s1 + $0x70] sm:$0x3f] %v14_v4 }
  0x12   :  { %56 = vst [vmem:[%s157_s1 + $0x80] sm:$0x3f] %v14_v4 }
  0x13   :  { %58 = vst [vmem:[%s157_s1 + $0x90] sm:$0x3f] %v14_v4 }
  0x14   :  { %60 = vst [vmem:[%s157_s1 + $0xa0] sm:$0x3f] %v14_v4 }
  0x15   :  { %62 = vst [vmem:[%s157_s1 + $0xb0] sm:$0x3f] %v14_v4 }
  0x16   :  { %53 = vst [vmem:[%s157_s1 + $0x68] sm:$0x3f] %v15_v5 }
  0x17   :  { %55 = vst [vmem:[%s157_s1 + $0x78] sm:$0x3f] %v15_v5 }
  0x18   :  { %57 = vst [vmem:[%s157_s1 + $0x88] sm:$0x3f] %v15_v5 }
  0x19   :  { %59 = vst [vmem:[%s157_s1 + $0x98] sm:$0x3f] %v15_v5 }
  0x1a   :  { %61 = vst [vmem:[%s157_s1 + $0xa8] sm:$0x3f] %v15_v5 }
  0x1b   :  { %63 = vst [vmem:[%s157_s1 + $0xb8] sm:$0x3f] %v15_v5 }

// kernel: room_encoder_forward.17
= control target key start
LH: loop header
LB: loop body
LE: loop exit
PB: predicated region body
PF: predicated region fallthrough
CT: control target
= control target key end

     0   :  { %v45_v15 = vlaneseq  ;;  %vm40_vm0 = vcmask 1040384   ;;  %s93_s0 = inlined_call_operand.vmem [shape: f32[2,3,3,256], index: 0, kind: input, shape index: {}]   ;;  %s94_s1 = inlined_call_operand.vmem [shape: f32[2,1,1,256], index: 1, kind: output, shape index: {}]  }
   0x1   :  { %v8_v0 = vld [vmem:[%s93_s0] sm:$0x77]  ;;  %v9_v1 = vld [vmem:[%s93_s0 + $0x8] sm:$0x77]  ;;  %v10_v2 = vld [vmem:[%s93_s0 + $0x10] sm:$0x77] }
   0x2   :  { %v14_v3 = vmax.f32 %v8_v0, %v9_v1  ;;  %v11_v4 = vld [vmem:[%s93_s0 + $0x18] sm:$0x77]  ;;  %v12_v5 = vld [vmem:[%s93_s0 + $0x20] sm:$0x77]  ;;  %v13_v6 = vld [vmem:[%s93_s0 + $0x28] sm:$0x77] }
   0x3   :  { %v15_v7 = vmax.f32 %v11_v4, %v12_v5  ;;  %vm47_vm1 = vcmp.lt.s32.totalorder %v45_v15, 256 }
   0x4   :  { %v16_v8 = vmax.f32 %v14_v3, %v10_v2 }
   0x5   :  { %v17_v9 = vmax.f32 %v15_v7, %v13_v6 }
   0x6   :  { %v55_v10 = vrot.slane %v16_v8, 9  ;;  %v57_v11 = vrot.slane %v16_v8, 10 }
   0x7   :  { %v56_v12 = vrot.slane %v17_v9, 9  ;;  %v58_v13 = vrot.slane %v17_v9, 10 }
   0x8   :  { %v26_v14 = vmax.f32 %v16_v8, %v55_v10 }
   0x9   :  { %v27_v16 = vmax.f32 %v17_v9, %v56_v12 }
   0xa   :  { %v34_v17 = vmax.f32 %v26_v14, %v57_v11 }
   0xb   :  { %v35_v18 = vmax.f32 %v27_v16, %v58_v13 }
   0xc   :  { %v38_v19 = vrot.slane %v34_v17, 3 }
   0xd   :  { %v39_v20 = vrot.slane %v35_v18, 3 }
   0xe   :  { %v41_v21 = vsel %vm40_vm0, %v34_v17, %v38_v19 }
   0xf   :  { %49 = vst.msk [vmem:[%s94_s1] sm:$0x3] %vm47_vm1, %v41_v21  ;;  %v42_v22 = vsel %vm40_vm0, %v35_v18, %v39_v20 }
  0x10   :  { %50 = vst.msk [vmem:[%s94_s1 + $0x2] sm:$0x3] %vm47_vm1, %v42_v22 }

// kernel: room_encoder_forward.16
= control target key start
LH: loop header
LB: loop body
LE: loop exit
PB: predicated region body
PF: predicated region fallthrough
CT: control target
= control target key end

     0   :  { %s1076_s12 = smov 0   ;;  %s1078_s13 = smov 0   ;;  %s1237_s0 = inlined_call_operand.vmem [shape: bf16[24,2304], index: 0, kind: input, shape index: {}]   ;;  %s1238_s1 = inlined_call_operand.vmem [shape: bf16[2304,256], index: 1, kind: input, shape index: {}]   ;;  %s1239_s2 = inlined_call_operand.vmem [shape: f32[1,256], index: 2, kind: input, shape index: {}]   ;;  %s1240_s3 = inlined_call_operand.vmem [shape: f32[24,256], index: 3, kind: output, shape index: {}]  }
   0x1   :  { %s1080_s14 = smov 0   ;;  %s1082_s15 = smov 0  }
   0x2   :  { %s1084_s16 = smov 0  }
   0x3 LB: > { %s25_s17 = sadd.s32 1, %s1049_s15  ;;  %p48_p1 = scmp.ne.s32.totalorder %s1041_s13, %s1037_s12  ;;  %s1053_s16 = sphi %s1084_s16, %s13_s16   ;;  %s1049_s15 = sphi %s1082_s15, %s1244_s15   ;;  %s1045_s14 = sphi %s1080_s14, %s1243_s14   ;;  %s1041_s13 = sphi %s1078_s13, %s1242_s13   ;;  %s1037_s12 = sphi %s1076_s12, %s1241_s12  }
   0x4   : > { %p26_p0 = scmp.ge.s32.totalorder %s25_s17, 9  ;;  %p49_p2 = scmp.eq.s32.totalorder %s1053_s16, 0 }
   0x5   : > { %s41_s19 = sadd.s32 1, %s1041_s13  ;;  %p787_p5 = scmp.ge.s32.totalorder %s1053_s16, 9 }
   0x6   : > { %s1246_s17 = smov (%p26_p0, %s25_s17), 0  ;;  %p50_p3 = por %p49_p2, %p48_p1 }
   0x7   : > { %s37_s18 = ssub.s32 %s1049_s15, %s1246_s17  ;;  %164 = sbr.rel (%p787_p5) target bundleno = 19 (0x13), region = 20 }
   0x8   : > { %p39_p4 = scmp.eq.s32.totalorder %s37_s18, 0 }
   0xa   : > { %s1111_s20 = scalar_select %p39_p4, %s1041_s13, %s41_s19  }
   0xc   : > { %167 = sbr.rel (!%p50_p3) target bundleno = 19 (0x13), region = 24  ;;  %s169_s21 = sand.u32 (%p50_p3), 1, %s1041_s13  }
   0xd   : > { %s936_s22 = sshll.u32 (%p50_p3), %s1049_s15, 3  ;;  %s972_s23 = smul.u32 (%p50_p3), 24, %s169_s21 }
   0xe   : > { %s177_s26 = scalar_lea.vmem (%p50_p3), %s1237_s0, %s936_s22 }
   0xf   : > { %v210_v0 = vld [vmem:[%s177_s26] sm:$0xff] (%p50_p3)  ;;  %v212_v1 = vld [vmem:[%s177_s26 + $0x48] sm:$0xff] (%p50_p3)  ;;  %v214_v2 = vld [vmem:[%s177_s26 + $0x90] sm:$0xff] (%p50_p3)  ;;  %s171_s27 = scalar_lea.vmem (%p50_p3), [#allocation3], %s972_s23 }
  0x10   : > { %211 = vst [vmem:[%s171_s27] sm:$0xff] (%p50_p3), %v210_v0 }
  0x11   : > { %213 = vst [vmem:[%s171_s27 + $0x8] sm:$0xff] %v212_v1 }
  0x12   : > { %215 = vst [vmem:[%s171_s27 + $0x10] sm:$0xff] %v214_v2 }
  0x13 PF: > { %p790_p6 = scmp.ge.s32.totalorder %s1053_s16, 1  ;;  %p235_p7 = scmp.lt.s32.totalorder %s1053_s16, 10 }
  0x15   : > { %p236_p8 = pnand %p790_p6, %p235_p7 }
  0x16   : > { %s242_s28 = sand.u32 (!%p236_p8), 1, %s1037_s12   ;;  %s791_s29 = sshll.u32 (!%p236_p8), %s1045_s14, 5 }
  0x17   : > { %239 = sbr.rel (%p236_p8) target bundleno = 245 (0xf5), region = 66  ;;  %p288_p9 = scmp.lt.s32.totalorder (!%p236_p8), %s791_s29, 287 }
  0x18   : > { %s973_s30 = smul.u32 (!%p236_p8), 24, %s242_s28  ;;  %p794_p10 = scmp.ne.s32.totalorder (!%p236_p8), %s1045_s14, 0 }
  0x1a   : > { %s1128_s8 = scalar_lea.vmem (!%p236_p8), [#allocation3], %s973_s30 }
  0x1c   : > { %s1248_s29 = smov (!%p288_p9, %s791_s29), 287  ;;  %318 = sbr.rel (%p794_p10) target bundleno = 40 (0x28), region = 74 }
  0x1d   : > { %s937_s4 = sshll.u32 %s1248_s29, 3 }
  0x1e   : > { %s1126_s7 = scalar_lea.vmem %s1238_s1, %s937_s4 }
  0x21   : > { %v1055_v3 = vmov 0.0  }
  0x22   : > { %319 = vst [vmem:[#allocation2 + $0x28] sm:$0xff] %v1055_v3 }
  0x23   : > { %320 = vst [vmem:[#allocation2 + $0x10] sm:$0xff] %v1055_v3 }
  0x24   : > { %321 = vst [vmem:[#allocation2 + $0x8] sm:$0xff] %v1055_v3 }
  0x25   : > { %322 = vst [vmem:[#allocation2] sm:$0xff] %v1055_v3 }
  0x26   : > { %323 = vst [vmem:[#allocation2 + $0x18] sm:$0xff] %v1055_v3 }
  0x27   : > { %324 = vst [vmem:[#allocation2 + $0x20] sm:$0xff] %v1055_v3 }
  0x28 PF: > { %v861_v4 = vld [vmem:[%s1126_s7 + $0x70] sm:$0xf]  ;;  %v955_v5 = vld [vmem:[%s1126_s7 + $0x74] sm:$0xf0]  ;;  %v954_v9 = vld [vmem:[%s1126_s7 + $0x74] sm:$0xf] }
  0x29   : > { %v925_v6 = vld [vmem:[%s1126_s7 + $0xf0] sm:$0xf]  ;;  %v862_v7 = vor.u32 %v955_v5, %v861_v4  ;;  %v971_v8 = vld [vmem:[%s1126_s7 + $0xf4] sm:$0xf0]  ;;  %v863_v10 = vld [vmem:[%s1126_s7 + $0x78] sm:$0xf0] }
  0x2a   : > { %v926_v11 = vor.u32 %v971_v8, %v925_v6  ;;  %v866_v12 = vor.u32 %v954_v9, %v863_v10  ;;  %v970_v13 = vld [vmem:[%s1126_s7 + $0xf4] sm:$0xf]  ;;  %v927_v14 = vld [vmem:[%s1126_s7 + $0xf8] sm:$0xf0]  ;;  %v853_v15 = vld [vmem:[%s1126_s7 + $0x60] sm:$0xf] }
  0x2b   : > { %543 = vmatpush.bf16.msra.mxu0 %v862_v7  ;;  %v930_v16 = vor.u32 %v970_v13, %v927_v14  ;;  %v953_v17 = vld [vmem:[%s1126_s7 + $0x64] sm:$0xf0]  ;;  %v917_v18 = vld [vmem:[%s1126_s7 + $0xe0] sm:$0xf]  ;;  %v952_v22 = vld [vmem:[%s1126_s7 + $0x64] sm:$0xf] }
  0x2c   : > { %v969_v19 = vld [vmem:[%s1126_s7 + $0xe4] sm:$0xf0]  ;;  %561 = vmatpush.bf16.msra.mxu1 %v926_v11  ;;  %579 = vmatpush.bf16.msra.mxu2 %v866_v12  ;;  %v854_v20 = vor.u32 %v953_v17, %v853_v15  ;;  %v855_v23 = vld [vmem:[%s1126_s7 + $0x68] sm:$0xf0]  ;;  %v968_v24 = vld [vmem:[%s1126_s7 + $0xe4] sm:$0xf] }
  0x2d   : > { %v918_v21 = vor.u32 %v969_v19, %v917_v18  ;;  %597 = vmatpush.bf16.msra.mxu3 %v930_v16  ;;  %v858_v25 = vor.u32 %v952_v22, %v855_v23  ;;  %v919_v26 = vld [vmem:[%s1126_s7 + $0xe8] sm:$0xf0]  ;;  %v845_v27 = vld [vmem:[%s1126_s7 + $0x50] sm:$0xf]  ;;  %v951_v28 = vld [vmem:[%s1126_s7 + $0x54] sm:$0xf0] }
  0x2e   : > { %v922_v29 = vor.u32 %v968_v24, %v919_v26  ;;  %v909_v30 = vld [vmem:[%s1126_s7 + $0xd0] sm:$0xf]  ;;  %v967_v31 = vld [vmem:[%s1126_s7 + $0xd4] sm:$0xf0]  ;;  %v950_v32 = vld [vmem:[%s1126_s7 + $0x54] sm:$0xf]  ;;  %v846_v33 = vor.u32 %v951_v28, %v845_v27 }
  0x2f   : > { %544 = vmatpush.bf16.msra.mxu0 %v854_v20  ;;  %v847_v34 = vld [vmem:[%s1126_s7 + $0x58] sm:$0xf0]  ;;  %v966_v35 = vld [vmem:[%s1126_s7 + $0xd4] sm:$0xf]  ;;  %v910_v37 = vor.u32 %v967_v31, %v909_v30  ;;  %v837_v39 = vld [vmem:[%s1126_s7 + $0x40] sm:$0xf] }
  0x30   : > { %v911_v36 = vld [vmem:[%s1126_s7 + $0xd8] sm:$0xf0]  ;;  %562 = vmatpush.bf16.msra.mxu1 %v918_v21  ;;  %580 = vmatpush.bf16.msra.mxu2 %v858_v25  ;;  %v850_v38 = vor.u32 %v950_v32, %v847_v34  ;;  %v949_v40 = vld [vmem:[%s1126_s7 + $0x44] sm:$0xf0]  ;;  %v901_v41 = vld [vmem:[%s1126_s7 + $0xc0] sm:$0xf] }
  0x31   : > { %598 = vmatpush.bf16.msra.mxu3 %v922_v29  ;;  %v914_v42 = vor.u32 %v966_v35, %v911_v36  ;;  %v965_v43 = vld [vmem:[%s1126_s7 + $0xc4] sm:$0xf0]  ;;  %v948_v44 = vld [vmem:[%s1126_s7 + $0x44] sm:$0xf]  ;;  %v839_v45 = vld [vmem:[%s1126_s7 + $0x48] sm:$0xf0]  ;;  %v838_v48 = vor.u32 %v949_v40, %v837_v39 }
  0x32   : > { %v964_v46 = vld [vmem:[%s1126_s7 + $0xc4] sm:$0xf]  ;;  %v903_v47 = vld [vmem:[%s1126_s7 + $0xc8] sm:$0xf0]  ;;  %v902_v49 = vor.u32 %v965_v43, %v901_v41  ;;  %v842_v50 = vor.u32 %v948_v44, %v839_v45  ;;  %v829_v51 = vld [vmem:[%s1126_s7 + $0x30] sm:$0xf] }
  0x33   : > { %545 = vmatpush.bf16.msra.mxu0 %v846_v33  ;;  %v947_v52 = vld [vmem:[%s1126_s7 + $0x34] sm:$0xf0]  ;;  %v893_v53 = vld [vmem:[%s1126_s7 + $0xb0] sm:$0xf]  ;;  %v906_v54 = vor.u32 %v964_v46, %v903_v47  ;;  %v946_v56 = vld [vmem:[%s1126_s7 + $0x34] sm:$0xf] }
  0x34   : > { %563 = vmatpush.bf16.msra.mxu1 %v910_v37  ;;  %581 = vmatpush.bf16.msra.mxu2 %v850_v38  ;;  %v963_v55 = vld [vmem:[%s1126_s7 + $0xb4] sm:$0xf0]  ;;  %v831_v57 = vld [vmem:[%s1126_s7 + $0x38] sm:$0xf0]  ;;  %v962_v58 = vld [vmem:[%s1126_s7 + $0xb4] sm:$0xf]  ;;  %v830_v60 = vor.u32 %v947_v52, %v829_v51 }
  0x35   : > { %599 = vmatpush.bf16.msra.mxu3 %v914_v42  ;;  %v895_v59 = vld [vmem:[%s1126_s7 + $0xb8] sm:$0xf0]  ;;  %v894_v61 = vor.u32 %v963_v55, %v893_v53  ;;  %v834_v62 = vor.u32 %v946_v56, %v831_v57  ;;  %v821_v63 = vld [vmem:[%s1126_s7 + $0x20] sm:$0xf]  ;;  %v945_v0 = vld [vmem:[%s1126_s7 + $0x24] sm:$0xf0] }
  0x36   : > { %v885_v1 = vld [vmem:[%s1126_s7 + $0xa0] sm:$0xf]  ;;  %v898_v2 = vor.u32 %v962_v58, %v895_v59  ;;  %v961_v3 = vld [vmem:[%s1126_s7 + $0xa4] sm:$0xf0]  ;;  %v944_v4 = vld [vmem:[%s1126_s7 + $0x24] sm:$0xf]  ;;  %v822_v8 = vor.u32 %v945_v0, %v821_v63 }
  0x37   : > { %546 = vmatpush.bf16.msra.mxu0 %v838_v48  ;;  %v823_v5 = vld [vmem:[%s1126_s7 + $0x28] sm:$0xf0]  ;;  %v960_v6 = vld [vmem:[%s1126_s7 + $0xa4] sm:$0xf]  ;;  %v886_v9 = vor.u32 %v961_v3, %v885_v1  ;;  %v813_v11 = vld [vmem:[%s1126_s7 + $0x10] sm:$0xf] }
  0x38   : > { %564 = vmatpush.bf16.msra.mxu1 %v902_v49  ;;  %582 = vmatpush.bf16.msra.mxu2 %v842_v50  ;;  %v887_v7 = vld [vmem:[%s1126_s7 + $0xa8] sm:$0xf0]  ;;  %v826_v10 = vor.u32 %v944_v4, %v823_v5  ;;  %v943_v12 = vld [vmem:[%s1126_s7 + $0x14] sm:$0xf0]  ;;  %v877_v13 = vld [vmem:[%s1126_s7 + $0x90] sm:$0xf] }
  0x39   : > { %600 = vmatpush.bf16.msra.mxu3 %v906_v54  ;;  %v890_v14 = vor.u32 %v960_v6, %v887_v7  ;;  %v959_v15 = vld [vmem:[%s1126_s7 + $0x94] sm:$0xf0]  ;;  %v942_v16 = vld [vmem:[%s1126_s7 + $0x14] sm:$0xf]  ;;  %v815_v17 = vld [vmem:[%s1126_s7 + $0x18] sm:$0xf0]  ;;  %v814_v20 = vor.u32 %v943_v12, %v813_v11 }
  0x3a   : > { %v958_v18 = vld [vmem:[%s1126_s7 + $0x94] sm:$0xf]  ;;  %v879_v19 = vld [vmem:[%s1126_s7 + $0x98] sm:$0xf0]  ;;  %v878_v21 = vor.u32 %v959_v15, %v877_v13  ;;  %v818_v22 = vor.u32 %v942_v16, %v815_v17  ;;  %v805_v23 = vld [vmem:[%s1126_s7] sm:$0xf] }
  0x3b   : > { %547 = vmatpush.bf16.msra.mxu0 %v830_v60  ;;  %v941_v24 = vld [vmem:[%s1126_s7 + $0x4] sm:$0xf0]  ;;  %v869_v25 = vld [vmem:[%s1126_s7 + $0x80] sm:$0xf]  ;;  %v882_v26 = vor.u32 %v958_v18, %v879_v19  ;;  %v940_v28 = vld [vmem:[%s1126_s7 + $0x4] sm:$0xf] }
  0x3c   : > { %565 = vmatpush.bf16.msra.mxu1 %v894_v61  ;;  %583 = vmatpush.bf16.msra.mxu2 %v834_v62  ;;  %v957_v27 = vld [vmem:[%s1126_s7 + $0x84] sm:$0xf0]  ;;  %v807_v29 = vld [vmem:[%s1126_s7 + $0x8] sm:$0xf0]  ;;  %v956_v30 = vld [vmem:[%s1126_s7 + $0x84] sm:$0xf]  ;;  %v806_v32 = vor.u32 %v941_v24, %v805_v23 }
  0x3d   : > { %601 = vmatpush.bf16.msra.mxu3 %v898_v2  ;;  %v871_v31 = vld [vmem:[%s1126_s7 + $0x88] sm:$0xf0]  ;;  %v797_v33 = vld [vmem:[%s1128_s8] sm:$0xf]  ;;  %v939_v34 = vld [vmem:[%s1128_s8 + $0x4] sm:$0xf0]  ;;  %v870_v35 = vor.u32 %v957_v27, %v869_v25  ;;  %v810_v36 = vor.u32 %v940_v28, %v807_v29 }
  0x3e   : > { %v938_v37 = vld [vmem:[%s1128_s8 + $0x4] sm:$0xf]  ;;  %v799_v38 = vld [vmem:[%s1128_s8 + $0x8] sm:$0xf0]  ;;  %v874_v39 = vor.u32 %v956_v30, %v871_v31  ;;  %v798_v40 = vor.u32 %v939_v34, %v797_v33  ;;  %v333_v42 = vld [vmem:[%s1128_s8 + $0x10] sm:$0xff]  ;;  %p931_p11 = scmp.ne.s32.totalorder %s1045_s14, 8 }
  0x3f   : > { %548 = vmatpush.bf16.msra.mxu0 %v822_v8  ;;  %v802_v41 = vor.u32 %v938_v37, %v799_v38  ;;  %v373_v43 = vunpack.c.l.b16 %v333_v42  ;;  %v374_v44 = vunpack.c.h.b16 %v333_v42  ;;  %v325_v48 = vld [vmem:[#allocation2 + $0x28] sm:$0xff]  ;;  %v326_v53 = vld [vmem:[#allocation2 + $0x10] sm:$0xff]  ;;  %v328_v63 = vld [vmem:[#allocation2] sm:$0xff] }
  0x40   : > { %566 = vmatpush.bf16.msra.mxu1 %v886_v9  ;;  %584 = vmatpush.bf16.msra.mxu2 %v826_v10  ;;  %v327_v57 = vld [vmem:[#allocation2 + $0x8] sm:$0xff]  ;;  %v329_v3 = vld [vmem:[#allocation2 + $0x18] sm:$0xff]  ;;  %v330_v9 = vld [vmem:[#allocation2 + $0x20] sm:$0xff] }
  0x41   : > { %602 = vmatpush.bf16.msra.mxu3 %v890_v14  ;;  %v377_v45 = vpack.c.b16 %v373_v43, %v373_v43  ;;  %v378_v46 = vpack.c.b16 %v374_v44, %v374_v44 }
  0x43   : > { %549 = vmatpush.bf16.msra.mxu0 %v814_v20 }
  0x44   : > { %567 = vmatpush.bf16.msra.mxu1 %v878_v21  ;;  %585 = vmatpush.bf16.msra.mxu2 %v818_v22 }
  0x45   : > { %603 = vmatpush.bf16.msra.mxu3 %v882_v26 }
  0x47   : > { %550 = vmatpush.bf16.msra.mxu0 %v806_v32 }
  0x48   : > { %568 = vmatpush.bf16.msra.mxu1 %v870_v35  ;;  %586 = vmatpush.bf16.msra.mxu2 %v810_v36 }
  0x49   : > { %604 = vmatpush.bf16.msra.mxu3 %v874_v39 }
  0x4a   : > { %551 = vmatmul.bf16.vlgmr.msra.gmra.mxu0 %v798_v40 }
  0x4b   : > { %569 = vmatmul.bf16.vlgmr.msra.gmra.mxu1 %v802_v41  ;;  %587 = vmatmul.bf16.vlgmr.msra.gmra.mxu2 %v798_v40 }
  0x4c   : > { %605 = vmatmul.bf16.vlgmr.msra.gmra.mxu3 %v802_v41 }
  0x5a   : > { %556 = vmatmul.bf16.gmra.mxu0 %v377_v45 }
  0x5b   : > { %574 = vmatmul.bf16.gmra.mxu1 %v378_v46  ;;  %592 = vmatmul.bf16.gmra.mxu2 %v377_v45 }
  0x5c   : > { %610 = vmatmul.bf16.gmra.mxu3 %v378_v46 }
  0xc7   : > { %v552_v47 = vpop.f32.mrf.mxu0 }
  0xc8   : > { %v570_v49 = vpop.f32.mrf.mxu1 }
  0xc9   : > { %v571_v50 = vadd.f32 %v570_v49, %v552_v47 }
  0xcb   : > { %v615_v51 = vadd.f32 %v571_v50, %v325_v48 }
  0xcd   : > { %621 = vst [vmem:[#allocation2 + $0x28] sm:$0xff] %v615_v51 }
  0xce   : > { %v588_v52 = vpop.f32.mrf.mxu2 }
  0xcf   : > { %v606_v54 = vpop.f32.mrf.mxu3  ;;  %v554_v55 = vpop.f32.mrf.mxu0 }
  0xd0   : > { %v607_v56 = vadd.f32 %v606_v54, %v588_v52  ;;  %v572_v58 = vpop.f32.mrf.mxu1 }
  0xd1   : > { %v573_v59 = vadd.f32 %v572_v58, %v554_v55 }
  0xd2   : > { %v616_v60 = vadd.f32 %v607_v56, %v326_v53 }
  0xd3   : > { %v617_v61 = vadd.f32 %v573_v59, %v327_v57 }
  0xd4   : > { %622 = vst [vmem:[#allocation2 + $0x10] sm:$0xff] %v616_v60 }
  0xd5   : > { %623 = vst [vmem:[#allocation2 + $0x8] sm:$0xff] %v617_v61 }
  0xd6   : > { %v590_v62 = vpop.f32.mrf.mxu2 }
  0xd7   : > { %v608_v0 = vpop.f32.mrf.mxu3  ;;  %v557_v1 = vpop.f32.mrf.mxu0 }
  0xd8   : > { %v609_v2 = vadd.f32 %v608_v0, %v590_v62  ;;  %v575_v4 = vpop.f32.mrf.mxu1 }
  0xd9   : > { %v576_v5 = vadd.f32 %v575_v4, %v557_v1 }
  0xda   : > { %v618_v6 = vadd.f32 %v609_v2, %v328_v63 }
  0xdb   : > { %v619_v7 = vadd.f32 %v576_v5, %v329_v3 }
  0xdc   : > { %624 = vst [vmem:[#allocation2] sm:$0xff] %v618_v6 }
  0xdd   : > { %625 = vst [vmem:[#allocation2 + $0x18] sm:$0xff] %v619_v7 }
  0xde   : > { %v593_v8 = vpop.f32.mrf.mxu2 }
  0xdf   : > { %v611_v10 = vpop.f32.mrf.mxu3  ;;  %v559_v11 = vpop.f32.mrf.mxu0 }
  0xe0   : > { %v612_v12 = vadd.f32 %v611_v10, %v593_v8  ;;  %v577_v13 = vpop.f32.mrf.mxu1 }
  0xe2   : > { %v620_v14 = vadd.f32 %v612_v12, %v330_v9 }
  0xe3   : > { %630 = sbr.rel (%p931_p11) target bundleno = 245 (0xf5), region = 78 }
  0xe4   : > { %626 = vst [vmem:[#allocation2 + $0x20] sm:$0xff] %v620_v14 }
  0xe6   : > { %v595_v15 = vpop.f32.mrf.mxu2 }
  0xe7   : > { %v613_v16 = vpop.f32.mrf.mxu3 }
  0xe8   : > { %v631_v17 = vld [vmem:[#allocation2 + $0x28] sm:$0xff]  ;;  %v637_v18 = vld [vmem:[%s1239_s2] sm:$0x3]  ;;  %v632_v19 = vld [vmem:[#allocation2 + $0x10] sm:$0xff] }
  0xe9   : > { %v639_v20 = vperm.slane %v637_v18, 0  ;;  %v640_v21 = vperm.slane %v637_v18, 1  ;;  %v633_v22 = vld [vmem:[#allocation2 + $0x8] sm:$0xff]  ;;  %v634_v23 = vld [vmem:[#allocation2] sm:$0xff]  ;;  %v635_v24 = vld [vmem:[#allocation2 + $0x18] sm:$0xff] }
  0xeb   : > { %v636_v25 = vld [vmem:[#allocation2 + $0x20] sm:$0xff]  ;;  %v643_v26 = vadd.f32 %v639_v20, %v631_v17  ;;  %v644_v27 = vadd.f32 %v640_v21, %v632_v19  ;;  %v645_v28 = vadd.f32 %v639_v20, %v633_v22  ;;  %v646_v29 = vadd.f32 %v640_v21, %v634_v23 }
  0xec   : > { %v647_v30 = vadd.f32 %v639_v20, %v635_v24  ;;  %v648_v31 = vadd.f32 %v640_v21, %v636_v25 }
  0xed   : > { %v649_v32 = vmax.f32 %v643_v26, 0.0  ;;  %v650_v33 = vmax.f32 %v644_v27, 0.0  ;;  %v651_v34 = vmax.f32 %v645_v28, 0.0  ;;  %v652_v35 = vmax.f32 %v646_v29, 0.0 }
  0xee   : > { %v653_v36 = vmax.f32 %v647_v30, 0.0  ;;  %v654_v37 = vmax.f32 %v648_v31, 0.0 }
  0xef   : > { %655 = vst [vmem:[%s1240_s3] sm:$0xff] %v649_v32 }
  0xf0   : > { %656 = vst [vmem:[%s1240_s3 + $0x8] sm:$0xff] %v650_v33 }
  0xf1   : > { %657 = vst [vmem:[%s1240_s3 + $0x10] sm:$0xff] %v651_v34 }
  0xf2   : > { %658 = vst [vmem:[%s1240_s3 + $0x18] sm:$0xff] %v652_v35 }
  0xf3   : > { %659 = vst [vmem:[%s1240_s3 + $0x20] sm:$0xff] %v653_v36 }
  0xf4   : > { %660 = vst [vmem:[%s1240_s3 + $0x28] sm:$0xff] %v654_v37 }
  0xf5 PF: > { %s13_s16 = sadd.s32 1, %s1053_s16   ;;  %s1241_s12 = smov %s1041_s13 }
  0xf6   : > { %p10_p12 = scmp.ge.s32.totalorder %s13_s16, 11   ;;  %s1242_s13 = smov %s1111_s20 }
  0xf7   : > { %s1243_s14 = smov %s1049_s15  ;;  %s1244_s15 = smov %s1246_s17 }
  0xf8   :  { %12 = sbr.rel (!%p10_p12) target bundleno = 3 (0x3), region = 119 }

// kernel: room_encoder_forward.19
= control target key start
LH: loop header
LB: loop body
LE: loop exit
PB: predicated region body
PF: predicated region fallthrough
CT: control target
= control target key end

     0   :  { %s1532_s18 = smov 0   ;;  %s1735_s0 = inlined_call_operand.vmem [shape: bf16[8,9216], index: 0, kind: input, shape index: {}]   ;;  %s1736_s1 = inlined_call_operand.vmem [shape: bf16[9216,128], index: 1, kind: input, shape index: {}]   ;;  %s1737_s2 = inlined_call_operand.vmem [shape: f32[1,128], index: 2, kind: input, shape index: {}]   ;;  %s1738_s3 = inlined_call_operand.vmem [shape: bf16[128,256], index: 3, kind: input, shape index: {}]   ;;  %s1739_s4 = inlined_call_operand.vmem [shape: f32[1,256], index: 4, kind: input, shape index: {}]   ;;  %s1740_s5 = inlined_call_operand.vmem [shape: f32[8,256], index: 5, kind: output, shape index: {}]  }
   0x1 LB: > { %s1538_s19 = sadd.s32 4294967295, %s1499_s18   ;;  %p1074_p0 = scmp.ge.s32.totalorder %s1499_s18, 1  ;;  %s1499_s18 = sphi %s1532_s18, %s15_s18  }
   0x2   : > { %p194_p1 = scmp.lt.s32.totalorder %s1499_s18, 10 }
   0x4   : > { %p195_p2 = pnand %p1074_p0, %p194_p1 }
   0x5   : > { %s1075_s20 = sshll.u32 (!%p195_p2), %s1538_s19, 3  ;;  %s1077_s21 = sshll.u32 (!%p195_p2), %s1538_s19, 7 }
   0x6   : > { %198 = sbr.rel (%p195_p2) target bundleno = 397 (0x18d), region = 40  ;;  %p223_p3 = scmp.lt.s32.totalorder (!%p195_p2), %s1075_s20, 71 }
   0x7   : > { %p229_p4 = scmp.lt.s32.totalorder (!%p195_p2), %s1077_s21, 1151  ;;  %p1079_p5 = scmp.ne.s32.totalorder (!%p195_p2), %s1538_s19, 0 }
   0xb   : > { %s1742_s20 = smov (!%p223_p3, %s1075_s20), 71  ;;  %s1744_s21 = smov (!%p229_p4, %s1077_s21), 1151 }
   0xc   : > { %s1076_s22 = sshll.u32 %s1742_s20, 2  ;;  %s1078_s26 = sshll.u32 %s1744_s21, 2 }
   0xd   : > { %s1547_s25 = scalar_lea.vmem %s1735_s0, %s1076_s22  ;;  %s1552_s29 = scalar_lea.vmem %s1736_s1, %s1078_s26 }
   0xe   : > { %237 = sbr.rel (%p1079_p5) target bundleno = 21 (0x15), region = 44 }
  0x13   : > { %v1501_v0 = vmov 0.0  }
  0x14   : > { %238 = vst [vmem:[#allocation2] sm:$0xff] %v1501_v0 }
  0x15 PF: > { %v1410_v1 = vld [vmem:[%s1552_s29 + $0x38] sm:$0xff]  ;;  %v1409_v5 = vld [vmem:[%s1552_s29 + $0x30] sm:$0xff]  ;;  %v1408_v9 = vld [vmem:[%s1552_s29 + $0x28] sm:$0xff]  ;;  %p1336_p6 = scmp.ne.s32.totalorder %s1538_s19, 8 }
  0x16   : > { %v1418_v2 = vld [vmem:[%s1552_s29 + $0x78] sm:$0xff]  ;;  %784 = vmatpush.bf16.msra.mxu0 %v1410_v1  ;;  %v1417_v6 = vld [vmem:[%s1552_s29 + $0x70] sm:$0xff]  ;;  %v1416_v10 = vld [vmem:[%s1552_s29 + $0x68] sm:$0xff] }
  0x17   : > { %v1426_v3 = vld [vmem:[%s1552_s29 + $0xb8] sm:$0xff]  ;;  %797 = vmatpush.bf16.msra.mxu1 %v1418_v2  ;;  %v1425_v7 = vld [vmem:[%s1552_s29 + $0xb0] sm:$0xff]  ;;  %v1424_v11 = vld [vmem:[%s1552_s29 + $0xa8] sm:$0xff] }
  0x18   : > { %v1434_v4 = vld [vmem:[%s1552_s29 + $0xf8] sm:$0xff]  ;;  %810 = vmatpush.bf16.msra.mxu2 %v1426_v3  ;;  %v1433_v8 = vld [vmem:[%s1552_s29 + $0xf0] sm:$0xff]  ;;  %v1432_v12 = vld [vmem:[%s1552_s29 + $0xe8] sm:$0xff] }
  0x19   : > { %823 = vmatpush.bf16.msra.mxu3 %v1434_v4  ;;  %v1407_v13 = vld [vmem:[%s1552_s29 + $0x20] sm:$0xff]  ;;  %v1406_v17 = vld [vmem:[%s1552_s29 + $0x18] sm:$0xff]  ;;  %v1405_v21 = vld [vmem:[%s1552_s29 + $0x10] sm:$0xff] }
  0x1a   : > { %785 = vmatpush.bf16.msra.mxu0 %v1409_v5  ;;  %v1415_v14 = vld [vmem:[%s1552_s29 + $0x60] sm:$0xff]  ;;  %v1414_v18 = vld [vmem:[%s1552_s29 + $0x58] sm:$0xff]  ;;  %v1413_v22 = vld [vmem:[%s1552_s29 + $0x50] sm:$0xff] }
  0x1b   : > { %798 = vmatpush.bf16.msra.mxu1 %v1417_v6  ;;  %v1423_v15 = vld [vmem:[%s1552_s29 + $0xa0] sm:$0xff]  ;;  %v1422_v19 = vld [vmem:[%s1552_s29 + $0x98] sm:$0xff]  ;;  %v1421_v23 = vld [vmem:[%s1552_s29 + $0x90] sm:$0xff] }
  0x1c   : > { %811 = vmatpush.bf16.msra.mxu2 %v1425_v7  ;;  %v1431_v16 = vld [vmem:[%s1552_s29 + $0xe0] sm:$0xff]  ;;  %v1430_v20 = vld [vmem:[%s1552_s29 + $0xd8] sm:$0xff]  ;;  %v1429_v24 = vld [vmem:[%s1552_s29 + $0xd0] sm:$0xff] }
  0x1d   : > { %824 = vmatpush.bf16.msra.mxu3 %v1433_v8  ;;  %v1404_v25 = vld [vmem:[%s1552_s29 + $0x8] sm:$0xff]  ;;  %v240_v30 = vld [vmem:[%s1547_s25] sm:$0xff]  ;;  %v1442_v39 = vld [vmem:[%s1552_s29 + $0x138] sm:$0xff] }
  0x1e   : > { %786 = vmatpush.bf16.msra.mxu0 %v1408_v9  ;;  %v1412_v26 = vld [vmem:[%s1552_s29 + $0x48] sm:$0xff]  ;;  %v1403_v31 = vld [vmem:[%s1552_s29] sm:$0xff]  ;;  %v376_v37 = vunpack.c.l.b16 %v240_v30  ;;  %v377_v38 = vunpack.c.h.b16 %v240_v30  ;;  %v1450_v40 = vld [vmem:[%s1552_s29 + $0x178] sm:$0xff] }
  0x1f   : > { %799 = vmatpush.bf16.msra.mxu1 %v1416_v10  ;;  %v1420_v27 = vld [vmem:[%s1552_s29 + $0x88] sm:$0xff]  ;;  %v1411_v32 = vld [vmem:[%s1552_s29 + $0x40] sm:$0xff]  ;;  %v1458_v41 = vld [vmem:[%s1552_s29 + $0x1b8] sm:$0xff] }
  0x20   : > { %812 = vmatpush.bf16.msra.mxu2 %v1424_v11  ;;  %v1428_v28 = vld [vmem:[%s1552_s29 + $0xc8] sm:$0xff]  ;;  %v1419_v35 = vld [vmem:[%s1552_s29 + $0x80] sm:$0xff]  ;;  %v1466_v42 = vld [vmem:[%s1552_s29 + $0x1f8] sm:$0xff]  ;;  %v384_v45 = vpack.c.b16 %v376_v37, %v376_v37  ;;  %v385_v46 = vpack.c.b16 %v377_v38, %v377_v38 }
  0x21   : > { %825 = vmatpush.bf16.msra.mxu3 %v1432_v12  ;;  %v241_v29 = vld [vmem:[%s1547_s25 + $0x8] sm:$0xff]  ;;  %v1427_v36 = vld [vmem:[%s1552_s29 + $0xc0] sm:$0xff]  ;;  %v1441_v47 = vld [vmem:[%s1552_s29 + $0x130] sm:$0xff] }
  0x22   : > { %787 = vmatpush.bf16.msra.mxu0 %v1407_v13  ;;  %v378_v33 = vunpack.c.l.b16 %v241_v29  ;;  %v379_v34 = vunpack.c.h.b16 %v241_v29  ;;  %v1449_v48 = vld [vmem:[%s1552_s29 + $0x170] sm:$0xff]  ;;  %v1440_v51 = vld [vmem:[%s1552_s29 + $0x128] sm:$0xff]  ;;  %v1439_v55 = vld [vmem:[%s1552_s29 + $0x120] sm:$0xff] }
  0x23   : > { %800 = vmatpush.bf16.msra.mxu1 %v1415_v14  ;;  %v1457_v49 = vld [vmem:[%s1552_s29 + $0x1b0] sm:$0xff]  ;;  %v1448_v52 = vld [vmem:[%s1552_s29 + $0x168] sm:$0xff]  ;;  %v1447_v56 = vld [vmem:[%s1552_s29 + $0x160] sm:$0xff] }
  0x24   : > { %813 = vmatpush.bf16.msra.mxu2 %v1423_v15  ;;  %v386_v43 = vpack.c.b16 %v378_v33, %v378_v33  ;;  %v387_v44 = vpack.c.b16 %v379_v34, %v379_v34  ;;  %v1465_v50 = vld [vmem:[%s1552_s29 + $0x1f0] sm:$0xff]  ;;  %v1456_v53 = vld [vmem:[%s1552_s29 + $0x1a8] sm:$0xff]  ;;  %v1455_v57 = vld [vmem:[%s1552_s29 + $0x1a0] sm:$0xff] }
  0x25   : > { %826 = vmatpush.bf16.msra.mxu3 %v1431_v16  ;;  %v1464_v54 = vld [vmem:[%s1552_s29 + $0x1e8] sm:$0xff]  ;;  %v1463_v58 = vld [vmem:[%s1552_s29 + $0x1e0] sm:$0xff]  ;;  %v1438_v59 = vld [vmem:[%s1552_s29 + $0x118] sm:$0xff] }
  0x26   : > { %788 = vmatpush.bf16.msra.mxu0 %v1406_v17  ;;  %v1446_v60 = vld [vmem:[%s1552_s29 + $0x158] sm:$0xff]  ;;  %v1437_v63 = vld [vmem:[%s1552_s29 + $0x110] sm:$0xff]  ;;  %v1436_v3 = vld [vmem:[%s1552_s29 + $0x108] sm:$0xff] }
  0x27   : > { %801 = vmatpush.bf16.msra.mxu1 %v1414_v18  ;;  %v1454_v61 = vld [vmem:[%s1552_s29 + $0x198] sm:$0xff]  ;;  %v1445_v0 = vld [vmem:[%s1552_s29 + $0x150] sm:$0xff]  ;;  %v1444_v4 = vld [vmem:[%s1552_s29 + $0x148] sm:$0xff] }
  0x28   : > { %814 = vmatpush.bf16.msra.mxu2 %v1422_v19  ;;  %v1462_v62 = vld [vmem:[%s1552_s29 + $0x1d8] sm:$0xff]  ;;  %v1453_v1 = vld [vmem:[%s1552_s29 + $0x190] sm:$0xff]  ;;  %v1452_v6 = vld [vmem:[%s1552_s29 + $0x188] sm:$0xff] }
  0x29   : > { %827 = vmatpush.bf16.msra.mxu3 %v1430_v20  ;;  %v1461_v2 = vld [vmem:[%s1552_s29 + $0x1d0] sm:$0xff]  ;;  %v1460_v7 = vld [vmem:[%s1552_s29 + $0x1c8] sm:$0xff]  ;;  %v243_v8 = vld [vmem:[%s1547_s25 + $0x18] sm:$0xff] }
  0x2a   : > { %789 = vmatpush.bf16.msra.mxu0 %v1405_v21  ;;  %v242_v5 = vld [vmem:[%s1547_s25 + $0x10] sm:$0xff]  ;;  %v1435_v11 = vld [vmem:[%s1552_s29 + $0x100] sm:$0xff]  ;;  %v382_v13 = vunpack.c.l.b16 %v243_v8  ;;  %v383_v14 = vunpack.c.h.b16 %v243_v8 }
  0x2b   : > { %802 = vmatpush.bf16.msra.mxu1 %v1413_v22  ;;  %v380_v9 = vunpack.c.l.b16 %v242_v5  ;;  %v381_v10 = vunpack.c.h.b16 %v242_v5  ;;  %v1443_v12 = vld [vmem:[%s1552_s29 + $0x140] sm:$0xff] }
  0x2c   : > { %815 = vmatpush.bf16.msra.mxu2 %v1421_v23  ;;  %v1451_v15 = vld [vmem:[%s1552_s29 + $0x180] sm:$0xff]  ;;  %v390_v19 = vpack.c.b16 %v382_v13, %v382_v13  ;;  %v391_v20 = vpack.c.b16 %v383_v14, %v383_v14 }
  0x2d   : > { %828 = vmatpush.bf16.msra.mxu3 %v1429_v24  ;;  %v1459_v16 = vld [vmem:[%s1552_s29 + $0x1c0] sm:$0xff]  ;;  %v388_v17 = vpack.c.b16 %v380_v9, %v380_v9  ;;  %v389_v18 = vpack.c.b16 %v381_v10, %v381_v10 }
  0x2e   : > { %790 = vmatpush.bf16.msra.mxu0 %v1404_v25 }
  0x2f   : > { %803 = vmatpush.bf16.msra.mxu1 %v1412_v26 }
  0x30   : > { %816 = vmatpush.bf16.msra.mxu2 %v1420_v27 }
  0x31   : > { %829 = vmatpush.bf16.msra.mxu3 %v1428_v28 }
  0x32   : > { %791 = vmatpush.bf16.msra.mxu0 %v1403_v31 }
  0x33   : > { %804 = vmatpush.bf16.msra.mxu1 %v1411_v32 }
  0x34   : > { %817 = vmatpush.bf16.msra.mxu2 %v1419_v35 }
  0x35   : > { %830 = vmatpush.bf16.msra.mxu3 %v1427_v36  ;;  %792 = vmatmul.bf16.vlgmr.msra.gmra.mxu0 %v384_v45 }
  0x36   : > { %836 = vmatpush.bf16.msrb.mxu0 %v1442_v39  ;;  %805 = vmatmul.bf16.vlgmr.msra.gmra.mxu1 %v385_v46 }
  0x37   : > { %849 = vmatpush.bf16.msrb.mxu1 %v1450_v40  ;;  %818 = vmatmul.bf16.vlgmr.msra.gmra.mxu2 %v386_v43 }
  0x38   : > { %862 = vmatpush.bf16.msrb.mxu2 %v1458_v41  ;;  %831 = vmatmul.bf16.vlgmr.msra.gmra.mxu3 %v387_v44  ;;  %v239_v41 = vld [vmem:[#allocation2] sm:$0xff] }
  0x39   : > { %875 = vmatpush.bf16.msrb.mxu3 %v1466_v42 }
  0x3a   : > { %837 = vmatpush.bf16.msrb.mxu0 %v1441_v47 }
  0x3b   : > { %850 = vmatpush.bf16.msrb.mxu1 %v1449_v48 }
  0x3c   : > { %863 = vmatpush.bf16.msrb.mxu2 %v1457_v49 }
  0x3d   : > { %876 = vmatpush.bf16.msrb.mxu3 %v1465_v50 }
  0x3e   : > { %838 = vmatpush.bf16.msrb.mxu0 %v1440_v51 }
  0x3f   : > { %851 = vmatpush.bf16.msrb.mxu1 %v1448_v52 }
  0x40   : > { %864 = vmatpush.bf16.msrb.mxu2 %v1456_v53 }
  0x41   : > { %877 = vmatpush.bf16.msrb.mxu3 %v1464_v54 }
  0x42   : > { %839 = vmatpush.bf16.msrb.mxu0 %v1439_v55 }
  0x43   : > { %852 = vmatpush.bf16.msrb.mxu1 %v1447_v56 }
  0x44   : > { %865 = vmatpush.bf16.msrb.mxu2 %v1455_v57 }
  0x45   : > { %878 = vmatpush.bf16.msrb.mxu3 %v1463_v58 }
  0x46   : > { %840 = vmatpush.bf16.msrb.mxu0 %v1438_v59 }
  0x47   : > { %853 = vmatpush.bf16.msrb.mxu1 %v1446_v60 }
  0x48   : > { %866 = vmatpush.bf16.msrb.mxu2 %v1454_v61 }
  0x49   : > { %879 = vmatpush.bf16.msrb.mxu3 %v1462_v62 }
  0x4a   : > { %841 = vmatpush.bf16.msrb.mxu0 %v1437_v63 }
  0x4b   : > { %854 = vmatpush.bf16.msrb.mxu1 %v1445_v0 }
  0x4c   : > { %867 = vmatpush.bf16.msrb.mxu2 %v1453_v1 }
  0x4d   : > { %880 = vmatpush.bf16.msrb.mxu3 %v1461_v2 }
  0x4e   : > { %842 = vmatpush.bf16.msrb.mxu0 %v1436_v3 }
  0x4f   : > { %855 = vmatpush.bf16.msrb.mxu1 %v1444_v4 }
  0x50   : > { %868 = vmatpush.bf16.msrb.mxu2 %v1452_v6 }
  0x51   : > { %881 = vmatpush.bf16.msrb.mxu3 %v1460_v7 }
  0x52   : > { %843 = vmatpush.bf16.msrb.mxu0 %v1435_v11 }
  0x53   : > { %856 = vmatpush.bf16.msrb.mxu1 %v1443_v12 }
  0x54   : > { %869 = vmatpush.bf16.msrb.mxu2 %v1451_v15 }
  0x55   : > { %882 = vmatpush.bf16.msrb.mxu3 %v1459_v16  ;;  %844 = vmatmul.bf16.vlgmr.msrb.gmra.mxu0 %v388_v17 }
  0x56   : > { %857 = vmatmul.bf16.vlgmr.msrb.gmra.mxu1 %v389_v18 }
  0x57   : > { %870 = vmatmul.bf16.vlgmr.msrb.gmra.mxu2 %v390_v19 }
  0x58   : > { %883 = vmatmul.bf16.vlgmr.msrb.gmra.mxu3 %v391_v20 }
  0xb2   : > { %v793_v21 = vpop.f32.mrf.mxu0 }
  0xb3   : > { %v806_v22 = vpop.f32.mrf.mxu1 }
  0xb4   : > { %v807_v29 = vadd.f32 %v806_v22, %v793_v21 }
  0xba   : > { %v819_v23 = vpop.f32.mrf.mxu2  ;;  %v795_v25 = vpop.f32.mrf.mxu0 }
  0xbb   : > { %v832_v24 = vpop.f32.mrf.mxu3  ;;  %v808_v26 = vpop.f32.mrf.mxu1  ;;  %v820_v30 = vadd.f32 %v819_v23, %v807_v29 }
  0xbd   : > { %v833_v31 = vadd.f32 %v832_v24, %v820_v30 }
  0xc2   : > { %v821_v27 = vpop.f32.mrf.mxu2 }
  0xc3   : > { %v834_v28 = vpop.f32.mrf.mxu3 }
  0xd2   : > { %v845_v32 = vpop.f32.mrf.mxu0 }
  0xd3   : > { %v858_v33 = vpop.f32.mrf.mxu1  ;;  %v846_v34 = vadd.f32 %v845_v32, %v833_v31 }
  0xd5   : > { %v859_v35 = vadd.f32 %v858_v33, %v846_v34 }
  0xda   : > { %v871_v36 = vpop.f32.mrf.mxu2  ;;  %v847_v39 = vpop.f32.mrf.mxu0 }
  0xdb   : > { %v884_v37 = vpop.f32.mrf.mxu3  ;;  %v872_v38 = vadd.f32 %v871_v36, %v859_v35  ;;  %v860_v40 = vpop.f32.mrf.mxu1 }
  0xdd   : > { %v885_v42 = vadd.f32 %v884_v37, %v872_v38 }
  0xdf   : > { %v888_v43 = vadd.f32 %v885_v42, %v239_v41  ;;  %893 = sbr.rel (%p1336_p6) target bundleno = 397 (0x18d), region = 48 }
  0xe1   : > { %889 = vst [vmem:[#allocation2] sm:$0xff] %v888_v43 }
  0xe2   : > { %v873_v44 = vpop.f32.mrf.mxu2 }
  0xe3   : > { %v886_v45 = vpop.f32.mrf.mxu3 }
  0xe4   : > { %v1395_v46 = vld [vmem:[%s1738_s3 + $0x70] sm:$0xf]  ;;  %v1482_v47 = vld [vmem:[%s1738_s3 + $0x74] sm:$0xf0]  ;;  %v1481_v48 = vld [vmem:[%s1738_s3 + $0x74] sm:$0xf] }
  0xe5   : > { %v1396_v49 = vor.u32 %v1482_v47, %v1395_v46  ;;  %v1397_v50 = vld [vmem:[%s1738_s3 + $0x78] sm:$0xf0]  ;;  %v1387_v51 = vld [vmem:[%s1738_s3 + $0x60] sm:$0xf]  ;;  %v1480_v52 = vld [vmem:[%s1738_s3 + $0x64] sm:$0xf0] }
  0xe6   : > { %v1400_v53 = vor.u32 %v1481_v48, %v1397_v50  ;;  %v1479_v54 = vld [vmem:[%s1738_s3 + $0x64] sm:$0xf]  ;;  %v1389_v55 = vld [vmem:[%s1738_s3 + $0x68] sm:$0xf0]  ;;  %v1388_v56 = vor.u32 %v1480_v52, %v1387_v51  ;;  %v1379_v58 = vld [vmem:[%s1738_s3 + $0x50] sm:$0xf] }
  0xe7   : > { %1003 = vmatpush.bf16.msra.mxu0 %v1396_v49  ;;  %v1392_v57 = vor.u32 %v1479_v54, %v1389_v55  ;;  %v1478_v59 = vld [vmem:[%s1738_s3 + $0x54] sm:$0xf0]  ;;  %v1477_v60 = vld [vmem:[%s1738_s3 + $0x54] sm:$0xf]  ;;  %v1381_v61 = vld [vmem:[%s1738_s3 + $0x58] sm:$0xf0] }
  0xe8   : > { %1016 = vmatpush.bf16.msra.mxu1 %v1400_v53  ;;  %v1380_v62 = vor.u32 %v1478_v59, %v1379_v58  ;;  %v1384_v63 = vor.u32 %v1477_v60, %v1381_v61  ;;  %v1371_v0 = vld [vmem:[%s1738_s3 + $0x40] sm:$0xf]  ;;  %v1476_v1 = vld [vmem:[%s1738_s3 + $0x44] sm:$0xf0]  ;;  %v1475_v2 = vld [vmem:[%s1738_s3 + $0x44] sm:$0xf] }
  0xe9   : > { %v1373_v3 = vld [vmem:[%s1738_s3 + $0x48] sm:$0xf0]  ;;  %v1372_v4 = vor.u32 %v1476_v1, %v1371_v0  ;;  %v1363_v6 = vld [vmem:[%s1738_s3 + $0x30] sm:$0xf]  ;;  %v1474_v7 = vld [vmem:[%s1738_s3 + $0x34] sm:$0xf0] }
  0xea   : > { %v1376_v5 = vor.u32 %v1475_v2, %v1373_v3  ;;  %v1473_v8 = vld [vmem:[%s1738_s3 + $0x34] sm:$0xf]  ;;  %v1365_v9 = vld [vmem:[%s1738_s3 + $0x38] sm:$0xf0]  ;;  %v1364_v10 = vor.u32 %v1474_v7, %v1363_v6  ;;  %v1355_v12 = vld [vmem:[%s1738_s3 + $0x20] sm:$0xf] }
  0xeb   : > { %1004 = vmatpush.bf16.msra.mxu0 %v1388_v56  ;;  %v1368_v11 = vor.u32 %v1473_v8, %v1365_v9  ;;  %v1472_v13 = vld [vmem:[%s1738_s3 + $0x24] sm:$0xf0]  ;;  %v1471_v14 = vld [vmem:[%s1738_s3 + $0x24] sm:$0xf]  ;;  %v1357_v15 = vld [vmem:[%s1738_s3 + $0x28] sm:$0xf0] }
  0xec   : > { %1017 = vmatpush.bf16.msra.mxu1 %v1392_v57  ;;  %v1356_v16 = vor.u32 %v1472_v13, %v1355_v12  ;;  %v1360_v17 = vor.u32 %v1471_v14, %v1357_v15  ;;  %v1347_v18 = vld [vmem:[%s1738_s3 + $0x10] sm:$0xf]  ;;  %v1470_v19 = vld [vmem:[%s1738_s3 + $0x14] sm:$0xf0]  ;;  %v1469_v20 = vld [vmem:[%s1738_s3 + $0x14] sm:$0xf] }
  0xed   : > { %v1349_v21 = vld [vmem:[%s1738_s3 + $0x18] sm:$0xf0]  ;;  %v1492_v22 = vld [vmem:[%s1737_s2] ss:$0 sm:$0xff]  ;;  %v1348_v23 = vor.u32 %v1470_v19, %v1347_v18  ;;  %v1468_v27 = vld [vmem:[%s1738_s3 + $0x4] sm:$0xf0] }
  0xee   : > { %v894_v24 = vld [vmem:[#allocation2] sm:$0xff]  ;;  %v1352_v25 = vor.u32 %v1469_v20, %v1349_v21  ;;  %v1341_v29 = vld [vmem:[%s1738_s3 + $0x8] sm:$0xf0] }
  0xef   : > { %1005 = vmatpush.bf16.msra.mxu0 %v1380_v62  ;;  %v1339_v26 = vld [vmem:[%s1738_s3] sm:$0xf]  ;;  %v1467_v28 = vld [vmem:[%s1738_s3 + $0x4] sm:$0xf]  ;;  %v899_v30 = vadd.f32 %v1492_v22, %v894_v24 }
  0xf0   : > { %1018 = vmatpush.bf16.msra.mxu1 %v1384_v63  ;;  %v1340_v31 = vor.u32 %v1468_v27, %v1339_v26  ;;  %v1344_v32 = vor.u32 %v1467_v28, %v1341_v29  ;;  %v917_v34 = vld [vmem:[%s1739_s4] sm:$0x3] }
  0xf1   : > { %v900_v33 = vpack.c.bf16 %v899_v30, %v899_v30  ;;  %v919_v35 = vperm.slane %v917_v34, 0  ;;  %v920_v36 = vperm.slane %v917_v34, 1 }
  0xf3   : > { %1006 = vmatpush.bf16.msra.mxu0 %v1372_v4 }
  0xf4   : > { %1019 = vmatpush.bf16.msra.mxu1 %v1376_v5 }
  0xf7   : > { %1007 = vmatpush.bf16.msra.mxu0 %v1364_v10 }
  0xf8   : > { %1020 = vmatpush.bf16.msra.mxu1 %v1368_v11 }
  0xfb   : > { %1008 = vmatpush.bf16.msra.mxu0 %v1356_v16 }
  0xfc   : > { %1021 = vmatpush.bf16.msra.mxu1 %v1360_v17 }
  0xff   : > { %1009 = vmatpush.bf16.msra.mxu0 %v1348_v23 }
 0x100   : > { %1022 = vmatpush.bf16.msra.mxu1 %v1352_v25 }
 0x103   : > { %1010 = vmatpush.bf16.msra.mxu0 %v1340_v31 }
 0x104   : > { %1023 = vmatpush.bf16.msra.mxu1 %v1344_v32 }
 0x106   : > { %1011 = vmatmul.bf16.vlgmr.msra.gmra.mxu0 %v900_v33 }
 0x107   : > { %1024 = vmatmul.bf16.vlgmr.msra.gmra.mxu1 %v900_v33 }
 0x183   : > { %v1012_v37 = vpop.f32.mrf.mxu0 }
 0x184   : > { %v1013_v38 = vadd.f32 %v1012_v37, %v919_v35  ;;  %v1025_v39 = vpop.f32.mrf.mxu1 }
 0x185   : > { %v1026_v40 = vadd.f32 %v1025_v39, %v920_v36 }
 0x186   : > { %1029 = vst [vmem:[%s1740_s5] sm:$0xff] %v1013_v38 }
 0x187   : > { %1030 = vst [vmem:[%s1740_s5 + $0x8] sm:$0xff] %v1026_v40 }
 0x18b   : > { %v1014_v41 = vpop.f32.mrf.mxu0 }
 0x18c   : > { %v1027_v42 = vpop.f32.mrf.mxu1 }
 0x18d PF: > { %s15_s18 = sadd.s32 1, %s1499_s18  }
 0x18e   : > { %p12_p7 = scmp.ge.s32.totalorder %s15_s18, 11  }
 0x190   :  { %14 = sbr.rel (!%p12_p7) target bundleno = 1 (0x1), region = 77 }

</bundles_post_ra>
